<compile_context>
chip_gen: v5e
topology: v5e:2x2
jax: 0.10.0
libtpu: 0.0.40
codegen_flags: <defaults>
</compile_context>

<pallas_src>
import functools

import jax
import jax.numpy as jnp
from jax import lax
from jax.experimental import pallas as pl
from jax.experimental.pallas import tpu as pltpu


def _head_kernel(x_ref, w_ref, o_ref, *, hp, h):
    # x_ref: (bb, T, C) f32   w_ref: (C, 3*hp) bf16   o_ref: (bb, T, h) f32
    bb, t, c = x_ref.shape

    # In-kernel f32 -> bf16 cast (hides under the MXU; avoids a wrapper HBM pass).
    # Flatten batches so the projection is one full-M MXU pass.
    x = x_ref[...].reshape(bb * t, c).astype(jnp.bfloat16)          # (M, C) bf16
    w = w_ref[...]                                                  # (C, 3hp) bf16

    # Fused QKV projection, f32 accumulation, held as bf16 to cut vreg/spill pressure.
    qkv = jnp.dot(x, w, preferred_element_type=jnp.float32).astype(jnp.bfloat16)

    q = qkv[:, 0 * hp:1 * hp].reshape(bb, t, hp)   # scale already folded into Wq
    k = qkv[:, 1 * hp:2 * hp].reshape(bb, t, hp)
    v = qkv[:, 2 * hp:3 * hp].reshape(bb, t, hp)

    # s = q @ k^T per batch (contract last axes; no explicit transpose).
    s = jnp.einsum('bqd,bkd->bqk', q, k,
                   preferred_element_type=jnp.float32)              # (bb, T, T) f32

    # Causal mask with a finite negative sentinel.
    row = lax.broadcasted_iota(jnp.int32, (t, t), 0)
    col = lax.broadcasted_iota(jnp.int32, (t, t), 1)
    s = jnp.where((col <= row)[None, :, :], s, jnp.float32(-1e30))

    # Softmax in f32; divide done as EUP reciprocal + multiply.
    m = jnp.max(s, axis=-1, keepdims=True)
    e = jnp.exp(s - m)
    denom = jnp.sum(e, axis=-1, keepdims=True)
    p = (e * pl.reciprocal(denom, approx=True)).astype(jnp.bfloat16)

    # (dropout skipped — eval mode)

    out = jnp.einsum('bqk,bkd->bqd', p, v,
                     preferred_element_type=jnp.float32)            # (bb, T, hp) f32
    # Drop the zero padding on store (lane-masked store; no post-kernel slice pass).
    o_ref[...] = out[:, :, :h].astype(o_ref.dtype)


def make_fused_qkv_weight(wq, wk, wv):
    """Init-time (once): fused, scale-folded, zero-padded (C, 3*Hp) bf16 QKV weight.

    wq, wk, wv: PyTorch-style Linear weights of shape (H, C) (bias=False).
    Returns (w_qkv, Hp).
    """
    h, c = wq.shape
    hp = max(128, ((h + 127) // 128) * 128)
    scale = float(c) ** -0.5   # NOTE: reference module scales by the embedding dim C.

    def pad(w):                # (H, C) -> (C, Hp), zero-padded columns
        return jnp.pad(jnp.transpose(w), ((0, 0), (0, hp - h)))

    # Fold the score scale into the q weight in f32 *before* the bf16 cast.
    w_qkv = jnp.concatenate([pad(wq * scale), pad(wk), pad(wv)], axis=1)
    return w_qkv.astype(jnp.bfloat16), hp


@functools.partial(jax.jit, static_argnames=("h", "hp"))
def head_forward(x, w_qkv, *, h, hp):
    """
    x:     (B, T, C) float32
    w_qkv: (C, 3*hp) bfloat16 from make_fused_qkv_weight
    returns: (B, T, h) float32  (matches the PyTorch forward in eval mode)
    """
    B, T, C = x.shape

    # Batch rows per grid step: flatten batches so each projection pass sees ~256 rows
    # (fills the 256-wide MXU M dim on v6e/v7x); keep the grid a divisor of B.
    bb = max(1, min(B, max(1, 256 // T)))
    while B % bb:
        bb -= 1
    grid = (B // bb,)

    flops = 2 * B * T * C * (3 * hp) + 4 * B * T * T * hp
    transcendentals = B * T * T
    bytes_accessed = 4 * B * T * C + 2 * C * 3 * hp + 4 * B * T * h

    kernel = functools.partial(_head_kernel, hp=hp, h=h)

    return pl.pallas_call(
        kernel,
        out_shape=jax.ShapeDtypeStruct((B, T, h), x.dtype),
        grid_spec=pltpu.PrefetchScalarGridSpec(
            num_scalar_prefetch=0,
            grid=grid,
            in_specs=[
                pl.BlockSpec((bb, T, C), lambda i: (i, 0, 0)),
                pl.BlockSpec((C, 3 * hp), lambda i: (0, 0)),
            ],
            out_specs=pl.BlockSpec((bb, T, h), lambda i: (i, 0, 0)),
        ),
        compiler_params=pltpu.CompilerParams(
            dimension_semantics=("parallel",),
        ),
        cost_estimate=pl.CostEstimate(
            flops=flops,
            transcendentals=transcendentals,
            bytes_accessed=bytes_accessed,
        ),
    )(x, w_qkv)


def head_reference(x, wq, wk, wv):
    """Pure-JAX f32 reference matching the PyTorch forward (eval mode)."""
    B, T, C = x.shape
    q = x @ wq.T
    k = x @ wk.T
    v = x @ wv.T
    s = (q @ jnp.swapaxes(k, -2, -1)) * (C ** -0.5)
    mask = jnp.tril(jnp.ones((T, T), dtype=bool))
    s = jnp.where(mask, s, -jnp.inf)
    p = jax.nn.softmax(s, axis=-1)
    return p @ v


if __name__ == "__main__":
    # Shapes consistent with the module: num_embed=384 (C), block_size>=T, head_size H.
    B, T, C, H = 2, 128, 384, 64

    key = jax.random.PRNGKey(0)
    kx, kq, kk, kv = jax.random.split(key, 4)

    x = jax.random.normal(kx, (B, T, C), dtype=jnp.float32)
    # nn.Linear(num_embed, head_size, bias=False): weight shape (head_size, num_embed)
    wq = jax.random.normal(kq, (H, C), dtype=jnp.float32) * (C ** -0.5)
    wk = jax.random.normal(kk, (H, C), dtype=jnp.float32) * (C ** -0.5)
    wv = jax.random.normal(kv, (H, C), dtype=jnp.float32) * (C ** -0.5)

    # Init-time weight fusion (done once, outside the per-call path).
    w_qkv, Hp = make_fused_qkv_weight(wq, wk, wv)

    out = head_forward(x, w_qkv, h=H, hp=Hp)
    out = jax.block_until_ready(out)

    ref = head_reference(x, wq, wk, wv)
    assert out.shape == (B, T, H), f"bad shape {out.shape}"
    # bf16 matmul inputs (f32 accumulation) -> loose tolerance vs the f32 reference.
    assert jnp.allclose(out, ref, atol=5e-2, rtol=5e-2), (
        "mismatch vs reference; max abs err = "
        f"{float(jnp.max(jnp.abs(out - ref)))}"
    )

    print("KERNEL_OK")
</pallas_src>

<mosaic_0001>
module attributes {stable_mosaic.version = 11 : i64} {
  func.func @_head_kernel(%arg0: i32, %arg1: memref<2x128x384xf32, #tpu.memory_space<vmem>>, %arg2: memref<384x384xbf16, #tpu.memory_space<vmem>>, %arg3: memref<2x128x64xf32, #tpu.memory_space<vmem>>) attributes {dimension_semantics = [#tpu.dimension_semantics<parallel>], iteration_bounds = array<i64: 1>, scalar_prefetch = 0 : i64, scratch_operands = 0 : i64, tpu.core_type = #tpu.core_type<tc>, window_params = [{transform_indices = @transform_0, window_bounds = array<i64: 2, 128, 384>}, {pipeline_mode = #tpu.pipeline_mode<synchronous>, transform_indices = @transform_1, window_bounds = array<i64: 384, 384>}, {transform_indices = @transform_2, window_bounds = array<i64: 2, 128, 64>}]} {
    %c0 = arith.constant 0 : index
    %c0_0 = arith.constant 0 : index
    %c0_1 = arith.constant 0 : index
    %0 = vector.load %arg1[%c0, %c0_0, %c0_1] : memref<2x128x384xf32, #tpu.memory_space<vmem>>, vector<2x128x384xf32>
    %1 = vector.shape_cast %0 : vector<2x128x384xf32> to vector<256x384xf32>
    %2 = arith.truncf %1 : vector<256x384xf32> to vector<256x384xbf16>
    %c0_2 = arith.constant 0 : index
    %c0_3 = arith.constant 0 : index
    %3 = vector.load %arg2[%c0_2, %c0_3] : memref<384x384xbf16, #tpu.memory_space<vmem>>, vector<384x384xbf16>
    %cst = arith.constant dense<0.000000e+00> : vector<256x384xf32>
    %4 = tpu.matmul %2, %3, %cst {dimension_numbers = #tpu.dot_dimension_numbers<[1], [0], [0], [1], [0, 0, 1, 1], [], []>} : vector<256x384xbf16>, vector<384x384xbf16>, vector<256x384xf32> -> vector<256x384xf32>
    %5 = arith.truncf %4 : vector<256x384xf32> to vector<256x384xbf16>
    %6 = vector.extract_strided_slice %5 {offsets = [0, 0], sizes = [256, 128], strides = [1, 1]} : vector<256x384xbf16> to vector<256x128xbf16>
    %7 = vector.shape_cast %6 : vector<256x128xbf16> to vector<2x128x128xbf16>
    %8 = vector.extract_strided_slice %5 {offsets = [0, 128], sizes = [256, 128], strides = [1, 1]} : vector<256x384xbf16> to vector<256x128xbf16>
    %9 = vector.shape_cast %8 : vector<256x128xbf16> to vector<2x128x128xbf16>
    %10 = vector.extract_strided_slice %5 {offsets = [0, 256], sizes = [256, 128], strides = [1, 1]} : vector<256x384xbf16> to vector<256x128xbf16>
    %11 = vector.shape_cast %10 : vector<256x128xbf16> to vector<2x128x128xbf16>
    "tpu.trace_start"() <{level = 10 : i32, message = "bqd,bkd->bqk"}> : () -> ()
    %cst_4 = arith.constant dense<0.000000e+00> : vector<2x128x128xf32>
    %12 = tpu.matmul %7, %9, %cst_4 {dimension_numbers = #tpu.dot_dimension_numbers<[2], [2], [1], [1], [0, 0, 0, 1, 1, 1], [0], [0]>} : vector<2x128x128xbf16>, vector<2x128x128xbf16>, vector<2x128x128xf32> -> vector<2x128x128xf32>
    "tpu.trace_stop"() : () -> ()
    %13 = tpu.iota {dimensions = array<i32: 0>} : vector<128x128xi32>
    %14 = tpu.iota {dimensions = array<i32: 1>} : vector<128x128xi32>
    %15 = arith.cmpi sle, %14, %13 : vector<128x128xi32>
    %16 = vector.shape_cast %15 : vector<128x128xi1> to vector<1x128x128xi1>
    %cst_5 = arith.constant -1.000000e+30 : f32
    %17 = vector.shape_cast %16 : vector<1x128x128xi1> to vector<1x128x128xi1>
    %18 = vector.broadcast %17 : vector<1x128x128xi1> to vector<2x128x128xi1>
    %19 = vector.broadcast %cst_5 : f32 to vector<2x128x128xf32>
    %20 = arith.select %18, %12, %19 : vector<2x128x128xi1>, vector<2x128x128xf32>
    %cst_6 = arith.constant dense<0xFF800000> : vector<2x128xf32>
    %21 = vector.multi_reduction <maximumf>, %20, %cst_6 [2] : vector<2x128x128xf32> to vector<2x128xf32>
    %22 = vector.shape_cast %21 : vector<2x128xf32> to vector<2x128x1xf32>
    %23 = vector.broadcast %22 : vector<2x128x1xf32> to vector<2x128x128xf32>
    %24 = arith.subf %20, %23 : vector<2x128x128xf32>
    %25 = math.exp %24 : vector<2x128x128xf32>
    %cst_7 = arith.constant dense<0.000000e+00> : vector<2x128xf32>
    %26 = vector.multi_reduction <add>, %25, %cst_7 [2] : vector<2x128x128xf32> to vector<2x128xf32>
    %27 = vector.shape_cast %26 : vector<2x128xf32> to vector<2x128x1xf32>
    %28 = tpu.reciprocal %27 {approx = true} : vector<2x128x1xf32> -> vector<2x128x1xf32>
    %29 = vector.broadcast %28 : vector<2x128x1xf32> to vector<2x128x128xf32>
    %30 = arith.mulf %25, %29 : vector<2x128x128xf32>
    %31 = arith.truncf %30 : vector<2x128x128xf32> to vector<2x128x128xbf16>
    "tpu.trace_start"() <{level = 10 : i32, message = "bqk,bkd->bqd"}> : () -> ()
    %cst_8 = arith.constant dense<0.000000e+00> : vector<2x128x128xf32>
    %32 = tpu.matmul %31, %11, %cst_8 {dimension_numbers = #tpu.dot_dimension_numbers<[2], [1], [1], [2], [0, 0, 0, 1, 1, 2], [0], [0]>} : vector<2x128x128xbf16>, vector<2x128x128xbf16>, vector<2x128x128xf32> -> vector<2x128x128xf32>
    "tpu.trace_stop"() : () -> ()
    %33 = vector.extract_strided_slice %32 {offsets = [0, 0, 0], sizes = [2, 128, 64], strides = [1, 1, 1]} : vector<2x128x128xf32> to vector<2x128x64xf32>
    %c0_9 = arith.constant 0 : index
    %c0_10 = arith.constant 0 : index
    %c0_11 = arith.constant 0 : index
    %34 = vector.load %arg3[%c0_9, %c0_10, %c0_11] : memref<2x128x64xf32, #tpu.memory_space<vmem>>, vector<2x128x64xf32>
    tpu.vector_store %arg3[%c0_9, %c0_10, %c0_11], %33 {strides = array<i32>} : memref<2x128x64xf32, #tpu.memory_space<vmem>>, vector<2x128x64xf32>,
    return
  }
  func.func @transform_0(%arg0: i32) -> (i32, i32, i32) {
    %c0_i32 = arith.constant 0 : i32
    %c0_i32_0 = arith.constant 0 : i32
    %c0_i32_1 = arith.constant 0 : i32
    return %arg0, %c0_i32, %c0_i32_0 : i32, i32, i32
  }
  func.func @transform_1(%arg0: i32) -> (i32, i32) {
    %c0_i32 = arith.constant 0 : i32
    %c0_i32_0 = arith.constant 0 : i32
    %c0_i32_1 = arith.constant 0 : i32
    return %c0_i32, %c0_i32_0 : i32, i32
  }
  func.func @transform_2(%arg0: i32) -> (i32, i32, i32) {
    %c0_i32 = arith.constant 0 : i32
    %c0_i32_0 = arith.constant 0 : i32
    %c0_i32_1 = arith.constant 0 : i32
    return %arg0, %c0_i32, %c0_i32_0 : i32, i32, i32
  }
}

</mosaic_0001>

<bundles_post_ra>
// kernel: head_forward.1
= control target key start
LH: loop header
LB: loop body
LE: loop exit
PB: predicated region body
PF: predicated region fallthrough
CT: control target
= control target key end

     0   :  { %7 = vsyncpa [#allocation3], 0  ;;  %s4626_s0 = inlined_call_operand.hbm [shape: f32[2,128,384], index: 0, kind: input, shape index: {}]   ;;  %s4627_s1 = inlined_call_operand.hbm [shape: bf16[384,384], index: 1, kind: input, shape index: {}]   ;;  %s4628_s2 = inlined_call_operand.vmem [shape: f32[2,128,64], index: 2, kind: output, shape index: {}]  }
   0x1   :  { %s13_s11 = sshll.u32 %s4626_s0, 4  ;;  %s14_s11 = int_to_ptr.hbm [resolvable:$true] %s13_s11 }
   0x2   :  { %8 = vsyncpa [#allocation5], 0  ;;  %s3132_s12 = smov [#allocation2]   ;;  %s26_s16 = sshll.u32 %s4627_s1, 4  ;;  %s27_s16 = int_to_ptr.hbm [resolvable:$true] %s26_s16 }
   0x3   :  { %s15_s13 = sshll.u32 %s3132_s12, 4  ;;  %s3133_s17 = smov 384   ;;  %s16_s13 = int_to_ptr.vmem [resolvable:$true] %s15_s13 }
   0x4   :  { %s3134_s18 = smov 24   ;;  %s3135_s19 = smov [#allocation4]  }
   0x5   :  { %21 = dma.hbm_to_vmem [thread:$0]  %s14_s11, 12288, %s16_s13, [#allocation3], %s3133_s17, %s3133_s17, %s3134_s18  }
   0x6   :  { %s28_s20 = sshll.u32 %s3135_s19, 4  ;;  %s3136_s21 = smov 192   ;;  %s29_s20 = int_to_ptr.vmem [resolvable:$true] %s28_s20 }
   0x7   :  { %s3137_s22 = smov 12  }
   0x8   :  { %34 = dma.hbm_to_vmem [thread:$0]  %s27_s16, 9216, %s29_s20, [#allocation5], %s3136_s21, %s3136_s21, %s3137_s22  }
   0x9   :  { %3128 = dma.done.wait [#allocation3], 12288  }
   0xa   :  { %3129 = vsyncadd [#allocation3], 4294955008 }
   0xb   :  { %3130 = dma.done.wait [#allocation5], 9216  }
   0xc   :  { %3131 = vsyncadd [#allocation5], 4294958080  ;;  %v2656_v0 = vld [vmem:[#allocation4 + $0xa8] sm:$0xf]  ;;  %v2880_v1 = vld [vmem:[#allocation4 + $0xb0] sm:$0xf0] }
   0xd   :  { %v2752_v2 = vld [vmem:[#allocation4 + $0x168] sm:$0xf]  ;;  %v2657_v3 = vor.u32 %v2880_v1, %v2656_v0  ;;  %v2904_v4 = vld [vmem:[#allocation4 + $0x170] sm:$0xf0]  ;;  %v2644_v5 = vld [vmem:[#allocation4 + $0x90] sm:$0xf] }
   0xe   :  { %v2877_v6 = vld [vmem:[#allocation4 + $0x98] sm:$0xf0]  ;;  %v2753_v7 = vor.u32 %v2904_v4, %v2752_v2  ;;  %v2740_v8 = vld [vmem:[#allocation4 + $0x150] sm:$0xf]  ;;  %v2632_v12 = vld [vmem:[#allocation4 + $0x78] sm:$0xf] }
   0xf   :  { %v2901_v9 = vld [vmem:[#allocation4 + $0x158] sm:$0xf0]  ;;  %667 = vmatpush.bf16.msra.mxu0 %v2657_v3  ;;  %2930 = vmatpush.bf16.msra.mxu2 %v2657_v3  ;;  %v2645_v10 = vor.u32 %v2877_v6, %v2644_v5  ;;  %v2874_v13 = vld [vmem:[#allocation4 + $0x80] sm:$0xf0]  ;;  %v2728_v14 = vld [vmem:[#allocation4 + $0x138] sm:$0xf] }
  0x10   :  { %756 = vmatpush.bf16.msra.mxu1 %v2753_v7  ;;  %v2741_v11 = vor.u32 %v2901_v9, %v2740_v8  ;;  %2938 = vmatpush.bf16.msra.mxu3 %v2753_v7  ;;  %v2898_v15 = vld [vmem:[#allocation4 + $0x140] sm:$0xf0]  ;;  %v2633_v16 = vor.u32 %v2874_v13, %v2632_v12  ;;  %v2620_v18 = vld [vmem:[#allocation4 + $0x60] sm:$0xf]  ;;  %v2871_v19 = vld [vmem:[#allocation4 + $0x68] sm:$0xf0] }
  0x11   :  { %v2729_v17 = vor.u32 %v2898_v15, %v2728_v14  ;;  %v2716_v20 = vld [vmem:[#allocation4 + $0x120] sm:$0xf]  ;;  %v2895_v21 = vld [vmem:[#allocation4 + $0x128] sm:$0xf0]  ;;  %v2621_v22 = vor.u32 %v2871_v19, %v2620_v18  ;;  %v2608_v24 = vld [vmem:[#allocation4 + $0x48] sm:$0xf] }
  0x12   :  { %v2717_v23 = vor.u32 %v2895_v21, %v2716_v20  ;;  %v2868_v25 = vld [vmem:[#allocation4 + $0x50] sm:$0xf0]  ;;  %v2704_v26 = vld [vmem:[#allocation4 + $0x108] sm:$0xf]  ;;  %v2596_v30 = vld [vmem:[#allocation4 + $0x30] sm:$0xf] }
  0x13   :  { %668 = vmatpush.bf16.msra.mxu0 %v2645_v10  ;;  %2931 = vmatpush.bf16.msra.mxu2 %v2645_v10  ;;  %v2892_v27 = vld [vmem:[#allocation4 + $0x110] sm:$0xf0]  ;;  %v2609_v28 = vor.u32 %v2868_v25, %v2608_v24  ;;  %v2865_v31 = vld [vmem:[#allocation4 + $0x38] sm:$0xf0]  ;;  %v2692_v32 = vld [vmem:[#allocation4 + $0xf0] sm:$0xf] }
  0x14   :  { %757 = vmatpush.bf16.msra.mxu1 %v2741_v11  ;;  %2939 = vmatpush.bf16.msra.mxu3 %v2741_v11  ;;  %v2705_v29 = vor.u32 %v2892_v27, %v2704_v26  ;;  %v2889_v33 = vld [vmem:[#allocation4 + $0xf8] sm:$0xf0]  ;;  %v2597_v34 = vor.u32 %v2865_v31, %v2596_v30  ;;  %v2584_v36 = vld [vmem:[#allocation4 + $0x18] sm:$0xf]  ;;  %v2862_v37 = vld [vmem:[#allocation4 + $0x20] sm:$0xf0] }
  0x15   :  { %v2693_v35 = vor.u32 %v2889_v33, %v2692_v32  ;;  %v2680_v38 = vld [vmem:[#allocation4 + $0xd8] sm:$0xf]  ;;  %v2886_v39 = vld [vmem:[#allocation4 + $0xe0] sm:$0xf0]  ;;  %v2585_v40 = vor.u32 %v2862_v37, %v2584_v36  ;;  %v2572_v42 = vld [vmem:[#allocation4] sm:$0xf] }
  0x16   :  { %v2681_v41 = vor.u32 %v2886_v39, %v2680_v38  ;;  %v2859_v43 = vld [vmem:[#allocation4 + $0x8] sm:$0xf0]  ;;  %v2668_v44 = vld [vmem:[#allocation4 + $0xc0] sm:$0xf]  ;;  %v46_v48 = vld [vmem:[#allocation2 + $0x18] sm:$0xff] }
  0x17   :  { %669 = vmatpush.bf16.msra.mxu0 %v2633_v16  ;;  %2932 = vmatpush.bf16.msra.mxu2 %v2633_v16  ;;  %v2883_v45 = vld [vmem:[#allocation4 + $0xc8] sm:$0xf0]  ;;  %v43_v46 = vld [vmem:[#allocation2] sm:$0xff]  ;;  %v2573_v47 = vor.u32 %v2859_v43, %v2572_v42  ;;  %v118_v50 = vld [vmem:[#allocation2 + $0x258] sm:$0xff] }
  0x18   :  { %758 = vmatpush.bf16.msra.mxu1 %v2729_v17  ;;  %2940 = vmatpush.bf16.msra.mxu3 %v2729_v17  ;;  %v115_v49 = vld [vmem:[#allocation2 + $0x240] sm:$0xff]  ;;  %v2669_v51 = vor.u32 %v2883_v45, %v2668_v44  ;;  %v44_v52 = vld [vmem:[#allocation2 + $0x8] sm:$0xff]  ;;  %v3159_v54 = vpack.c.bf16 %v46_v48, %v43_v46  ;;  %v2928_v58 = vld [vmem:[#allocation4 + $0x230] sm:$0xf0] }
  0x19   :  { %v47_v53 = vld [vmem:[#allocation2 + $0x20] sm:$0xff]  ;;  %v3161_v55 = vpack.c.bf16 %v118_v50, %v115_v49  ;;  %v2848_v57 = vld [vmem:[#allocation4 + $0x228] sm:$0xf]  ;;  %v2836_v60 = vld [vmem:[#allocation4 + $0x210] sm:$0xf] }
  0x1a   :  { %v3163_v56 = vpack.c.bf16 %v47_v53, %v44_v52  ;;  %v2849_v59 = vor.u32 %v2928_v58, %v2848_v57  ;;  %v2925_v61 = vld [vmem:[#allocation4 + $0x218] sm:$0xf0]  ;;  %v2824_v63 = vld [vmem:[#allocation4 + $0x1f8] sm:$0xf]  ;;  %v2922_v0 = vld [vmem:[#allocation4 + $0x200] sm:$0xf0] }
  0x1b   :  { %670 = vmatpush.bf16.msra.mxu0 %v2621_v22  ;;  %2933 = vmatpush.bf16.msra.mxu2 %v2621_v22  ;;  %4678 = vst [vmem:[#allocation8_spill] sm:$0xff] %v3161_v55  ;;  %v2837_v62 = vor.u32 %v2925_v61, %v2836_v60  ;;  %v2825_v1 = vor.u32 %v2922_v0, %v2824_v63  ;;  %v2812_v2 = vld [vmem:[#allocation4 + $0x1e0] sm:$0xf]  ;;  %v2919_v3 = vld [vmem:[#allocation4 + $0x1e8] sm:$0xf0]  ;;  %v49_v4 = vld [vmem:[#allocation2 + $0x30] sm:$0xff] }
  0x1c   :  { %759 = vmatpush.bf16.msra.mxu1 %v2717_v23  ;;  %2941 = vmatpush.bf16.msra.mxu3 %v2717_v23  ;;  %v52_v5 = vld [vmem:[#allocation2 + $0x48] sm:$0xff]  ;;  %v121_v6 = vld [vmem:[#allocation2 + $0x270] sm:$0xff]  ;;  %v50_v8 = vld [vmem:[#allocation2 + $0x38] sm:$0xff]  ;;  %v2813_v10 = vor.u32 %v2919_v3, %v2812_v2 }
  0x1d   :  { %v124_v7 = vld [vmem:[#allocation2 + $0x288] sm:$0xff]  ;;  %v53_v9 = vld [vmem:[#allocation2 + $0x50] sm:$0xff]  ;;  %v3168_v11 = vpack.c.bf16 %v52_v5, %v49_v4  ;;  %v2913_v18 = vld [vmem:[#allocation4 + $0x1b8] sm:$0xf0] }
  0x1e   :  { %v3170_v12 = vpack.c.bf16 %v124_v7, %v121_v6  ;;  %v3172_v13 = vpack.c.bf16 %v53_v9, %v50_v8  ;;  %v2800_v14 = vld [vmem:[#allocation4 + $0x1c8] sm:$0xf]  ;;  %v2916_v15 = vld [vmem:[#allocation4 + $0x1d0] sm:$0xf0]  ;;  %v2788_v17 = vld [vmem:[#allocation4 + $0x1b0] sm:$0xf] }
  0x1f   :  { %671 = vmatpush.bf16.msra.mxu0 %v2609_v28  ;;  %2934 = vmatpush.bf16.msra.mxu2 %v2609_v28  ;;  %v2801_v16 = vor.u32 %v2916_v15, %v2800_v14  ;;  %v2789_v19 = vor.u32 %v2913_v18, %v2788_v17  ;;  %v2776_v20 = vld [vmem:[#allocation4 + $0x198] sm:$0xf]  ;;  %v2910_v21 = vld [vmem:[#allocation4 + $0x1a0] sm:$0xf0]  ;;  %v2764_v23 = vld [vmem:[#allocation4 + $0x180] sm:$0xf] }
  0x20   :  { %760 = vmatpush.bf16.msra.mxu1 %v2705_v29  ;;  %2942 = vmatpush.bf16.msra.mxu3 %v2705_v29  ;;  %4679 = vst [vmem:[#allocation9_spill] sm:$0xff] %v3170_v12  ;;  %v2777_v22 = vor.u32 %v2910_v21, %v2776_v20  ;;  %v2907_v24 = vld [vmem:[#allocation4 + $0x188] sm:$0xf0]  ;;  %v119_v26 = vld [vmem:[#allocation2 + $0x260] sm:$0xff]  ;;  %v58_v29 = vld [vmem:[#allocation2 + $0x78] sm:$0xff] }
  0x21   :  { %v116_v25 = vld [vmem:[#allocation2 + $0x248] sm:$0xff]  ;;  %v55_v27 = vld [vmem:[#allocation2 + $0x60] sm:$0xff]  ;;  %v130_v31 = vld [vmem:[#allocation2 + $0x2b8] sm:$0xff] }
  0x22   :  { %v3177_v28 = vpack.c.bf16 %v119_v26, %v116_v25  ;;  %v127_v30 = vld [vmem:[#allocation2 + $0x2a0] sm:$0xff]  ;;  %v56_v32 = vld [vmem:[#allocation2 + $0x68] sm:$0xff]  ;;  %v122_v38 = vld [vmem:[#allocation2 + $0x278] sm:$0xff] }
  0x23   :  { %672 = vmatpush.bf16.msra.mxu0 %v2597_v34  ;;  %2935 = vmatpush.bf16.msra.mxu2 %v2597_v34  ;;  %v59_v33 = vld [vmem:[#allocation2 + $0x80] sm:$0xff]  ;;  %v2765_v34 = vor.u32 %v2907_v24, %v2764_v23  ;;  %v3182_v36 = vpack.c.bf16 %v130_v31, %v127_v30  ;;  %v125_v39 = vld [vmem:[#allocation2 + $0x290] sm:$0xff]  ;;  %v64_v42 = vld [vmem:[#allocation2 + $0xa8] sm:$0xff] }
  0x24   :  { %761 = vmatpush.bf16.msra.mxu1 %v2693_v35  ;;  %2943 = vmatpush.bf16.msra.mxu3 %v2693_v35  ;;  %4680 = vst [vmem:[#allocation10_spill] sm:$0xff] %v3177_v28  ;;  %v3180_v35 = vpack.c.bf16 %v58_v29, %v55_v27  ;;  %v3184_v37 = vpack.c.bf16 %v59_v33, %v56_v32  ;;  %v133_v43 = vld [vmem:[#allocation2 + $0x2d0] sm:$0xff]  ;;  %v136_v44 = vld [vmem:[#allocation2 + $0x2e8] sm:$0xff]  ;;  %v62_v45 = vld [vmem:[#allocation2 + $0x98] sm:$0xff] }
  0x25   :  { %4681 = vst [vmem:[#allocation11_spill] sm:$0xff] %v3182_v36  ;;  %v65_v46 = vld [vmem:[#allocation2 + $0xb0] sm:$0xff]  ;;  %v3194_v48 = vpack.c.bf16 %v136_v44, %v133_v43  ;;  %v128_v50 = vld [vmem:[#allocation2 + $0x2a8] sm:$0xff]  ;;  %v67_v52 = vld [vmem:[#allocation2 + $0xc0] sm:$0xff] }
  0x26   :  { %v3196_v49 = vpack.c.bf16 %v65_v46, %v62_v45  ;;  %v2879_v57 = vld [vmem:[#allocation4 + $0xac] sm:$0xf]  ;;  %v2658_v58 = vld [vmem:[#allocation4 + $0xb4] sm:$0xf0]  ;;  %v45_v60 = vld [vmem:[#allocation2 + $0x10] sm:$0xff] }
  0x27   :  { %673 = vmatpush.bf16.msra.mxu0 %v2585_v40  ;;  %2936 = vmatpush.bf16.msra.mxu2 %v2585_v40  ;;  %v61_v40 = vld [vmem:[#allocation2 + $0x90] sm:$0xff]  ;;  %4683 = vst [vmem:[#allocation13_spill] sm:$0xff] %v3194_v48  ;;  %v48_v61 = vld [vmem:[#allocation2 + $0x28] sm:$0xff]  ;;  %v71_v0 = vld [vmem:[#allocation2 + $0xe0] sm:$0xff] }
  0x28   :  { %762 = vmatpush.bf16.msra.mxu1 %v2681_v41  ;;  %2944 = vmatpush.bf16.msra.mxu3 %v2681_v41  ;;  %v3189_v41 = vpack.c.bf16 %v125_v39, %v122_v38  ;;  %v68_v63 = vld [vmem:[#allocation2 + $0xc8] sm:$0xff]  ;;  %v3206_v2 = vpack.c.bf16 %v48_v61, %v45_v60  ;;  %v2876_v3 = vld [vmem:[#allocation4 + $0x94] sm:$0xf]  ;;  %v2646_v4 = vld [vmem:[#allocation4 + $0x9c] sm:$0xf0] }
  0x29   :  { %v3208_v5 = vpack.c.bf16 %v71_v0, %v68_v63  ;;  %v2649_v6 = vor.u32 %v2876_v3, %v2646_v4  ;;  %v2873_v7 = vld [vmem:[#allocation4 + $0x7c] sm:$0xf]  ;;  %v2634_v8 = vld [vmem:[#allocation4 + $0x84] sm:$0xf0]  ;;  %v2622_v14 = vld [vmem:[#allocation4 + $0x6c] sm:$0xf0] }
  0x2a   :  { %4682 = vst [vmem:[#allocation12_spill] sm:$0xff] %v3189_v41  ;;  %v2637_v9 = vor.u32 %v2873_v7, %v2634_v8  ;;  %v137_v17 = vld [vmem:[#allocation2 + $0x2f0] sm:$0xff]  ;;  %v2867_v20 = vld [vmem:[#allocation4 + $0x4c] sm:$0xf]  ;;  %v2610_v21 = vld [vmem:[#allocation4 + $0x54] sm:$0xf0] }
  0x2b   :  { %674 = vmatpush.bf16.msra.mxu0 %v2573_v47  ;;  %2937 = vmatpush.bf16.msra.mxu2 %v2573_v47  ;;  %v3192_v47 = vpack.c.bf16 %v64_v42, %v61_v40  ;;  %4686 = vst [vmem:[#allocation16_spill] sm:$0xff] %v3206_v2  ;;  %v73_v18 = vld [vmem:[#allocation2 + $0xf0] sm:$0xff]  ;;  %v51_v23 = vld [vmem:[#allocation2 + $0x40] sm:$0xff]  ;;  %v54_v24 = vld [vmem:[#allocation2 + $0x58] sm:$0xff]  ;;  %v2613_v25 = vor.u32 %v2867_v20, %v2610_v21 }
  0x2c   :  { %763 = vmatpush.bf16.msra.mxu1 %v2669_v51  ;;  %2945 = vmatpush.bf16.msra.mxu3 %v2669_v51  ;;  %v131_v51 = vld [vmem:[#allocation2 + $0x2c0] sm:$0xff]  ;;  %4687 = vst [vmem:[#allocation17_spill] sm:$0xff] %v3208_v5  ;;  %v74_v26 = vld [vmem:[#allocation2 + $0xf8] sm:$0xff]  ;;  %v77_v27 = vld [vmem:[#allocation2 + $0x110] sm:$0xff]  ;;  %v3218_v30 = vpack.c.bf16 %v54_v24, %v51_v23 }
  0x2d   :  { %v3201_v53 = vpack.c.bf16 %v131_v51, %v128_v50  ;;  %v2864_v31 = vld [vmem:[#allocation4 + $0x34] sm:$0xf]  ;;  %v2598_v32 = vld [vmem:[#allocation4 + $0x3c] sm:$0xf0]  ;;  %v3220_v33 = vpack.c.bf16 %v77_v27, %v74_v26  ;;  %v2861_v38 = vld [vmem:[#allocation4 + $0x1c] sm:$0xf] }
  0x2e   :  { %675 = vmatmul.bf16.vlgmr.msra.gmra.mxu0 %v3159_v54  ;;  %735 = vmatmul.bf16.vlgmr.msra.gmra.mxu2 %v3161_v55  ;;  %4690 = vst [vmem:[#allocation20_spill] sm:$0xff] %v3218_v30  ;;  %v2586_v39 = vld [vmem:[#allocation4 + $0x24] sm:$0xf0]  ;;  %v2858_v42 = vld [vmem:[#allocation4 + $0x4] sm:$0xf]  ;;  %v82_v46 = vld [vmem:[#allocation2 + $0x138] sm:$0xff] }
  0x2f   :  { %764 = vmatmul.bf16.vlgmr.msra.gmra.mxu1 %v3163_v56  ;;  %845 = vmatpush.bf16.msrb.mxu2 %v2849_v59  ;;  %4684 = vst [vmem:[#allocation14_spill] sm:$0xff] %v3201_v53  ;;  %v70_v59 = vld [vmem:[#allocation2 + $0xd8] sm:$0xff]  ;;  %v2589_v40 = vor.u32 %v2861_v38, %v2586_v39  ;;  %v2574_v43 = vld [vmem:[#allocation4 + $0xc] sm:$0xf0]  ;;  %v79_v45 = vld [vmem:[#allocation2 + $0x120] sm:$0xff] }
  0x30   :  { %824 = vmatmul.bf16.vlgmr.msra.gmra.mxu3 %v3177_v28  ;;  %4691 = vst [vmem:[#allocation21_spill] sm:$0xff] %v3220_v33  ;;  %v2577_v44 = vor.u32 %v2858_v42, %v2574_v43  ;;  %v57_v50 = vld [vmem:[#allocation2 + $0x70] sm:$0xff]  ;;  %v60_v51 = vld [vmem:[#allocation2 + $0x88] sm:$0xff]  ;;  %v63_v63 = vld [vmem:[#allocation2 + $0xa0] sm:$0xff] }
  0x31   :  { %v85_v61 = vld [vmem:[#allocation2 + $0x150] sm:$0xff]  ;;  %v66_v0 = vld [vmem:[#allocation2 + $0xb8] sm:$0xff]  ;;  %v2927_v27 = vld [vmem:[#allocation4 + $0x22c] sm:$0xf] }
  0x32   :  { %v86_v3 = vld [vmem:[#allocation2 + $0x158] sm:$0xff]  ;;  %v89_v4 = vld [vmem:[#allocation2 + $0x170] sm:$0xff]  ;;  %v3238_v7 = vpack.c.bf16 %v66_v0, %v63_v63  ;;  %v2826_v0 = vld [vmem:[#allocation4 + $0x204] sm:$0xf0] }
  0x33   :  { %846 = vmatpush.bf16.msrb.mxu2 %v2837_v62  ;;  %v2661_v62 = vor.u32 %v2879_v57, %v2658_v58  ;;  %v83_v57 = vld [vmem:[#allocation2 + $0x140] sm:$0xff]  ;;  %v3226_v58 = vpack.c.bf16 %v82_v46, %v79_v45  ;;  %v3240_v8 = vpack.c.bf16 %v89_v4, %v86_v3  ;;  %v2754_v26 = vld [vmem:[#allocation4 + $0x174] sm:$0xf0]  ;;  %v2900_v39 = vld [vmem:[#allocation4 + $0x154] sm:$0xf] }
  0x34   :  { %4696 = vst [vmem:[#allocation26_spill] sm:$0xff] %v3238_v7  ;;  %v2924_v42 = vld [vmem:[#allocation4 + $0x214] sm:$0xf]  ;;  %v100_v3 = vld [vmem:[#allocation2 + $0x1c8] sm:$0xff]  ;;  %v75_v4 = vld [vmem:[#allocation2 + $0x100] sm:$0xff] }
  0x35   :  { %934 = vmatpush.bf16.msrb.mxu3 %v2661_v62  ;;  %4692 = vst [vmem:[#allocation22_spill] sm:$0xff] %v3226_v58  ;;  %v88_v62 = vld [vmem:[#allocation2 + $0x168] sm:$0xff] }
  0x36   :  { %4697 = vst [vmem:[#allocation27_spill] sm:$0xff] %v3240_v8 }
  0x37   :  { %847 = vmatpush.bf16.msrb.mxu2 %v2825_v1  ;;  %v3204_v1 = vpack.c.bf16 %v70_v59, %v67_v52  ;;  %v80_v52 = vld [vmem:[#allocation2 + $0x128] sm:$0xff]  ;;  %v3228_v59 = vpack.c.bf16 %v60_v51, %v57_v50 }
  0x38   :  { %v3230_v60 = vpack.c.bf16 %v83_v57, %v80_v52  ;;  %v2897_v52 = vld [vmem:[#allocation4 + $0x13c] sm:$0xf]  ;;  %v2730_v57 = vld [vmem:[#allocation4 + $0x144] sm:$0xf0] }
  0x39   :  { %4685 = vst [vmem:[#allocation15_spill] sm:$0xff] %v3204_v1  ;;  %935 = vmatpush.bf16.msrb.mxu3 %v2649_v6  ;;  %v3236_v6 = vpack.c.bf16 %v88_v62, %v85_v61  ;;  %v2921_v61 = vld [vmem:[#allocation4 + $0x1fc] sm:$0xf]  ;;  %v97_v62 = vld [vmem:[#allocation2 + $0x1b0] sm:$0xff]  ;;  %v2733_v63 = vor.u32 %v2897_v52, %v2730_v57 }
  0x3a   :  { %4693 = vst [vmem:[#allocation23_spill] sm:$0xff] %v3228_v59 }
  0x3b   :  { %848 = vmatpush.bf16.msrb.mxu2 %v2813_v10  ;;  %v2870_v10 = vld [vmem:[#allocation4 + $0x64] sm:$0xf]  ;;  %4694 = vst [vmem:[#allocation24_spill] sm:$0xff] %v3230_v60 }
  0x3c   :  { %v2625_v15 = vor.u32 %v2870_v10, %v2622_v14  ;;  %4695 = vst [vmem:[#allocation25_spill] sm:$0xff] %v3236_v6  ;;  %v94_v10 = vld [vmem:[#allocation2 + $0x198] sm:$0xff]  ;;  %v69_v14 = vld [vmem:[#allocation2 + $0xd0] sm:$0xff] }
  0x3d   :  { %936 = vmatpush.bf16.msrb.mxu3 %v2637_v9  ;;  %v91_v9 = vld [vmem:[#allocation2 + $0x180] sm:$0xff] }
  0x3e   :  { %680 = vmatmul.bf16.gmra.mxu0 %v3168_v11  ;;  %740 = vmatmul.bf16.gmra.mxu2 %v3170_v12 }
  0x3f   :  { %769 = vmatmul.bf16.gmra.mxu1 %v3172_v13  ;;  %849 = vmatpush.bf16.msrb.mxu2 %v2801_v16  ;;  %v134_v16 = vld [vmem:[#allocation2 + $0x2d8] sm:$0xff] }
  0x40   :  { %829 = vmatmul.bf16.gmra.mxu3 %v3189_v41 }
  0x41   :  { %937 = vmatpush.bf16.msrb.mxu3 %v2625_v15  ;;  %v72_v15 = vld [vmem:[#allocation2 + $0xe8] sm:$0xff] }
  0x42   :  { %v3248_v20 = vpack.c.bf16 %v72_v15, %v69_v14  ;;  %v98_v14 = vld [vmem:[#allocation2 + $0x1b8] sm:$0xff]  ;;  %v101_v15 = vld [vmem:[#allocation2 + $0x1d0] sm:$0xff] }
  0x43   :  { %850 = vmatpush.bf16.msrb.mxu2 %v2789_v19  ;;  %v3213_v19 = vpack.c.bf16 %v137_v17, %v134_v16  ;;  %v92_v16 = vld [vmem:[#allocation2 + $0x188] sm:$0xff]  ;;  %v95_v17 = vld [vmem:[#allocation2 + $0x1a0] sm:$0xff] }
  0x44   :  { %4699 = vst [vmem:[#allocation29_spill] sm:$0xff] %v3248_v20 }
  0x45   :  { %4688 = vst [vmem:[#allocation18_spill] sm:$0xff] %v3213_v19  ;;  %938 = vmatpush.bf16.msrb.mxu3 %v2613_v25  ;;  %v2903_v25 = vld [vmem:[#allocation4 + $0x16c] sm:$0xf] }
  0x47   :  { %851 = vmatpush.bf16.msrb.mxu2 %v2777_v22  ;;  %v76_v22 = vld [vmem:[#allocation2 + $0x108] sm:$0xff] }
  0x48   :  { %v3216_v29 = vpack.c.bf16 %v76_v22, %v73_v18  ;;  %v3246_v18 = vpack.c.bf16 %v94_v10, %v91_v9  ;;  %v3250_v22 = vpack.c.bf16 %v95_v17, %v92_v16  ;;  %v78_v9 = vld [vmem:[#allocation2 + $0x118] sm:$0xff]  ;;  %v2829_v10 = vor.u32 %v2921_v61, %v2826_v0  ;;  %v2894_v17 = vld [vmem:[#allocation4 + $0x124] sm:$0xf]  ;;  %v2888_v61 = vld [vmem:[#allocation4 + $0xf4] sm:$0xf] }
  0x4a   :  { %4689 = vst [vmem:[#allocation19_spill] sm:$0xff] %v3216_v29 }
  0x4b   :  { %852 = vmatpush.bf16.msrb.mxu2 %v2765_v34  ;;  %v2601_v34 = vor.u32 %v2864_v31, %v2598_v32  ;;  %4698 = vst [vmem:[#allocation28_spill] sm:$0xff] %v3246_v18  ;;  %v2757_v31 = vor.u32 %v2903_v25, %v2754_v26  ;;  %v2850_v32 = vld [vmem:[#allocation4 + $0x234] sm:$0xf0]  ;;  %v3264_v25 = vpack.c.bf16 %v100_v3, %v97_v62  ;;  %v2694_v62 = vld [vmem:[#allocation4 + $0xfc] sm:$0xf0] }
  0x4c   :  { %v3266_v26 = vpack.c.bf16 %v78_v9, %v75_v4  ;;  %v2697_v0 = vor.u32 %v2888_v61, %v2694_v62  ;;  %v2790_v3 = vld [vmem:[#allocation4 + $0x1bc] sm:$0xf0]  ;;  %v2906_v61 = vld [vmem:[#allocation4 + $0x184] sm:$0xf] }
  0x4d   :  { %939 = vmatpush.bf16.msrb.mxu3 %v2601_v34  ;;  %v2853_v34 = vor.u32 %v2927_v27, %v2850_v32  ;;  %1023 = vmatpush.bf16.msrb.mxu0 %v2757_v31  ;;  %4700 = vst [vmem:[#allocation30_spill] sm:$0xff] %v3264_v25  ;;  %v2814_v31 = vld [vmem:[#allocation4 + $0x1ec] sm:$0xf0] }
  0x4e   :  { %685 = vmatmul.bf16.gmra.mxu0 %v3180_v35  ;;  %745 = vmatmul.bf16.gmra.mxu2 %v3182_v36  ;;  %4701 = vst [vmem:[#allocation31_spill] sm:$0xff] %v3266_v26 }
  0x4f   :  { %774 = vmatmul.bf16.gmra.mxu1 %v3184_v37 }
  0x50   :  { %834 = vmatmul.bf16.gmra.mxu3 %v3201_v53  ;;  %1112 = vmatpush.bf16.msrb.mxu1 %v2853_v34  ;;  %v3268_v34 = vpack.c.bf16 %v101_v15, %v98_v14  ;;  %v2885_v15 = vld [vmem:[#allocation4 + $0xdc] sm:$0xf] }
  0x51   :  { %940 = vmatpush.bf16.msrb.mxu3 %v2589_v40  ;;  %v2742_v40 = vld [vmem:[#allocation4 + $0x15c] sm:$0xf0] }
  0x52   :  { %v2745_v43 = vor.u32 %v2900_v39, %v2742_v40 }
  0x54   :  { %1024 = vmatpush.bf16.msrb.mxu0 %v2745_v43  ;;  %v2891_v43 = vld [vmem:[#allocation4 + $0x10c] sm:$0xf] }
  0x55   :  { %941 = vmatpush.bf16.msrb.mxu3 %v2577_v44  ;;  %v2838_v44 = vld [vmem:[#allocation4 + $0x21c] sm:$0xf0] }
  0x56   :  { %v2841_v46 = vor.u32 %v2924_v42, %v2838_v44  ;;  %v2706_v44 = vld [vmem:[#allocation4 + $0x114] sm:$0xf0] }
  0x58   :  { %1113 = vmatpush.bf16.msrb.mxu1 %v2841_v46  ;;  %1025 = vmatpush.bf16.msrb.mxu0 %v2733_v63  ;;  %v2709_v46 = vor.u32 %v2891_v43, %v2706_v44  ;;  %v2912_v63 = vld [vmem:[#allocation4 + $0x1b4] sm:$0xf]  ;;  %v104_v43 = vld [vmem:[#allocation2 + $0x1e8] sm:$0xff]  ;;  %v107_v44 = vld [vmem:[#allocation2 + $0x200] sm:$0xff] }
  0x5c   :  { %1114 = vmatpush.bf16.msrb.mxu1 %v2829_v10  ;;  %v2793_v10 = vor.u32 %v2912_v63, %v2790_v3  ;;  %v2766_v3 = vld [vmem:[#allocation4 + $0x18c] sm:$0xf0] }
  0x5e   :  { %690 = vmatmul.bf16.gmra.mxu0 %v3192_v47  ;;  %750 = vmatmul.bf16.gmra.mxu2 %v3194_v48 }
  0x5f   :  { %779 = vmatmul.bf16.gmra.mxu1 %v3196_v49 }
  0x60   :  { %839 = vmatmul.bf16.gmra.mxu3 %v3213_v19 }
  0x6e   :  { %695 = vmatmul.bf16.gmra.mxu0 %v3204_v1  ;;  %853 = vmatmul.bf16.vlgmr.msrb.gmra.mxu2 %v3206_v2 }
  0x6f   :  { %784 = vmatmul.bf16.gmra.mxu1 %v3208_v5 }
  0x70   :  { %942 = vmatmul.bf16.vlgmr.msrb.gmra.mxu3 %v3159_v54 }
  0x7e   :  { %700 = vmatmul.bf16.gmra.mxu0 %v3216_v29  ;;  %858 = vmatmul.bf16.gmra.mxu2 %v3218_v30 }
  0x7f   :  { %789 = vmatmul.bf16.gmra.mxu1 %v3220_v33 }
  0x80   :  { %947 = vmatmul.bf16.gmra.mxu3 %v3168_v11 }
  0x8e   :  { %705 = vmatmul.bf16.gmra.mxu0 %v3226_v58  ;;  %863 = vmatmul.bf16.gmra.mxu2 %v3228_v59 }
  0x8f   :  { %794 = vmatmul.bf16.gmra.mxu1 %v3230_v60 }
  0x90   :  { %952 = vmatmul.bf16.gmra.mxu3 %v3180_v35 }
  0x9e   :  { %710 = vmatmul.bf16.gmra.mxu0 %v3236_v6  ;;  %868 = vmatmul.bf16.gmra.mxu2 %v3238_v7 }
  0x9f   :  { %799 = vmatmul.bf16.gmra.mxu1 %v3240_v8 }
  0xa0   :  { %957 = vmatmul.bf16.gmra.mxu3 %v3192_v47 }
  0xab   :  { %v676_v21 = vpop.f32.mrf.mxu0 }
  0xac   :  { %v765_v23 = vpop.f32.mrf.mxu1 }
  0xad   :  { %v3252_v24 = vadd.f32 %v765_v23, %v676_v21  ;;  %v2718_v21 = vld [vmem:[#allocation4 + $0x12c] sm:$0xf0]  ;;  %v2918_v23 = vld [vmem:[#allocation4 + $0x1e4] sm:$0xf] }
  0xae   :  { %715 = vmatmul.bf16.gmra.mxu0 %v3246_v18  ;;  %873 = vmatmul.bf16.gmra.mxu2 %v3248_v20  ;;  %v2721_v27 = vor.u32 %v2894_v17, %v2718_v21  ;;  %v2817_v40 = vor.u32 %v2918_v23, %v2814_v31  ;;  %v2682_v17 = vld [vmem:[#allocation4 + $0xe4] sm:$0xf0]  ;;  %v2909_v21 = vld [vmem:[#allocation4 + $0x19c] sm:$0xf]  ;;  %v103_v23 = vld [vmem:[#allocation2 + $0x1e0] sm:$0xff] }
  0xaf   :  { %804 = vmatmul.bf16.gmra.mxu1 %v3250_v22  ;;  %v2778_v31 = vld [vmem:[#allocation4 + $0x1a4] sm:$0xf0] }
  0xb0   :  { %1026 = vmatpush.bf16.msrb.mxu0 %v2721_v27  ;;  %1115 = vmatpush.bf16.msrb.mxu1 %v2817_v40  ;;  %v2685_v27 = vor.u32 %v2885_v15, %v2682_v17  ;;  %v84_v40 = vld [vmem:[#allocation2 + $0x148] sm:$0xff] }
  0xb1   :  { %v3257_v38 = vpop.f32.mrf.mxu2  ;;  %962 = vmatmul.bf16.gmra.mxu3 %v3204_v1 }
  0xb3   :  { %v678_v45 = vpop.f32.mrf.mxu0  ;;  %v825_v15 = vpop.f32.mrf.mxu3 }
  0xb4   :  { %v767_v50 = vpop.f32.mrf.mxu1  ;;  %1027 = vmatpush.bf16.msrb.mxu0 %v2709_v46 }
  0xb5   :  { %v3259_v51 = vadd.f32 %v767_v50, %v678_v45  ;;  %v2915_v45 = vld [vmem:[#allocation4 + $0x1cc] sm:$0xf]  ;;  %v2802_v50 = vld [vmem:[#allocation4 + $0x1d4] sm:$0xf0] }
  0xb6   :  { %v2805_v52 = vor.u32 %v2915_v45, %v2802_v50  ;;  %v2781_v45 = vor.u32 %v2909_v21, %v2778_v31  ;;  %v2882_v50 = vld [vmem:[#allocation4 + $0xc4] sm:$0xf] }
  0xb8   :  { %1116 = vmatpush.bf16.msrb.mxu1 %v2805_v52  ;;  %1028 = vmatpush.bf16.msrb.mxu0 %v2697_v0  ;;  %v2670_v52 = vld [vmem:[#allocation4 + $0xcc] sm:$0xf0] }
  0xb9   :  { %v3262_v16 = vpop.f32.mrf.mxu2  ;;  %v2673_v0 = vor.u32 %v2882_v50, %v2670_v52  ;;  %v87_v50 = vld [vmem:[#allocation2 + $0x160] sm:$0xff]  ;;  %v90_v52 = vld [vmem:[#allocation2 + $0x178] sm:$0xff] }
  0xbb   :  { %v681_v32 = vpop.f32.mrf.mxu0  ;;  %v827_v31 = vpop.f32.mrf.mxu3 }
  0xbc   :  { %v770_v39 = vpop.f32.mrf.mxu1  ;;  %1117 = vmatpush.bf16.msrb.mxu1 %v2793_v10  ;;  %1029 = vmatpush.bf16.msrb.mxu0 %v2685_v27  ;;  %v2769_v10 = vor.u32 %v2906_v61, %v2766_v3  ;;  %v110_v61 = vld [vmem:[#allocation2 + $0x218] sm:$0xff] }
  0xbd   :  { %v3270_v42 = vadd.f32 %v770_v39, %v681_v32  ;;  %v106_v32 = vld [vmem:[#allocation2 + $0x1f8] sm:$0xff]  ;;  %v81_v39 = vld [vmem:[#allocation2 + $0x130] sm:$0xff] }
  0xbe   :  { %720 = vmatmul.bf16.gmra.mxu0 %v3264_v25  ;;  %878 = vmatmul.bf16.gmra.mxu2 %v3266_v26  ;;  %v3280_v62 = vpack.c.bf16 %v106_v32, %v103_v23  ;;  %v3282_v63 = vpack.c.bf16 %v84_v40, %v81_v39  ;;  %v3292_v39 = vadd.f32 %v825_v15, %v3257_v38 }
  0xbf   :  { %809 = vmatmul.bf16.gmra.mxu1 %v3268_v34  ;;  %v3295_v40 = vadd.f32 %v827_v31, %v3262_v16 }
  0xc0   :  { %4702 = vst [vmem:[#allocation32_spill] sm:$0xff] %v3280_v62  ;;  %1118 = vmatpush.bf16.msrb.mxu1 %v2781_v45  ;;  %1030 = vmatpush.bf16.msrb.mxu0 %v2673_v0  ;;  %v112_v45 = vld [vmem:[#allocation2 + $0x228] sm:$0xff]  ;;  %v113_v0 = vld [vmem:[#allocation2 + $0x230] sm:$0xff] }
  0xc1   :  { %v3275_v57 = vpop.f32.mrf.mxu2  ;;  %4703 = vst [vmem:[#allocation33_spill] sm:$0xff] %v3282_v63  ;;  %967 = vmatmul.bf16.gmra.mxu3 %v3216_v29  ;;  %v3304_v15 = vpack.c.bf16 %v113_v0, %v110_v61  ;;  %v93_v61 = vld [vmem:[#allocation2 + $0x190] sm:$0xff]  ;;  %v96_v0 = vld [vmem:[#allocation2 + $0x1a8] sm:$0xff] }
  0xc2   :  { %4704 = vst [vmem:[#allocation34_spill] sm:$0xff] %v3295_v40 }
  0xc3   :  { %v683_v4 = vpop.f32.mrf.mxu0  ;;  %v830_v16 = vpop.f32.mrf.mxu3 }
  0xc4   :  { %v772_v9 = vpop.f32.mrf.mxu1  ;;  %1119 = vmatpush.bf16.msrb.mxu1 %v2769_v10 }
  0xc5   :  { %v3277_v14 = vadd.f32 %v772_v9, %v683_v4  ;;  %v3284_v9 = vpack.c.bf16 %v107_v44, %v104_v43  ;;  %v109_v44 = vld [vmem:[#allocation2 + $0x210] sm:$0xff] }
  0xc9   :  { %v743_v46 = vpop.f32.mrf.mxu2 }
  0xcb   :  { %v686_v4 = vpop.f32.mrf.mxu0  ;;  %v832_v40 = vpop.f32.mrf.mxu3 }
  0xcc   :  { %v775_v17 = vpop.f32.mrf.mxu1 }
  0xcd   :  { %v3286_v21 = vadd.f32 %v775_v17, %v686_v4  ;;  %v3300_v4 = vpack.c.bf16 %v112_v45, %v109_v44  ;;  %v3302_v17 = vpack.c.bf16 %v90_v52, %v87_v50  ;;  %v3312_v45 = vadd.f32 %v830_v16, %v3275_v57 }
  0xce   :  { %725 = vmatmul.bf16.gmra.mxu0 %v3280_v62  ;;  %883 = vmatmul.bf16.gmra.mxu2 %v3282_v63  ;;  %v3314_v50 = vadd.f32 %v832_v40, %v743_v46 }
  0xcf   :  { %814 = vmatmul.bf16.gmra.mxu1 %v3284_v9  ;;  %4705 = vst [vmem:[#allocation35_spill] sm:$0xff] %v3300_v4 }
  0xd0   :  { %4706 = vst [vmem:[#allocation36_spill] sm:$0xff] %v3302_v17 }
  0xd1   :  { %v746_v23 = vpop.f32.mrf.mxu2  ;;  %4707 = vst [vmem:[#allocation37_spill] sm:$0xff] %v3312_v45  ;;  %972 = vmatmul.bf16.gmra.mxu3 %v3226_v58 }
  0xd2   :  { %4708 = vst [vmem:[#allocation38_spill] sm:$0xff] %v3314_v50 }
  0xd3   :  { %v688_v27 = vpop.f32.mrf.mxu0  ;;  %v835_v29 = vpop.f32.mrf.mxu3 }
  0xd4   :  { %v777_v32 = vpop.f32.mrf.mxu1 }
  0xd5   :  { %v3297_v43 = vadd.f32 %v777_v32, %v688_v27 }
  0xd9   :  { %v748_v3 = vpop.f32.mrf.mxu2 }
  0xdb   :  { %v691_v38 = vpop.f32.mrf.mxu0  ;;  %v837_v16 = vpop.f32.mrf.mxu3 }
  0xdc   :  { %v780_v10 = vpop.f32.mrf.mxu1 }
  0xdd   :  { %v3306_v27 = vadd.f32 %v780_v10, %v691_v38  ;;  %v3319_v10 = vpack.c.bf16 %v96_v0, %v93_v61  ;;  %v3331_v61 = vadd.f32 %v837_v16, %v748_v3 }
  0xde   :  { %730 = vmatmul.bf16.gmra.mxu0 %v3300_v4  ;;  %888 = vmatmul.bf16.gmra.mxu2 %v3302_v17 }
  0xdf   :  { %819 = vmatmul.bf16.gmra.mxu1 %v3304_v15  ;;  %4709 = vst [vmem:[#allocation39_spill] sm:$0xff] %v3319_v10 }
  0xe0   :  { %4711 = vst [vmem:[#allocation41_spill] sm:$0xff] %v3331_v61 }
  0xe1   :  { %v751_v31 = vpop.f32.mrf.mxu2  ;;  %977 = vmatmul.bf16.gmra.mxu3 %v3236_v6 }
  0xe3   :  { %v693_v32 = vpop.f32.mrf.mxu0 }
  0xe4   :  { %v782_v44 = vpop.f32.mrf.mxu1 }
  0xe5   :  { %v3316_v52 = vadd.f32 %v782_v44, %v693_v32  ;;  %v3329_v44 = vadd.f32 %v835_v29, %v746_v23 }
  0xe7   :  { %4710 = vst [vmem:[#allocation40_spill] sm:$0xff] %v3329_v44 }
  0xe9   :  { %v753_v38 = vpop.f32.mrf.mxu2 }
  0xeb   :  { %v696_v19 = vpop.f32.mrf.mxu0 }
  0xec   :  { %v785_v53 = vpop.f32.mrf.mxu1 }
  0xed   :  { %v3321_v1 = vadd.f32 %v785_v53, %v696_v19  ;;  %v99_v53 = vld [vmem:[#allocation2 + $0x1c0] sm:$0xff]  ;;  %v102_v19 = vld [vmem:[#allocation2 + $0x1d8] sm:$0xff] }
  0xee   :  { %893 = vmatmul.bf16.gmra.mxu2 %v3319_v10  ;;  %1031 = vmatmul.bf16.vlgmr.msrb.gmra.mxu0 %v3163_v56  ;;  %v3339_v58 = vpack.c.bf16 %v102_v19, %v99_v53  ;;  %v108_v53 = vld [vmem:[#allocation2 + $0x208] sm:$0xff] }
  0xef   :  { %1120 = vmatmul.bf16.vlgmr.msrb.gmra.mxu1 %v3206_v2 }
  0xf0   :  { %4712 = vst [vmem:[#allocation42_spill] sm:$0xff] %v3339_v58 }
  0xf1   :  { %v854_v57 = vpop.f32.mrf.mxu2  ;;  %982 = vmatmul.bf16.gmra.mxu3 %v3246_v18  ;;  %v120_v18 = vld [vmem:[#allocation2 + $0x268] sm:$0xff] }
  0xf2   :  { %v3327_v46 = vadd.f32 %v854_v57, %v3252_v24  ;;  %v840_v57 = vpop.f32.mrf.mxu3 }
  0xf3   :  { %v698_v40 = vpop.f32.mrf.mxu0 }
  0xf4   :  { %v787_v32 = vpop.f32.mrf.mxu1 }
  0xf5   :  { %v3333_v0 = vadd.f32 %v787_v32, %v698_v40  ;;  %v3349_v40 = vadd.f32 %v840_v57, %v751_v31 }
  0xf7   :  { %4713 = vst [vmem:[#allocation43_spill] sm:$0xff] %v3349_v40 }
  0xf9   :  { %v856_v50 = vpop.f32.mrf.mxu2 }
  0xfa   :  { %v3337_v2 = vadd.f32 %v856_v50, %v3259_v51  ;;  %v842_v51 = vpop.f32.mrf.mxu3 }
  0xfb   :  { %v701_v24 = vpop.f32.mrf.mxu0  ;;  %v3351_v16 = vadd.f32 %v842_v51, %v753_v38 }
  0xfc   :  { %v790_v45 = vpop.f32.mrf.mxu1 }
  0xfd   :  { %v3341_v41 = vadd.f32 %v790_v45, %v701_v24  ;;  %4714 = vst [vmem:[#allocation44_spill] sm:$0xff] %v3351_v16  ;;  %v105_v45 = vld [vmem:[#allocation2 + $0x1f0] sm:$0xff] }
  0xfe   :  { %898 = vmatmul.bf16.gmra.mxu2 %v3339_v58  ;;  %1036 = vmatmul.bf16.gmra.mxu0 %v3172_v13  ;;  %v3359_v61 = vpack.c.bf16 %v108_v53, %v105_v45  ;;  %v111_v45 = vld [vmem:[#allocation2 + $0x220] sm:$0xff]  ;;  %v114_v53 = vld [vmem:[#allocation2 + $0x238] sm:$0xff] }
  0xff   :  { %1125 = vmatmul.bf16.gmra.mxu1 %v3218_v30 }
 0x100   :  { %4716 = vst [vmem:[#allocation46_spill] sm:$0xff] %v3359_v61 }
 0x101   :  { %v859_v29 = vpop.f32.mrf.mxu2  ;;  %987 = vmatmul.bf16.gmra.mxu3 %v3264_v25  ;;  %v117_v25 = vld [vmem:[#allocation2 + $0x250] sm:$0xff] }
 0x102   :  { %v3347_v23 = vadd.f32 %v859_v29, %v3270_v42  ;;  %v3361_v29 = vpop.f32.mrf.mxu3  ;;  %v3399_v6 = vpack.c.bf16 %v120_v18, %v117_v25 }
 0x103   :  { %v703_v3 = vpop.f32.mrf.mxu0 }
 0x104   :  { %v792_v50 = vpop.f32.mrf.mxu1  ;;  %4720 = vst [vmem:[#allocation50_spill] sm:$0xff] %v3399_v6 }
 0x105   :  { %v3353_v32 = vadd.f32 %v792_v50, %v703_v3 }
 0x107   :  { %4715 = vst [vmem:[#allocation45_spill] sm:$0xff] %v3353_v32 }
 0x109   :  { %v861_v19 = vpop.f32.mrf.mxu2 }
 0x10a   :  { %v3357_v24 = vadd.f32 %v861_v19, %v3277_v14  ;;  %v3371_v3 = vpop.f32.mrf.mxu3 }
 0x10b   :  { %v706_v42 = vpop.f32.mrf.mxu0 }
 0x10c   :  { %v795_v30 = vpop.f32.mrf.mxu1 }
 0x10d   :  { %v3363_v31 = vadd.f32 %v795_v30, %v706_v42  ;;  %v3379_v42 = vpack.c.bf16 %v114_v53, %v111_v45 }
 0x10e   :  { %903 = vmatmul.bf16.gmra.mxu2 %v3359_v61  ;;  %1041 = vmatmul.bf16.gmra.mxu0 %v3184_v37 }
 0x10f   :  { %1130 = vmatmul.bf16.gmra.mxu1 %v3228_v59  ;;  %4718 = vst [vmem:[#allocation48_spill] sm:$0xff] %v3379_v42 }
 0x111   :  { %v864_v38 = vpop.f32.mrf.mxu2  ;;  %992 = vmatmul.bf16.gmra.mxu3 %v3280_v62  ;;  %v123_v62 = vld [vmem:[#allocation2 + $0x280] sm:$0xff] }
 0x112   :  { %v3369_v57 = vadd.f32 %v864_v38, %v3286_v21  ;;  %v3381_v59 = vpop.f32.mrf.mxu3 }
 0x113   :  { %v708_v14 = vpop.f32.mrf.mxu0 }
 0x114   :  { %v797_v51 = vpop.f32.mrf.mxu1 }
 0x115   :  { %v3373_v50 = vadd.f32 %v797_v51, %v708_v14 }
 0x117   :  { %4717 = vst [vmem:[#allocation47_spill] sm:$0xff] %v3373_v50 }
 0x119   :  { %v866_v30 = vpop.f32.mrf.mxu2 }
 0x11a   :  { %v3377_v19 = vadd.f32 %v866_v30, %v3297_v43  ;;  %v3391_v30 = vpop.f32.mrf.mxu3 }
 0x11b   :  { %v711_v16 = vpop.f32.mrf.mxu0 }
 0x11c   :  { %v800_v21 = vpop.f32.mrf.mxu1 }
 0x11d   :  { %v3383_v38 = vadd.f32 %v800_v21, %v711_v16 }
 0x11e   :  { %908 = vmatmul.bf16.gmra.mxu2 %v3379_v42  ;;  %1046 = vmatmul.bf16.gmra.mxu0 %v3196_v49 }
 0x11f   :  { %1135 = vmatmul.bf16.gmra.mxu1 %v3238_v7 }
 0x121   :  { %v869_v14 = vpop.f32.mrf.mxu2  ;;  %997 = vmatmul.bf16.gmra.mxu3 %v3300_v4 }
 0x122   :  { %v3389_v51 = vadd.f32 %v869_v14, %v3306_v27  ;;  %v3401_v40 = vpop.f32.mrf.mxu3 }
 0x123   :  { %v713_v43 = vpop.f32.mrf.mxu0 }
 0x124   :  { %v802_v45 = vpop.f32.mrf.mxu1 }
 0x125   :  { %v3393_v53 = vadd.f32 %v802_v45, %v713_v43 }
 0x127   :  { %4719 = vst [vmem:[#allocation49_spill] sm:$0xff] %v3393_v53  ;;  %v126_v53 = vld [vmem:[#allocation2 + $0x298] sm:$0xff] }
 0x129   :  { %v871_v16 = vpop.f32.mrf.mxu2 }
 0x12a   :  { %v3397_v21 = vadd.f32 %v871_v16, %v3316_v52  ;;  %v3411_v16 = vpop.f32.mrf.mxu3 }
 0x12b   :  { %v716_v7 = vpop.f32.mrf.mxu0 }
 0x12c   :  { %v805_v27 = vpop.f32.mrf.mxu1 }
 0x12d   :  { %v3403_v14 = vadd.f32 %v805_v27, %v716_v7  ;;  %v3418_v27 = vpack.c.bf16 %v126_v53, %v123_v62 }
 0x12e   :  { %913 = vmatmul.bf16.gmra.mxu2 %v3399_v6  ;;  %1051 = vmatmul.bf16.gmra.mxu0 %v3208_v5  ;;  %v132_v5 = vld [vmem:[#allocation2 + $0x2c8] sm:$0xff] }
 0x12f   :  { %1140 = vmatmul.bf16.gmra.mxu1 %v3248_v20  ;;  %4722 = vst [vmem:[#allocation52_spill] sm:$0xff] %v3418_v27 }
 0x131   :  { %v874_v43 = vpop.f32.mrf.mxu2  ;;  %1002 = vmatmul.bf16.gmra.mxu3 %v3161_v55 }
 0x132   :  { %v3409_v45 = vadd.f32 %v874_v43, %v3321_v1  ;;  %v3420_v20 = vpop.f32.mrf.mxu3 }
 0x133   :  { %v718_v52 = vpop.f32.mrf.mxu0 }
 0x134   :  { %v807_v18 = vpop.f32.mrf.mxu1 }
 0x135   :  { %v3413_v25 = vadd.f32 %v807_v18, %v718_v52 }
 0x137   :  { %4721 = vst [vmem:[#allocation51_spill] sm:$0xff] %v3413_v25  ;;  %v129_v25 = vld [vmem:[#allocation2 + $0x2b0] sm:$0xff] }
 0x139   :  { %v3416_v7 = vpop.f32.mrf.mxu2 }
 0x13a   :  { %v3430_v4 = vpop.f32.mrf.mxu3 }
 0x13b   :  { %v721_v50 = vpop.f32.mrf.mxu0 }
 0x13c   :  { %v810_v44 = vpop.f32.mrf.mxu1 }
 0x13d   :  { %v3422_v1 = vadd.f32 %v810_v44, %v721_v50  ;;  %v3437_v50 = vpack.c.bf16 %v132_v5, %v129_v25  ;;  %v2664_v25 = vld [vmem:[#allocation4 + $0xb0] sm:$0xf] }
 0x13e   :  { %918 = vmatmul.bf16.gmra.mxu2 %v3418_v27  ;;  %1056 = vmatmul.bf16.gmra.mxu0 %v3220_v33 }
 0x13f   :  { %1145 = vmatmul.bf16.gmra.mxu1 %v3266_v26  ;;  %4726 = vst [vmem:[#allocation56_spill] sm:$0xff] %v3437_v50 }
 0x141   :  { %v879_v43 = vpop.f32.mrf.mxu2  ;;  %1007 = vmatmul.bf16.gmra.mxu3 %v3170_v12  ;;  %v2905_v12 = vld [vmem:[#allocation4 + $0x178] sm:$0xf0] }
 0x142   :  { %v3428_v52 = vadd.f32 %v879_v43, %v3341_v41  ;;  %v3439_v26 = vpop.f32.mrf.mxu3 }
 0x143   :  { %v723_v18 = vpop.f32.mrf.mxu0 }
 0x144   :  { %4723 = vst [vmem:[#allocation53_spill] sm:$0xff] %v3428_v52  ;;  %v812_v62 = vpop.f32.mrf.mxu1  ;;  %v138_v52 = vld [vmem:[#allocation2 + $0x2f8] sm:$0xff] }
 0x145   :  { %v3432_v53 = vadd.f32 %v812_v62, %v723_v18 }
 0x147   :  { %4724 = vst [vmem:[#allocation54_spill] sm:$0xff] %v3432_v53  ;;  %v2881_v53 = vld [vmem:[#allocation4 + $0xb8] sm:$0xf0] }
 0x149   :  { %v3435_v44 = vpop.f32.mrf.mxu2 }
 0x14a   :  { %4725 = vst [vmem:[#allocation55_spill] sm:$0xff] %v3435_v44  ;;  %v3449_v55 = vpop.f32.mrf.mxu3 }
 0x14b   :  { %v726_v33 = vpop.f32.mrf.mxu0 }
 0x14c   :  { %v815_v32 = vpop.f32.mrf.mxu1 }
 0x14d   :  { %v3441_v41 = vadd.f32 %v815_v32, %v726_v33  ;;  %v2665_v33 = vor.u32 %v2881_v53, %v2664_v25  ;;  %v135_v32 = vld [vmem:[#allocation2 + $0x2e0] sm:$0xff] }
 0x14e   :  { %923 = vmatmul.bf16.gmra.mxu2 %v3437_v50  ;;  %1061 = vmatmul.bf16.gmra.mxu0 %v3230_v60 }
 0x14f   :  { %1150 = vmatmul.bf16.gmra.mxu1 %v3282_v63  ;;  %1201 = vmatpush.bf16.msra.mxu2 %v2665_v33  ;;  %v3456_v63 = vpack.c.bf16 %v138_v52, %v135_v32  ;;  %v2760_v32 = vld [vmem:[#allocation4 + $0x170] sm:$0xf] }
 0x151   :  { %v884_v43 = vpop.f32.mrf.mxu2  ;;  %4730 = vst [vmem:[#allocation60_spill] sm:$0xff] %v3456_v63  ;;  %1012 = vmatmul.bf16.gmra.mxu3 %v3182_v36 }
 0x152   :  { %v3447_v18 = vadd.f32 %v884_v43, %v3363_v31  ;;  %v3458_v43 = vpop.f32.mrf.mxu3 }
 0x153   :  { %v728_v62 = vpop.f32.mrf.mxu0 }
 0x154   :  { %4727 = vst [vmem:[#allocation57_spill] sm:$0xff] %v3447_v18  ;;  %v817_v5 = vpop.f32.mrf.mxu1 }
 0x155   :  { %v3451_v44 = vadd.f32 %v817_v5, %v728_v62 }
 0x157   :  { %4728 = vst [vmem:[#allocation58_spill] sm:$0xff] %v3451_v44  ;;  %v2652_v44 = vld [vmem:[#allocation4 + $0x98] sm:$0xf] }
 0x159   :  { %v3454_v60 = vpop.f32.mrf.mxu2 }
 0x15a   :  { %4729 = vst [vmem:[#allocation59_spill] sm:$0xff] %v3454_v60  ;;  %v3468_v25 = vpop.f32.mrf.mxu3 }
 0x15b   :  { %v731_v31 = vpop.f32.mrf.mxu0 }
 0x15c   :  { %v820_v18 = vpop.f32.mrf.mxu1 }
 0x15d   :  { %v3460_v50 = vadd.f32 %v820_v18, %v731_v31  ;;  %v2761_v18 = vor.u32 %v2905_v12, %v2760_v32  ;;  %v2640_v12 = vld [vmem:[#allocation4 + $0x80] sm:$0xf]  ;;  %v2875_v32 = vld [vmem:[#allocation4 + $0x88] sm:$0xf0] }
 0x15e   :  { %928 = vmatmul.bf16.gmra.mxu2 %v3456_v63  ;;  %1066 = vmatmul.bf16.gmra.mxu0 %v3240_v8  ;;  %v2748_v8 = vld [vmem:[#allocation4 + $0x158] sm:$0xf]  ;;  %v2641_v36 = vor.u32 %v2875_v32, %v2640_v12 }
 0x15f   :  { %1155 = vmatmul.bf16.gmra.mxu1 %v3302_v17  ;;  %1290 = vmatpush.bf16.msra.mxu3 %v2761_v18  ;;  %v2878_v17 = vld [vmem:[#allocation4 + $0xa0] sm:$0xf0]  ;;  %v2736_v18 = vld [vmem:[#allocation4 + $0x140] sm:$0xf] }
 0x161   :  { %v889_v53 = vpop.f32.mrf.mxu2  ;;  %1017 = vmatmul.bf16.gmra.mxu3 %v3194_v48  ;;  %v2884_v48 = vld [vmem:[#allocation4 + $0xd0] sm:$0xf0] }
 0x162   :  { %v3466_v62 = vadd.f32 %v889_v53, %v3383_v38  ;;  %v2653_v38 = vor.u32 %v2878_v17, %v2652_v44  ;;  %v3475_v53 = vpop.f32.mrf.mxu3 }
 0x163   :  { %v733_v5 = vpop.f32.mrf.mxu0  ;;  %4734 = vst [vmem:[#allocation64_spill] sm:$0xff] %v3475_v53 }
 0x164   :  { %4731 = vst [vmem:[#allocation61_spill] sm:$0xff] %v3466_v62  ;;  %v822_v52 = vpop.f32.mrf.mxu1  ;;  %v2902_v62 = vld [vmem:[#allocation4 + $0x160] sm:$0xf0]  ;;  %1202 = vmatpush.bf16.msra.mxu2 %v2653_v38 }
 0x165   :  { %v3470_v33 = vadd.f32 %v822_v52, %v733_v5  ;;  %v2749_v52 = vor.u32 %v2902_v62, %v2748_v8  ;;  %v2628_v8 = vld [vmem:[#allocation4 + $0x68] sm:$0xf] }
 0x167   :  { %4732 = vst [vmem:[#allocation62_spill] sm:$0xff] %v3470_v33  ;;  %1291 = vmatpush.bf16.msra.mxu3 %v2749_v52  ;;  %v2896_v52 = vld [vmem:[#allocation4 + $0x130] sm:$0xf0] }
 0x168   :  { %1203 = vmatpush.bf16.msra.mxu2 %v2641_v36  ;;  %v2869_v36 = vld [vmem:[#allocation4 + $0x58] sm:$0xf0] }
 0x169   :  { %v3473_v31 = vpop.f32.mrf.mxu2 }
 0x16a   :  { %4733 = vst [vmem:[#allocation63_spill] sm:$0xff] %v3473_v31  ;;  %v2899_v31 = vld [vmem:[#allocation4 + $0x148] sm:$0xf0]  ;;  %v3484_v38 = vpop.f32.mrf.mxu3 }
 0x16b   :  { %v1032_v63 = vpop.f32.mrf.mxu0  ;;  %v2737_v44 = vor.u32 %v2899_v31, %v2736_v18  ;;  %v2893_v18 = vld [vmem:[#allocation4 + $0x118] sm:$0xf0] }
 0x16c   :  { %v1033_v60 = vadd.f32 %v1032_v63, %v3361_v29  ;;  %v1121_v5 = vpop.f32.mrf.mxu1 }
 0x16d   :  { %1292 = vmatpush.bf16.msra.mxu3 %v2737_v44 }
 0x16e   :  { %v1122_v33 = vadd.f32 %v1121_v5, %v1033_v60  ;;  %1071 = vmatmul.bf16.gmra.mxu0 %v3250_v22  ;;  %v2872_v60 = vld [vmem:[#allocation4 + $0x70] sm:$0xf0]  ;;  %v2724_v5 = vld [vmem:[#allocation4 + $0x128] sm:$0xf] }
 0x16f   :  { %1160 = vmatmul.bf16.gmra.mxu1 %v3319_v10  ;;  %v2629_v62 = vor.u32 %v2872_v60, %v2628_v8  ;;  %v2725_v10 = vor.u32 %v2896_v52, %v2724_v5  ;;  %v2866_v52 = vld [vmem:[#allocation4 + $0x40] sm:$0xf0] }
 0x170   :  { %v1468_v17 = vpack.c.bf16 %v1122_v33, %v3327_v46  ;;  %v2616_v33 = vld [vmem:[#allocation4 + $0x50] sm:$0xf] }
 0x171   :  { %v894_v53 = vpop.f32.mrf.mxu2  ;;  %1204 = vmatpush.bf16.msra.mxu2 %v2629_v62  ;;  %1293 = vmatpush.bf16.msra.mxu3 %v2725_v10  ;;  %v2604_v62 = vld [vmem:[#allocation4 + $0x38] sm:$0xf] }
 0x172   :  { %v3482_v63 = vadd.f32 %v894_v53, %v3403_v14  ;;  %v2712_v14 = vld [vmem:[#allocation4 + $0x110] sm:$0xf]  ;;  %v1564_v31 = vrot.slane %v1468_v17, 4  ;;  %v2617_v53 = vor.u32 %v2869_v36, %v2616_v33  ;;  %v3493_v33 = vpop.f32.mrf.mxu3  ;;  %v2700_v36 = vld [vmem:[#allocation4 + $0xf8] sm:$0xf] }
 0x173   :  { %v1034_v29 = vpop.f32.mrf.mxu0  ;;  %v2713_v8 = vor.u32 %v2893_v18, %v2712_v14 }
 0x174   :  { %v1035_v12 = vadd.f32 %v1034_v29, %v3371_v3  ;;  %v1123_v32 = vpop.f32.mrf.mxu1  ;;  %v1596_v3 = vunpack.c.l.b16 %v1468_v17 }
 0x175   :  { %1205 = vmatpush.bf16.msra.mxu2 %v2617_v53  ;;  %1294 = vmatpush.bf16.msra.mxu3 %v2713_v8  ;;  %v2863_v8 = vld [vmem:[#allocation4 + $0x28] sm:$0xf0] }
 0x176   :  { %v1124_v46 = vadd.f32 %v1123_v32, %v1035_v12  ;;  %v3491_v12 = vunpack.c.l.b16 %v1564_v31  ;;  %v2605_v32 = vor.u32 %v2866_v52, %v2604_v62  ;;  %v2592_v31 = vld [vmem:[#allocation4 + $0x20] sm:$0xf]  ;;  %v2676_v52 = vld [vmem:[#allocation4 + $0xc8] sm:$0xf] }
 0x177   :  { %v2688_v62 = vld [vmem:[#allocation4 + $0xe0] sm:$0xf] }
 0x178   :  { %v1470_v44 = vpack.c.bf16 %v1124_v46, %v3337_v2  ;;  %v2890_v2 = vld [vmem:[#allocation4 + $0x100] sm:$0xf0] }
 0x179   :  { %v3489_v60 = vpop.f32.mrf.mxu2  ;;  %v2701_v53 = vor.u32 %v2890_v2, %v2700_v36  ;;  %1206 = vmatpush.bf16.msra.mxu2 %v2605_v32  ;;  %v2580_v36 = vld [vmem:[#allocation4 + $0x8] sm:$0xf]  ;;  %v2860_v2 = vld [vmem:[#allocation4 + $0x10] sm:$0xf0] }
 0x17a   :  { %v1565_v29 = vrot.slane %v1470_v44, 4  ;;  %v1597_v5 = vunpack.c.l.b16 %v1470_v44 }
 0x17b   :  { %v1037_v10 = vpop.f32.mrf.mxu0  ;;  %1295 = vmatpush.bf16.msra.mxu3 %v2701_v53  ;;  %v3508_v53 = vpop.f32.mrf.mxu3 }
 0x17c   :  { %v3495_v46 = vpack.c.b16 %v1597_v5, %v1596_v3  ;;  %v1038_v14 = vadd.f32 %v1037_v10, %v3381_v59  ;;  %v1126_v18 = vpop.f32.mrf.mxu1  ;;  %v3498_v17 = vunpack.c.l.b16 %v1565_v29  ;;  %v2593_v3 = vor.u32 %v2863_v8, %v2592_v31  ;;  %v2887_v5 = vld [vmem:[#allocation4 + $0xe8] sm:$0xf0] }
 0x17d   :  { %v2689_v10 = vor.u32 %v2887_v5, %v2688_v62 }
 0x17e   :  { %v1127_v44 = vadd.f32 %v1126_v18, %v1038_v14  ;;  %1076 = vmatmul.bf16.gmra.mxu0 %v3268_v34  ;;  %1207 = vmatpush.bf16.msra.mxu2 %v2593_v3  ;;  %v2581_v18 = vor.u32 %v2860_v2, %v2580_v36 }
 0x17f   :  { %1165 = vmatmul.bf16.gmra.mxu1 %v3339_v58  ;;  %1296 = vmatpush.bf16.msra.mxu3 %v2689_v10  ;;  %v2677_v58 = vor.u32 %v2884_v48, %v2676_v52 }
 0x180   :  { %v1472_v59 = vpack.c.bf16 %v1127_v44, %v3347_v23 }
 0x181   :  { %v899_v29 = vpop.f32.mrf.mxu2 }
 0x182   :  { %v3506_v32 = vadd.f32 %v899_v29, %v3422_v1  ;;  %1208 = vmatpush.bf16.msra.mxu2 %v2581_v18  ;;  %v1566_v44 = vrot.slane %v1472_v59, 4  ;;  %v1598_v3 = vunpack.c.l.b16 %v1472_v59 }
 0x183   :  { %v1039_v14 = vpop.f32.mrf.mxu0  ;;  %1297 = vmatpush.bf16.msra.mxu3 %v2677_v58  ;;  %v3516_v36 = vpop.f32.mrf.mxu3 }
 0x184   :  { %v1040_v31 = vadd.f32 %v1039_v14, %v3391_v30  ;;  %v1128_v8 = vpop.f32.mrf.mxu1  ;;  %v3518_v30 = vunpack.c.l.b16 %v1566_v44 }
 0x185   :  { %1209 = vmatmul.bf16.vlgmr.msra.gmra.mxu2 %v3159_v54 }
 0x186   :  { %v1129_v23 = vadd.f32 %v1128_v8, %v1040_v31  ;;  %1298 = vmatmul.bf16.vlgmr.msra.gmra.mxu3 %v3163_v56 }
 0x188   :  { %v1474_v1 = vpack.c.bf16 %v1129_v23, %v3357_v24 }
 0x189   :  { %v3513_v62 = vpop.f32.mrf.mxu2 }
 0x18a   :  { %v1567_v5 = vrot.slane %v1474_v1, 4  ;;  %v1599_v10 = vunpack.c.l.b16 %v1474_v1 }
 0x18b   :  { %v1042_v29 = vpop.f32.mrf.mxu0  ;;  %v3533_v18 = vpop.f32.mrf.mxu3 }
 0x18c   :  { %v1043_v48 = vadd.f32 %v1042_v29, %v3401_v40  ;;  %v1131_v58 = vpop.f32.mrf.mxu1  ;;  %v3521_v52 = vunpack.c.l.b16 %v1567_v5  ;;  %v3523_v24 = vpack.c.b16 %v1599_v10, %v1598_v3 }
 0x18e   :  { %v1132_v54 = vadd.f32 %v1131_v58, %v1043_v48  ;;  %1081 = vmatmul.bf16.gmra.mxu0 %v3284_v9 }
 0x18f   :  { %1170 = vmatmul.bf16.gmra.mxu1 %v3359_v61 }
 0x190   :  { %v1476_v59 = vpack.c.bf16 %v1132_v54, %v3369_v57 }
 0x191   :  { %v904_v2 = vpop.f32.mrf.mxu2 }
 0x192   :  { %v3531_v14 = vadd.f32 %v904_v2, %v3441_v41  ;;  %v1568_v44 = vrot.slane %v1476_v59, 4  ;;  %v1600_v57 = vunpack.c.l.b16 %v1476_v59 }
 0x193   :  { %v1044_v40 = vpop.f32.mrf.mxu0  ;;  %v3541_v29 = vpop.f32.mrf.mxu3 }
 0x194   :  { %v1045_v31 = vadd.f32 %v1044_v40, %v3411_v16  ;;  %v1133_v8 = vpop.f32.mrf.mxu1  ;;  %v3543_v48 = vunpack.c.l.b16 %v1568_v44 }
 0x195   :  { %1214 = vmatmul.bf16.gmra.mxu2 %v3168_v11 }
 0x196   :  { %v1134_v23 = vadd.f32 %v1133_v8, %v1045_v31  ;;  %1303 = vmatmul.bf16.gmra.mxu3 %v3172_v13 }
 0x198   :  { %v1478_v1 = vpack.c.bf16 %v1134_v23, %v3377_v19 }
 0x199   :  { %v3538_v3 = vpop.f32.mrf.mxu2 }
 0x19a   :  { %v1569_v5 = vrot.slane %v1478_v1, 4  ;;  %v1601_v41 = vunpack.c.l.b16 %v1478_v1 }
 0x19b   :  { %v1047_v10 = vpop.f32.mrf.mxu0  ;;  %v3558_v31 = vpop.f32.mrf.mxu3 }
 0x19c   :  { %v1048_v16 = vadd.f32 %v1047_v10, %v3420_v20  ;;  %v1136_v58 = vpop.f32.mrf.mxu1  ;;  %v3546_v54 = vunpack.c.l.b16 %v1569_v5  ;;  %v3548_v19 = vpack.c.b16 %v1601_v41, %v1600_v57 }
 0x19e   :  { %4735 = vst [vmem:[#allocation65_spill] sm:$0xff] %v3548_v19  ;;  %v1137_v11 = vadd.f32 %v1136_v58, %v1048_v16  ;;  %1086 = vmatmul.bf16.gmra.mxu0 %v3304_v15 }
 0x19f   :  { %1175 = vmatmul.bf16.gmra.mxu1 %v3379_v42 }
 0x1a0   :  { %v1480_v59 = vpack.c.bf16 %v1137_v11, %v3389_v51 }
 0x1a1   :  { %v909_v2 = vpop.f32.mrf.mxu2 }
 0x1a2   :  { %v3556_v40 = vadd.f32 %v909_v2, %v3460_v50  ;;  %v1570_v1 = vrot.slane %v1480_v59, 4  ;;  %v1602_v51 = vunpack.c.l.b16 %v1480_v59 }
 0x1a3   :  { %v1049_v20 = vpop.f32.mrf.mxu0  ;;  %v3566_v16 = vpop.f32.mrf.mxu3 }
 0x1a4   :  { %v1050_v8 = vadd.f32 %v1049_v20, %v3430_v4  ;;  %v1138_v23 = vpop.f32.mrf.mxu1  ;;  %v3568_v58 = vunpack.c.l.b16 %v1570_v1  ;;  %v2929_v20 = vld [vmem:[#allocation4 + $0x238] sm:$0xf0]  ;;  %v2926_v1 = vld [vmem:[#allocation4 + $0x220] sm:$0xf0] }
 0x1a5   :  { %1219 = vmatmul.bf16.gmra.mxu2 %v3180_v35  ;;  %v2856_v35 = vld [vmem:[#allocation4 + $0x230] sm:$0xf] }
 0x1a6   :  { %v1139_v44 = vadd.f32 %v1138_v23, %v1050_v8  ;;  %1308 = vmatmul.bf16.gmra.mxu3 %v3184_v37  ;;  %v2857_v37 = vor.u32 %v2929_v20, %v2856_v35  ;;  %v2923_v35 = vld [vmem:[#allocation4 + $0x208] sm:$0xf0] }
 0x1a8   :  { %v1482_v57 = vpack.c.bf16 %v1139_v44, %v3397_v21  ;;  %1379 = vmatpush.bf16.msra.mxu0 %v2857_v37  ;;  %v2844_v44 = vld [vmem:[#allocation4 + $0x218] sm:$0xf] }
 0x1a9   :  { %v3563_v5 = vpop.f32.mrf.mxu2 }
 0x1aa   :  { %v1571_v41 = vrot.slane %v1482_v57, 4  ;;  %v1603_v50 = vunpack.c.l.b16 %v1482_v57 }
 0x1ab   :  { %v1052_v10 = vpop.f32.mrf.mxu0 }
 0x1ac   :  { %v1053_v4 = vadd.f32 %v1052_v10, %v3439_v26  ;;  %v1141_v11 = vpop.f32.mrf.mxu1  ;;  %v3571_v2 = vunpack.c.l.b16 %v1571_v41  ;;  %v3573_v21 = vpack.c.b16 %v1603_v50, %v1602_v51  ;;  %v2845_v51 = vor.u32 %v2926_v1, %v2844_v44  ;;  %v3583_v50 = vpop.f32.mrf.mxu3  ;;  %v2920_v44 = vld [vmem:[#allocation4 + $0x1f0] sm:$0xf0] }
 0x1ae   :  { %4736 = vst [vmem:[#allocation66_spill] sm:$0xff] %v3573_v21  ;;  %v1142_v8 = vadd.f32 %v1141_v11, %v1053_v4  ;;  %1091 = vmatmul.bf16.gmra.mxu0 %v3177_v28  ;;  %v2832_v11 = vld [vmem:[#allocation4 + $0x200] sm:$0xf] }
 0x1af   :  { %1180 = vmatmul.bf16.gmra.mxu1 %v3399_v6  ;;  %1380 = vmatpush.bf16.msra.mxu0 %v2845_v51 }
 0x1b0   :  { %v1484_v23 = vpack.c.bf16 %v1142_v8, %v3409_v45  ;;  %v877_v45 = vadd.f32 %v3416_v7, %v3333_v0  ;;  %v2833_v8 = vor.u32 %v2923_v35, %v2832_v11  ;;  %v2808_v11 = vld [vmem:[#allocation4 + $0x1d0] sm:$0xf]  ;;  %v2917_v35 = vld [vmem:[#allocation4 + $0x1d8] sm:$0xf0] }
 0x1b1   :  { %v914_v26 = vpop.f32.mrf.mxu2 }
 0x1b2   :  { %v3581_v57 = vadd.f32 %v914_v26, %v3292_v39  ;;  %v1572_v37 = vrot.slane %v1484_v23, 4  ;;  %v2820_v26 = vld [vmem:[#allocation4 + $0x1e8] sm:$0xf] }
 0x1b3   :  { %v1054_v41 = vpop.f32.mrf.mxu0  ;;  %1381 = vmatpush.bf16.msra.mxu0 %v2833_v8  ;;  %v4739_v8 = vld [vmem:[#allocation37_spill] sm:$0xff] }
 0x1b4   :  { %v1055_v10 = vadd.f32 %v1054_v41, %v3449_v55  ;;  %v1143_v4 = vpop.f32.mrf.mxu1  ;;  %v1604_v55 = vunpack.c.l.b16 %v1484_v23  ;;  %v2821_v41 = vor.u32 %v2920_v44, %v2820_v26  ;;  %v3592_v59 = vpop.f32.mrf.mxu3  ;;  %v3594_v0 = vunpack.c.l.b16 %v1572_v37 }
 0x1b5   :  { %1224 = vmatmul.bf16.gmra.mxu2 %v3192_v47  ;;  %v2809_v23 = vor.u32 %v2917_v35, %v2808_v11  ;;  %v2784_v35 = vld [vmem:[#allocation4 + $0x1a0] sm:$0xf] }
 0x1b6   :  { %v1144_v20 = vadd.f32 %v1143_v4, %v1055_v10  ;;  %1313 = vmatmul.bf16.gmra.mxu3 %v3196_v49  ;;  %v4738_v49 = vld [vmem:[#allocation12_spill] sm:$0xff] }
 0x1b7   :  { %1382 = vmatpush.bf16.msra.mxu0 %v2821_v41 }
 0x1b8   :  { %v1486_v56 = vpack.c.bf16 %v1144_v20, %v877_v45 }
 0x1b9   :  { %v3589_v39 = vpop.f32.mrf.mxu2 }
 0x1ba   :  { %v1573_v1 = vrot.slane %v1486_v56, 4  ;;  %v1605_v51 = vunpack.c.l.b16 %v1486_v56  ;;  %v2911_v56 = vld [vmem:[#allocation4 + $0x1a8] sm:$0xf0] }
 0x1bb   :  { %v1057_v13 = vpop.f32.mrf.mxu0  ;;  %1383 = vmatpush.bf16.msra.mxu0 %v2809_v23  ;;  %v2785_v6 = vor.u32 %v2911_v56, %v2784_v35  ;;  %v4745_v56 = vld [vmem:[#allocation64_spill] sm:$0xff] }
 0x1bc   :  { %v1058_v7 = vadd.f32 %v1057_v13, %v3458_v43  ;;  %v1146_v10 = vpop.f32.mrf.mxu1  ;;  %v3597_v47 = vunpack.c.l.b16 %v1573_v1  ;;  %v3599_v4 = vpack.c.b16 %v1605_v51, %v1604_v55  ;;  %v2796_v43 = vld [vmem:[#allocation4 + $0x1b8] sm:$0xf]  ;;  %v2914_v13 = vld [vmem:[#allocation4 + $0x1c0] sm:$0xf0]  ;;  %v3608_v55 = vpop.f32.mrf.mxu3  ;;  %v4740_v1 = vld [vmem:[#allocation53_spill] sm:$0xff] }
 0x1bd   :  { %v2797_v26 = vor.u32 %v2914_v13, %v2796_v43  ;;  %v4743_v43 = vld [vmem:[#allocation15_spill] sm:$0xff] }
 0x1be   :  { %4737 = vst [vmem:[#allocation67_spill] sm:$0xff] %v3599_v4  ;;  %1096 = vmatmul.bf16.gmra.mxu0 %v4738_v49  ;;  %v1147_v45 = vadd.f32 %v1146_v10, %v1058_v7  ;;  %v4741_v7 = vld [vmem:[#allocation45_spill] sm:$0xff]  ;;  %v4742_v10 = vld [vmem:[#allocation55_spill] sm:$0xff] }
 0x1bf   :  { %1185 = vmatmul.bf16.gmra.mxu1 %v3418_v27  ;;  %1384 = vmatpush.bf16.msra.mxu0 %v2797_v26  ;;  %v882_v23 = vadd.f32 %v4742_v10, %v4741_v7  ;;  %v4747_v7 = vld [vmem:[#allocation14_spill] sm:$0xff]  ;;  %v4748_v10 = vld [vmem:[#allocation56_spill] sm:$0xff] }
 0x1c0   :  { %v1488_v51 = vpack.c.bf16 %v1147_v45, %v4740_v1  ;;  %v2908_v45 = vld [vmem:[#allocation4 + $0x190] sm:$0xf0]  ;;  %v4744_v1 = vld [vmem:[#allocation17_spill] sm:$0xff] }
 0x1c1   :  { %v919_v20 = vpop.f32.mrf.mxu2 }
 0x1c2   :  { %v3606_v37 = vadd.f32 %v919_v20, %v4739_v8  ;;  %v1574_v42 = vrot.slane %v1488_v51, 4  ;;  %v2772_v8 = vld [vmem:[#allocation4 + $0x188] sm:$0xf] }
 0x1c3   :  { %v1059_v44 = vpop.f32.mrf.mxu0  ;;  %1385 = vmatpush.bf16.msra.mxu0 %v2785_v6  ;;  %v2773_v61 = vor.u32 %v2908_v45, %v2772_v8 }
 0x1c4   :  { %v1060_v41 = vadd.f32 %v1059_v44, %v3468_v25  ;;  %v1148_v11 = vpop.f32.mrf.mxu1  ;;  %v1606_v25 = vunpack.c.l.b16 %v1488_v51  ;;  %v3618_v21 = vpop.f32.mrf.mxu3 }
 0x1c5   :  { %1229 = vmatmul.bf16.gmra.mxu2 %v4743_v43  ;;  %v4749_v43 = vld [vmem:[#allocation40_spill] sm:$0xff] }
 0x1c6   :  { %v1149_v27 = vadd.f32 %v1148_v11, %v1060_v41  ;;  %1318 = vmatmul.bf16.gmra.mxu3 %v4744_v1  ;;  %v3620_v41 = vunpack.c.l.b16 %v1574_v42 }
 0x1c7   :  { %1386 = vmatpush.bf16.msra.mxu0 %v2773_v61  ;;  %v4751_v61 = vld [vmem:[#allocation57_spill] sm:$0xff] }
 0x1c8   :  { %v1490_v20 = vpack.c.bf16 %v1149_v27, %v882_v23 }
 0x1c9   :  { %v3615_v13 = vpop.f32.mrf.mxu2 }
 0x1ca   :  { %v1575_v26 = vrot.slane %v1490_v20, 4  ;;  %v1607_v44 = vunpack.c.l.b16 %v1490_v20 }
 0x1cb   :  { %v1062_v4 = vpop.f32.mrf.mxu0 }
 0x1cc   :  { %v1063_v27 = vadd.f32 %v1062_v4, %v4745_v56  ;;  %v1151_v6 = vpop.f32.mrf.mxu1  ;;  %v3623_v11 = vunpack.c.l.b16 %v1575_v26  ;;  %v3625_v35 = vpack.c.b16 %v1607_v44, %v1606_v25  ;;  %v3634_v4 = vpop.f32.mrf.mxu3  ;;  %v4752_v26 = vld [vmem:[#allocation47_spill] sm:$0xff] }
 0x1cd   :  { %v4753_v44 = vld [vmem:[#allocation59_spill] sm:$0xff] }
 0x1ce   :  { %4746 = vst [vmem:[#allocation37_spill] sm:$0xff] %v3625_v35  ;;  %1101 = vmatmul.bf16.gmra.mxu0 %v4747_v7  ;;  %v1152_v23 = vadd.f32 %v1151_v6, %v1063_v27  ;;  %v887_v56 = vadd.f32 %v4753_v44, %v4752_v26  ;;  %v4756_v6 = vld [vmem:[#allocation21_spill] sm:$0xff] }
 0x1cf   :  { %1190 = vmatmul.bf16.gmra.mxu1 %v4748_v10  ;;  %v4754_v10 = vld [vmem:[#allocation19_spill] sm:$0xff] }
 0x1d0   :  { %v1492_v45 = vpack.c.bf16 %v1152_v23, %v4751_v61 }
 0x1d1   :  { %v924_v20 = vpop.f32.mrf.mxu2 }
 0x1d2   :  { %v3632_v42 = vadd.f32 %v924_v20, %v4749_v43  ;;  %v1576_v51 = vrot.slane %v1492_v45, 4  ;;  %v1608_v20 = vunpack.c.l.b16 %v1492_v45  ;;  %v4760_v45 = vld [vmem:[#allocation43_spill] sm:$0xff] }
 0x1d3   :  { %v1064_v8 = vpop.f32.mrf.mxu0 }
 0x1d4   :  { %4750 = vst [vmem:[#allocation53_spill] sm:$0xff] %v3632_v42  ;;  %v1065_v1 = vadd.f32 %v1064_v8, %v3484_v38  ;;  %v1153_v25 = vpop.f32.mrf.mxu1  ;;  %v3644_v23 = vpop.f32.mrf.mxu3  ;;  %v1640_v38 = vunpack.c.l.b16 %v1576_v51  ;;  %v4762_v51 = vld [vmem:[#allocation61_spill] sm:$0xff] }
 0x1d5   :  { %1234 = vmatmul.bf16.gmra.mxu2 %v4754_v10 }
 0x1d6   :  { %v1154_v35 = vadd.f32 %v1153_v25, %v1065_v1  ;;  %1323 = vmatmul.bf16.gmra.mxu3 %v4756_v6  ;;  %v4759_v25 = vld [vmem:[#allocation60_spill] sm:$0xff] }
 0x1d8   :  { %v1494_v7 = vpack.c.bf16 %v1154_v35, %v887_v56  ;;  %v4758_v35 = vld [vmem:[#allocation18_spill] sm:$0xff] }
 0x1d9   :  { %v3641_v27 = vpop.f32.mrf.mxu2 }
 0x1da   :  { %4755 = vst [vmem:[#allocation45_spill] sm:$0xff] %v3641_v27  ;;  %v1577_v43 = vrot.slane %v1494_v7, 4  ;;  %v1609_v49 = vunpack.c.l.b16 %v1494_v7 }
 0x1db   :  { %v1067_v42 = vpop.f32.mrf.mxu0 }
 0x1dc   :  { %v1068_v8 = vadd.f32 %v1067_v42, %v3493_v33  ;;  %v1156_v61 = vpop.f32.mrf.mxu1  ;;  %v1641_v26 = vunpack.c.l.b16 %v1577_v43  ;;  %v3647_v1 = vpack.c.b16 %v1609_v49, %v1608_v20  ;;  %v3654_v27 = vpop.f32.mrf.mxu3  ;;  %v4763_v49 = vld [vmem:[#allocation49_spill] sm:$0xff]  ;;  %v4764_v20 = vld [vmem:[#allocation63_spill] sm:$0xff] }
 0x1dd   :  { %v892_v43 = vadd.f32 %v4764_v20, %v4763_v49 }
 0x1de   :  { %4757 = vst [vmem:[#allocation55_spill] sm:$0xff] %v3647_v1  ;;  %1106 = vmatmul.bf16.gmra.mxu0 %v4758_v35  ;;  %v1650_v10 = vpack.c.b16 %v1641_v26, %v1640_v38  ;;  %v1157_v44 = vadd.f32 %v1156_v61, %v1068_v8  ;;  %v4766_v8 = vld [vmem:[#allocation24_spill] sm:$0xff] }
 0x1df   :  { %1195 = vmatmul.bf16.gmra.mxu1 %v4759_v25  ;;  %v4765_v25 = vld [vmem:[#allocation22_spill] sm:$0xff] }
 0x1e0   :  { %v1496_v19 = vpack.c.bf16 %v1157_v44, %v4762_v51 }
 0x1e1   :  { %v929_v56 = vpop.f32.mrf.mxu2 }
 0x1e2   :  { %v3652_v6 = vadd.f32 %v929_v56, %v4760_v45  ;;  %v1578_v38 = vrot.slane %v1496_v19, 4  ;;  %v1610_v61 = vunpack.c.l.b16 %v1496_v19 }
 0x1e3   :  { %v1069_v7 = vpop.f32.mrf.mxu0 }
 0x1e4   :  { %4761 = vst [vmem:[#allocation15_spill] sm:$0xff] %v3652_v6  ;;  %v1070_v33 = vadd.f32 %v1069_v7, %v3508_v53  ;;  %v1158_v42 = vpop.f32.mrf.mxu1  ;;  %v3662_v6 = vpop.f32.mrf.mxu3  ;;  %v1642_v44 = vunpack.c.l.b16 %v1578_v38  ;;  %v4768_v38 = vld [vmem:[#allocation51_spill] sm:$0xff] }
 0x1e5   :  { %1239 = vmatmul.bf16.gmra.mxu2 %v4765_v25 }
 0x1e6   :  { %v1159_v1 = vadd.f32 %v1158_v42, %v1070_v33  ;;  %1328 = vmatmul.bf16.gmra.mxu3 %v4766_v8  ;;  %v4767_v42 = vld [vmem:[#allocation16_spill] sm:$0xff] }
 0x1e8   :  { %v1498_v26 = vpack.c.bf16 %v1159_v1, %v892_v43 }
 0x1ea   :  { %v1579_v56 = vrot.slane %v1498_v26, 4  ;;  %v1611_v45 = vunpack.c.l.b16 %v1498_v26  ;;  %v897_v26 = vadd.f32 %v3489_v60, %v4768_v38 }
 0x1eb   :  { %v1072_v35 = vpop.f32.mrf.mxu0 }
 0x1ec   :  { %v1643_v51 = vunpack.c.l.b16 %v1579_v56  ;;  %v1073_v53 = vadd.f32 %v1072_v35, %v3516_v36  ;;  %v1161_v7 = vpop.f32.mrf.mxu1  ;;  %v3665_v28 = vpack.c.b16 %v1611_v45, %v1610_v61  ;;  %v3669_v49 = vpop.f32.mrf.mxu3  ;;  %v4769_v61 = vld [vmem:[#allocation25_spill] sm:$0xff]  ;;  %v4770_v56 = vld [vmem:[#allocation27_spill] sm:$0xff] }
 0x1ee   :  { %v1162_v33 = vadd.f32 %v1161_v7, %v1073_v53  ;;  %1387 = vmatmul.bf16.vlgmr.msra.gmra.mxu0 %v4767_v42  ;;  %v1651_v1 = vpack.c.b16 %v1643_v51, %v1642_v44 }
 0x1f0   :  { %v1500_v25 = vpack.c.bf16 %v1162_v33, %v3482_v63  ;;  %1660 = vmatpush.bf16.xpose.msra.mxu1 %v1651_v1  ;;  %v4771_v1 = vld [vmem:[#allocation20_spill] sm:$0xff] }
 0x1f2   :  { %v1580_v35 = vrot.slane %v1500_v25, 4  ;;  %v1709_v45 = vunpack.c.l.b16 %v1500_v25 }
 0x1f3   :  { %v1074_v19 = vpop.f32.mrf.mxu0 }
 0x1f4   :  { %v1075_v20 = vadd.f32 %v1074_v19, %v3533_v18  ;;  %v1163_v43 = vpop.f32.mrf.mxu1  ;;  %v3676_v53 = vpop.f32.mrf.mxu3  ;;  %v3678_v7 = vunpack.c.l.b16 %v1580_v35  ;;  %v4773_v35 = vld [vmem:[#allocation54_spill] sm:$0xff] }
 0x1f5   :  { %1244 = vmatmul.bf16.gmra.mxu2 %v4769_v61 }
 0x1f6   :  { %v1164_v36 = vadd.f32 %v1163_v43, %v1075_v20  ;;  %1333 = vmatmul.bf16.gmra.mxu3 %v4770_v56  ;;  %v4772_v20 = vpack.c.b16 %v3623_v11, %v3620_v41  ;;  %v3692_v43 = vpop.f32.mrf.mxu2  ;;  %v4775_v41 = vld [vmem:[#allocation28_spill] sm:$0xff] }
 0x1f8   :  { %v1502_v8 = vpack.c.bf16 %v1164_v36, %v897_v26  ;;  %1661 = vmatpush.bf16.xpose.msra.mxu1 %v1650_v10 }
 0x1fa   :  { %v1581_v63 = vrot.slane %v1502_v8, 4  ;;  %v1710_v44 = vunpack.c.l.b16 %v1502_v8  ;;  %v902_v8 = vadd.f32 %v3513_v62, %v4773_v35 }
 0x1fb   :  { %v1077_v51 = vpop.f32.mrf.mxu0 }
 0x1fc   :  { %v3680_v18 = vpack.c.b16 %v1710_v44, %v1709_v45  ;;  %v1078_v60 = vadd.f32 %v1077_v51, %v3541_v29  ;;  %v1166_v33 = vpop.f32.mrf.mxu1  ;;  %v3683_v42 = vunpack.c.l.b16 %v1581_v63  ;;  %v3694_v26 = vpop.f32.mrf.mxu3 }
 0x1fe   :  { %v1167_v10 = vadd.f32 %v1166_v33, %v1078_v60  ;;  %1392 = vmatmul.bf16.gmra.mxu0 %v4771_v1  ;;  %v1757_v25 = vpack.c.b16 %v3683_v42, %v3678_v7  ;;  %v4815_v7 = vld [vmem:[#allocation50_spill] sm:$0xff] }
 0x200   :  { %v1504_v19 = vpack.c.bf16 %v1167_v10, %v3506_v32  ;;  %1662 = vmatpush.bf16.xpose.msra.mxu1 %v4772_v20  ;;  %v4774_v32 = vpack.c.b16 %v3597_v47, %v3594_v0  ;;  %v4776_v47 = vld [vmem:[#allocation23_spill] sm:$0xff] }
 0x202   :  { %v1582_v56 = vrot.slane %v1504_v19, 4  ;;  %v1711_v11 = vunpack.c.l.b16 %v1504_v19 }
 0x203   :  { %v1079_v38 = vpop.f32.mrf.mxu0 }
 0x204   :  { %v1080_v29 = vadd.f32 %v1079_v38, %v3558_v31  ;;  %v1168_v36 = vpop.f32.mrf.mxu1  ;;  %v3704_v60 = vunpack.c.l.b16 %v1582_v56  ;;  %v4777_v38 = vpack.c.b16 %v3571_v2, %v3568_v58  ;;  %v4779_v58 = vpack.c.b16 %v3546_v54, %v3543_v48  ;;  %v4780_v2 = vld [vmem:[#allocation30_spill] sm:$0xff] }
 0x205   :  { %1249 = vmatmul.bf16.gmra.mxu2 %v4775_v41  ;;  %v4781_v54 = vld [vmem:[#allocation26_spill] sm:$0xff] }
 0x206   :  { %v1169_v61 = vadd.f32 %v1168_v36, %v1080_v29  ;;  %1338 = vmatmul.bf16.gmra.mxu3 %v3250_v22 }
 0x208   :  { %v1506_v45 = vpack.c.bf16 %v1169_v61, %v902_v8  ;;  %1663 = vmatpush.bf16.xpose.msra.mxu1 %v4774_v32  ;;  %v1210_v31 = vpop.f32.mrf.mxu2 }
 0x209   :  { %v1299_v10 = vpop.f32.mrf.mxu3 }
 0x20a   :  { %v1583_v63 = vrot.slane %v1506_v45, 4  ;;  %v1712_v44 = vunpack.c.l.b16 %v1506_v45  ;;  %v3719_v8 = vadd.f32 %v1299_v10, %v1210_v31  ;;  %v4778_v45 = vld [vmem:[#allocation58_spill] sm:$0xff] }
 0x20b   :  { %v1082_v51 = vpop.f32.mrf.mxu0  ;;  %v907_v32 = vadd.f32 %v3538_v3, %v4778_v45 }
 0x20c   :  { %v1083_v62 = vadd.f32 %v1082_v51, %v3566_v16  ;;  %v1171_v33 = vpop.f32.mrf.mxu1  ;;  %v3707_v1 = vunpack.c.l.b16 %v1583_v63  ;;  %v3709_v20 = vpack.c.b16 %v1712_v44, %v1711_v11 }
 0x20e   :  { %v1172_v0 = vadd.f32 %v1171_v33, %v1083_v62  ;;  %1397 = vmatmul.bf16.gmra.mxu0 %v4776_v47  ;;  %v1758_v22 = vpack.c.b16 %v3707_v1, %v3704_v60 }
 0x210   :  { %v1508_v19 = vpack.c.bf16 %v1172_v0, %v3531_v14  ;;  %1664 = vmatpush.bf16.xpose.msra.mxu1 %v4777_v38  ;;  %v1212_v16 = vpop.f32.mrf.mxu2  ;;  %v4782_v38 = vpack.c.b16 %v3521_v52, %v3518_v30  ;;  %v4784_v30 = vpack.c.b16 %v3498_v17, %v3491_v12  ;;  %v4785_v52 = vld [vmem:[#allocation32_spill] sm:$0xff]  ;;  %v4786_v17 = vld [vmem:[#allocation29_spill] sm:$0xff] }
 0x211   :  { %v1301_v61 = vpop.f32.mrf.mxu3 }
 0x212   :  { %v3721_v56 = vadd.f32 %v1301_v61, %v1212_v16  ;;  %v1584_v11 = vrot.slane %v1508_v19, 4 }
 0x213   :  { %v1084_v29 = vpop.f32.mrf.mxu0 }
 0x214   :  { %v1085_v36 = vadd.f32 %v1084_v29, %v3583_v50  ;;  %v1173_v35 = vpop.f32.mrf.mxu1  ;;  %v1713_v50 = vunpack.c.l.b16 %v1508_v19  ;;  %v3730_v62 = vunpack.c.l.b16 %v1584_v11 }
 0x215   :  { %1254 = vmatmul.bf16.gmra.mxu2 %v4780_v2 }
 0x216   :  { %v1174_v41 = vadd.f32 %v1173_v35, %v1085_v36  ;;  %1343 = vmatmul.bf16.gmra.mxu3 %v3268_v34 }
 0x218   :  { %v1510_v14 = vpack.c.bf16 %v1174_v41, %v907_v32  ;;  %1665 = vmatpush.bf16.xpose.msra.mxu1 %v4779_v58  ;;  %v1215_v31 = vpop.f32.mrf.mxu2  ;;  %v4783_v32 = vld [vmem:[#allocation62_spill] sm:$0xff] }
 0x219   :  { %v1304_v10 = vpop.f32.mrf.mxu3  ;;  %v912_v41 = vadd.f32 %v3563_v5, %v4783_v32 }
 0x21a   :  { %v1585_v63 = vrot.slane %v1510_v14, 4  ;;  %v1714_v44 = vunpack.c.l.b16 %v1510_v14  ;;  %v3745_v35 = vadd.f32 %v1304_v10, %v1215_v31 }
 0x21b   :  { %v1087_v51 = vpop.f32.mrf.mxu0 }
 0x21c   :  { %v1088_v3 = vadd.f32 %v1087_v51, %v3592_v59  ;;  %v1176_v33 = vpop.f32.mrf.mxu1  ;;  %v3733_v0 = vunpack.c.l.b16 %v1585_v63  ;;  %v3735_v47 = vpack.c.b16 %v1714_v44, %v1713_v50 }
 0x21e   :  { %v1177_v48 = vadd.f32 %v1176_v33, %v1088_v3  ;;  %1402 = vmatmul.bf16.gmra.mxu0 %v4781_v54  ;;  %v1759_v34 = vpack.c.b16 %v3733_v0, %v3730_v62 }
 0x220   :  { %v1512_v19 = vpack.c.bf16 %v1177_v48, %v3556_v40  ;;  %1666 = vmatpush.bf16.xpose.msra.mxu1 %v4782_v38  ;;  %v1217_v59 = vpop.f32.mrf.mxu2 }
 0x221   :  { %v1306_v61 = vpop.f32.mrf.mxu3 }
 0x222   :  { %v3747_v45 = vadd.f32 %v1306_v61, %v1217_v59  ;;  %v1586_v14 = vrot.slane %v1512_v19, 4 }
 0x223   :  { %v1089_v29 = vpop.f32.mrf.mxu0 }
 0x224   :  { %v1090_v16 = vadd.f32 %v1089_v29, %v3608_v55  ;;  %v1178_v36 = vpop.f32.mrf.mxu1  ;;  %v1715_v55 = vunpack.c.l.b16 %v1512_v19  ;;  %v3756_v44 = vunpack.c.l.b16 %v1586_v14 }
 0x225   :  { %1259 = vmatmul.bf16.gmra.mxu2 %v4785_v52 }
 0x226   :  { %v1179_v11 = vadd.f32 %v1178_v36, %v1090_v16  ;;  %1348 = vmatmul.bf16.gmra.mxu3 %v3284_v9  ;;  %v4787_v16 = vld [vmem:[#allocation34_spill] sm:$0xff] }
 0x227   :  { %v917_v36 = vadd.f32 %v3589_v39, %v4787_v16 }
 0x228   :  { %v1514_v40 = vpack.c.bf16 %v1179_v11, %v912_v41  ;;  %1667 = vmatpush.bf16.xpose.msra.mxu1 %v4784_v30  ;;  %v1220_v63 = vpop.f32.mrf.mxu2  ;;  %v4788_v11 = vld [vmem:[#allocation35_spill] sm:$0xff] }
 0x229   :  { %v1309_v31 = vpop.f32.mrf.mxu3 }
 0x22a   :  { %v1587_v58 = vrot.slane %v1514_v40, 4  ;;  %v1716_v2 = vunpack.c.l.b16 %v1514_v40  ;;  %v3769_v38 = vadd.f32 %v1309_v31, %v1220_v63 }
 0x22b   :  { %v1092_v50 = vpop.f32.mrf.mxu0 }
 0x22c   :  { %v1093_v5 = vadd.f32 %v1092_v50, %v3618_v21  ;;  %v1181_v51 = vpop.f32.mrf.mxu1  ;;  %v3759_v3 = vunpack.c.l.b16 %v1587_v58  ;;  %v3761_v33 = vpack.c.b16 %v1716_v2, %v1715_v55  ;;  %v4789_v50 = vld [vmem:[#allocation31_spill] sm:$0xff] }
 0x22e   :  { %v1182_v12 = vadd.f32 %v1181_v51, %v1093_v5  ;;  %1407 = vmatmul.bf16.gmra.mxu0 %v4786_v17  ;;  %v1760_v9 = vpack.c.b16 %v3759_v3, %v3756_v44 }
 0x22f   :  { %1668 = vmatmul.bf16.vlgmr.msra.gmra.mxu1 %v3495_v46 }
 0x230   :  { %v1516_v10 = vpack.c.bf16 %v1182_v12, %v3581_v57  ;;  %v1222_v54 = vpop.f32.mrf.mxu2 }
 0x231   :  { %v1311_v29 = vpop.f32.mrf.mxu3 }
 0x232   :  { %v3771_v59 = vadd.f32 %v1311_v29, %v1222_v54  ;;  %v1588_v32 = vrot.slane %v1516_v10, 4  ;;  %v1717_v46 = vunpack.c.l.b16 %v1516_v10  ;;  %v4790_v54 = vld [vmem:[#allocation38_spill] sm:$0xff] }
 0x233   :  { %v1094_v48 = vpop.f32.mrf.mxu0 }
 0x234   :  { %v1095_v21 = vadd.f32 %v1094_v48, %v3634_v4  ;;  %v1183_v19 = vpop.f32.mrf.mxu1  ;;  %v3777_v30 = vunpack.c.l.b16 %v1588_v32 }
 0x235   :  { %1264 = vmatmul.bf16.gmra.mxu2 %v4788_v11 }
 0x236   :  { %v1184_v61 = vadd.f32 %v1183_v19, %v1095_v21  ;;  %1353 = vmatmul.bf16.gmra.mxu3 %v3304_v15  ;;  %v922_v21 = vadd.f32 %v3615_v13, %v4790_v54  ;;  %v4797_v54 = vld [vmem:[#allocation45_spill] sm:$0xff] }
 0x238   :  { %v1518_v41 = vpack.c.bf16 %v1184_v61, %v917_v36  ;;  %v1225_v40 = vpop.f32.mrf.mxu2  ;;  %v4792_v36 = vld [vmem:[#allocation10_spill] sm:$0xff] }
 0x239   :  { %v1314_v39 = vpop.f32.mrf.mxu3 }
 0x23a   :  { %v1589_v57 = vrot.slane %v1518_v41, 4  ;;  %v1718_v14 = vunpack.c.l.b16 %v1518_v41  ;;  %v3790_v17 = vadd.f32 %v1314_v39, %v1225_v40  ;;  %v4793_v40 = vld [vmem:[#allocation33_spill] sm:$0xff] }
 0x23b   :  { %v1097_v4 = vpop.f32.mrf.mxu0 }
 0x23c   :  { %v1098_v52 = vadd.f32 %v1097_v4, %v3644_v23  ;;  %v1186_v55 = vpop.f32.mrf.mxu1  ;;  %v3780_v58 = vunpack.c.l.b16 %v1589_v57  ;;  %v3782_v2 = vpack.c.b16 %v1718_v14, %v1717_v46 }
 0x23e   :  { %1412 = vmatmul.bf16.gmra.mxu0 %v4789_v50  ;;  %v1761_v15 = vpack.c.b16 %v3780_v58, %v3777_v30  ;;  %v1187_v63 = vadd.f32 %v1186_v55, %v1098_v52  ;;  %v4794_v55 = vld [vmem:[#allocation65_spill] sm:$0xff] }
 0x23f   :  { %1673 = vmatmul.bf16.gmra.mxu1 %v3523_v24  ;;  %v4791_v24 = vld [vmem:[#allocation8_spill] sm:$0xff] }
 0x240   :  { %v1227_v51 = vpop.f32.mrf.mxu2  ;;  %v1520_v31 = vpack.c.bf16 %v1187_v63, %v3606_v37 }
 0x241   :  { %v1316_v10 = vpop.f32.mrf.mxu3 }
 0x242   :  { %v3792_v48 = vadd.f32 %v1316_v10, %v1227_v51  ;;  %v1590_v29 = vrot.slane %v1520_v31, 4  ;;  %v1719_v61 = vunpack.c.l.b16 %v1520_v31  ;;  %v4796_v10 = vld [vmem:[#allocation41_spill] sm:$0xff] }
 0x243   :  { %v1099_v5 = vpop.f32.mrf.mxu0 }
 0x244   :  { %v1100_v23 = vadd.f32 %v1099_v5, %v3654_v27  ;;  %v1188_v12 = vpop.f32.mrf.mxu1  ;;  %v3798_v11 = vunpack.c.l.b16 %v1590_v29  ;;  %v4795_v5 = vld [vmem:[#allocation53_spill] sm:$0xff] }
 0x245   :  { %1269 = vmatmul.bf16.gmra.mxu2 %v4791_v24  ;;  %v4798_v24 = vld [vmem:[#allocation9_spill] sm:$0xff] }
 0x246   :  { %v1189_v19 = vadd.f32 %v1188_v12, %v1100_v23  ;;  %1358 = vmatmul.bf16.gmra.mxu3 %v4792_v36  ;;  %v4799_v36 = vld [vmem:[#allocation12_spill] sm:$0xff] }
 0x248   :  { %v1522_v16 = vpack.c.bf16 %v1189_v19, %v922_v21  ;;  %v1230_v41 = vpop.f32.mrf.mxu2  ;;  %v927_v21 = vadd.f32 %v4797_v54, %v4796_v10  ;;  %v4802_v10 = vld [vmem:[#allocation15_spill] sm:$0xff] }
 0x249   :  { %v1319_v13 = vpop.f32.mrf.mxu3 }
 0x24a   :  { %v1591_v37 = vrot.slane %v1522_v16, 4  ;;  %v1720_v32 = vunpack.c.l.b16 %v1522_v16  ;;  %v3813_v23 = vadd.f32 %v1319_v13, %v1230_v41 }
 0x24b   :  { %v1102_v27 = vpop.f32.mrf.mxu0 }
 0x24c   :  { %v1103_v46 = vadd.f32 %v1102_v27, %v3662_v6  ;;  %v1191_v57 = vpop.f32.mrf.mxu1  ;;  %v3801_v14 = vunpack.c.l.b16 %v1591_v37  ;;  %v3803_v4 = vpack.c.b16 %v1720_v32, %v1719_v61 }
 0x24e   :  { %1417 = vmatmul.bf16.gmra.mxu0 %v4793_v40  ;;  %v1762_v52 = vpack.c.b16 %v3801_v14, %v3798_v11  ;;  %v1192_v39 = vadd.f32 %v1191_v57, %v1103_v46 }
 0x24f   :  { %1678 = vmatmul.bf16.gmra.mxu1 %v4794_v55 }
 0x250   :  { %v3809_v63 = vpop.f32.mrf.mxu2  ;;  %v1524_v51 = vpack.c.bf16 %v1192_v39, %v4795_v5  ;;  %v4800_v39 = vld [vmem:[#allocation36_spill] sm:$0xff]  ;;  %v4801_v5 = vld [vmem:[#allocation66_spill] sm:$0xff] }
 0x251   :  { %v3815_v12 = vpop.f32.mrf.mxu3 }
 0x252   :  { %v1592_v29 = vrot.slane %v1524_v51, 4  ;;  %v1721_v61 = vunpack.c.l.b16 %v1524_v51 }
 0x253   :  { %v1104_v50 = vpop.f32.mrf.mxu0 }
 0x254   :  { %v1105_v6 = vadd.f32 %v1104_v50, %v3669_v49  ;;  %v1193_v31 = vpop.f32.mrf.mxu1  ;;  %v1753_v41 = vunpack.c.l.b16 %v1592_v29  ;;  %v4803_v29 = vld [vmem:[#allocation44_spill] sm:$0xff] }
 0x255   :  { %1274 = vmatmul.bf16.gmra.mxu2 %v4798_v24 }
 0x256   :  { %v1194_v19 = vadd.f32 %v1193_v31, %v1105_v6  ;;  %1363 = vmatmul.bf16.gmra.mxu3 %v4799_v36 }
 0x258   :  { %v1526_v16 = vpack.c.bf16 %v1194_v19, %v927_v21  ;;  %v3821_v49 = vpop.f32.mrf.mxu2 }
 0x259   :  { %v3824_v40 = vpop.f32.mrf.mxu3 }
 0x25a   :  { %v1593_v37 = vrot.slane %v1526_v16, 4  ;;  %v1722_v32 = vunpack.c.l.b16 %v1526_v16  ;;  %v932_v16 = vadd.f32 %v3692_v43, %v4803_v29 }
 0x25b   :  { %v1107_v27 = vpop.f32.mrf.mxu0 }
 0x25c   :  { %v1108_v46 = vadd.f32 %v1107_v27, %v3676_v53  ;;  %v1196_v57 = vpop.f32.mrf.mxu1  ;;  %v1754_v13 = vunpack.c.l.b16 %v1593_v37  ;;  %v3826_v55 = vpack.c.b16 %v1722_v32, %v1721_v61  ;;  %v4804_v37 = vld [vmem:[#allocation11_spill] sm:$0xff]  ;;  %v4805_v32 = vld [vmem:[#allocation14_spill] sm:$0xff] }
 0x25e   :  { %1422 = vmatmul.bf16.gmra.mxu0 %v4800_v39  ;;  %v1763_v50 = vpack.c.b16 %v1754_v13, %v1753_v41  ;;  %v1197_v51 = vadd.f32 %v1196_v57, %v1108_v46 }
 0x25f   :  { %1683 = vmatmul.bf16.gmra.mxu1 %v4801_v5 }
 0x260   :  { %v3830_v31 = vpop.f32.mrf.mxu2  ;;  %v1528_v54 = vpack.c.bf16 %v1197_v51, %v4802_v10 }
 0x261   :  { %v3834_v53 = vpop.f32.mrf.mxu3 }
 0x262   :  { %v1594_v36 = vrot.slane %v1528_v54, 4  ;;  %v1723_v27 = vunpack.c.l.b16 %v1528_v54 }
 0x263   :  { %v1109_v6 = vpop.f32.mrf.mxu0 }
 0x264   :  { %v1110_v21 = vadd.f32 %v1109_v6, %v3694_v26  ;;  %v1198_v19 = vpop.f32.mrf.mxu1  ;;  %v1755_v26 = vunpack.c.l.b16 %v1594_v36  ;;  %v4806_v6 = vld [vmem:[#allocation39_spill] sm:$0xff] }
 0x265   :  { %1279 = vmatmul.bf16.gmra.mxu2 %v4804_v37  ;;  %v4808_v37 = vld [vmem:[#allocation13_spill] sm:$0xff] }
 0x266   :  { %v1199_v24 = vadd.f32 %v1198_v19, %v1110_v21  ;;  %1368 = vmatmul.bf16.gmra.mxu3 %v4805_v32  ;;  %v4807_v21 = vld [vmem:[#allocation67_spill] sm:$0xff]  ;;  %v4809_v32 = vld [vmem:[#allocation18_spill] sm:$0xff] }
 0x268   :  { %v1530_v61 = vpack.c.bf16 %v1199_v24, %v932_v16  ;;  %v3840_v13 = vpop.f32.mrf.mxu2 }
 0x269   :  { %v3843_v51 = vpop.f32.mrf.mxu3 }
 0x26a   :  { %v1595_v41 = vrot.slane %v1530_v61, 4  ;;  %v1724_v46 = vunpack.c.l.b16 %v1530_v61 }
 0x26b   :  { %v1388_v57 = vpop.f32.mrf.mxu0 }
 0x26c   :  { %v1756_v39 = vunpack.c.l.b16 %v1595_v41  ;;  %v1389_v5 = vadd.f32 %v1388_v57, %v3719_v8  ;;  %v3845_v43 = vpack.c.b16 %v1724_v46, %v1723_v27 }
 0x26e   :  { %1427 = vmatmul.bf16.gmra.mxu0 %v4806_v6  ;;  %v1764_v10 = vpack.c.b16 %v1756_v39, %v1755_v26  ;;  %v1469_v29 = vpack.c.bf16 %v1389_v5, %v1389_v5  ;;  %v4810_v26 = vld [vmem:[#allocation42_spill] sm:$0xff]  ;;  %v4811_v39 = vld [vmem:[#allocation37_spill] sm:$0xff] }
 0x26f   :  { %1688 = vmatmul.bf16.gmra.mxu1 %v4807_v21 }
 0x270   :  { %1773 = vmatpush.bf16.xpose.msrb.mxu2 %v1764_v10  ;;  %v3849_v19 = vpop.f32.mrf.mxu2  ;;  %v3854_v8 = vunpack.c.l.b16 %v1469_v29 }
 0x271   :  { %v3852_v24 = vpop.f32.mrf.mxu3 }
 0x273   :  { %v1390_v54 = vpop.f32.mrf.mxu0 }
 0x274   :  { %v1391_v16 = vadd.f32 %v1390_v54, %v3721_v56 }
 0x275   :  { %1284 = vmatmul.bf16.gmra.mxu2 %v4808_v37  ;;  %v4813_v37 = vld [vmem:[#allocation55_spill] sm:$0xff] }
 0x276   :  { %v1471_v36 = vpack.c.bf16 %v1391_v16, %v1391_v16  ;;  %1373 = vmatmul.bf16.gmra.mxu3 %v4809_v32 }
 0x278   :  { %v3856_v61 = vunpack.c.l.b16 %v1471_v36  ;;  %1774 = vmatpush.bf16.xpose.msrb.mxu2 %v1763_v50  ;;  %v3862_v46 = vpop.f32.mrf.mxu2 }
 0x279   :  { %v3865_v57 = vpop.f32.mrf.mxu3 }
 0x27b   :  { %v1393_v41 = vpop.f32.mrf.mxu0 }
 0x27c   :  { %v1394_v56 = vadd.f32 %v1393_v41, %v3745_v35 }
 0x27e   :  { %1432 = vmatmul.bf16.gmra.mxu0 %v4810_v26  ;;  %v1473_v6 = vpack.c.bf16 %v1394_v56, %v1394_v56 }
 0x27f   :  { %1693 = vmatmul.bf16.gmra.mxu1 %v4811_v39 }
 0x280   :  { %1775 = vmatpush.bf16.xpose.msrb.mxu2 %v1762_v52  ;;  %v3872_v5 = vpop.f32.mrf.mxu2  ;;  %v3877_v35 = vunpack.c.l.b16 %v1473_v6  ;;  %v4814_v6 = vld [vmem:[#allocation48_spill] sm:$0xff] }
 0x281   :  { %v3875_v21 = vpop.f32.mrf.mxu3 }
 0x283   :  { %v1395_v50 = vpop.f32.mrf.mxu0 }
 0x284   :  { %v1396_v10 = vadd.f32 %v1395_v50, %v3747_v45  ;;  %v4812_v45 = vld [vmem:[#allocation46_spill] sm:$0xff] }
 0x286   :  { %v1475_v54 = vpack.c.bf16 %v1396_v10, %v1396_v10  ;;  %v1822_v10 = vlaneseq }
 0x288   :  { %v3879_v29 = vunpack.c.l.b16 %v1475_v54  ;;  %1776 = vmatpush.bf16.xpose.msrb.mxu2 %v1761_v15  ;;  %v1250_v52 = vpop.f32.mrf.mxu2 }
 0x289   :  { %v1339_v36 = vpop.f32.mrf.mxu3 }
 0x28a   :  { %v3895_v15 = vadd.f32 %v1339_v36, %v1250_v52  ;;  %v3923_v36 = vand.u32 127, %v1822_v10 }
 0x28b   :  { %v1398_v14 = vpop.f32.mrf.mxu0 }
 0x28c   :  { %v1399_v16 = vadd.f32 %v1398_v14, %v3769_v38 }
 0x28e   :  { %1437 = vmatmul.bf16.gmra.mxu0 %v4812_v45  ;;  %v1477_v30 = vpack.c.bf16 %v1399_v16, %v1399_v16  ;;  %v3921_v16 = vshrl.u32 %v1822_v10, 7  ;;  %v4816_v10 = vld [vmem:[#allocation52_spill] sm:$0xff] }
 0x28f   :  { %1698 = vmatmul.bf16.gmra.mxu1 %v4813_v37 }
 0x290   :  { %1777 = vmatpush.bf16.xpose.msrb.mxu2 %v1760_v9  ;;  %v3892_v41 = vpop.f32.mrf.mxu2  ;;  %v3899_v26 = vunpack.c.l.b16 %v1477_v30  ;;  %vm1841_vm0 = vcmp.le.s32.totalorder %v3923_v36, %v3921_v16  ;;  %v3947_v42 = vadd.s32 8, %v3921_v16 }
 0x291   :  { %v3897_v56 = vpop.f32.mrf.mxu3 }
 0x292   :  { %vm1842_vm1 = vcmp.le.s32.totalorder %v3923_v36, %v3947_v42 }
 0x293   :  { %v1400_v32 = vpop.f32.mrf.mxu0 }
 0x294   :  { %v1401_v58 = vadd.f32 %v1400_v32, %v3771_v59 }
 0x296   :  { %v1479_v38 = vpack.c.bf16 %v1401_v58, %v1401_v58 }
 0x298   :  { %v3901_v39 = vunpack.c.l.b16 %v1479_v38  ;;  %1778 = vmatpush.bf16.xpose.msrb.mxu2 %v1759_v34  ;;  %v1255_v9 = vpop.f32.mrf.mxu2 }
 0x299   :  { %v1344_v50 = vpop.f32.mrf.mxu3 }
 0x29a   :  { %v3917_v14 = vadd.f32 %v1344_v50, %v1255_v9 }
 0x29b   :  { %v1403_v3 = vpop.f32.mrf.mxu0 }
 0x29c   :  { %v1404_v59 = vadd.f32 %v1403_v3, %v3790_v17 }
 0x29e   :  { %1442 = vmatmul.bf16.gmra.mxu0 %v4814_v6  ;;  %v1481_v0 = vpack.c.bf16 %v1404_v59, %v1404_v59 }
 0x29f   :  { %1703 = vmatmul.bf16.gmra.mxu1 %v3665_v28 }
 0x2a0   :  { %1779 = vmatpush.bf16.xpose.msrb.mxu2 %v1758_v22  ;;  %v3914_v62 = vpop.f32.mrf.mxu2  ;;  %v3925_v28 = vunpack.c.l.b16 %v1481_v0 }
 0x2a1   :  { %v3919_v52 = vpop.f32.mrf.mxu3 }
 0x2a3   :  { %v1405_v54 = vpop.f32.mrf.mxu0 }
 0x2a4   :  { %v1406_v34 = vadd.f32 %v1405_v54, %v3792_v48  ;;  %v3981_v54 = vadd.s32 24, %v3921_v16 }
 0x2a6   :  { %v1483_v17 = vpack.c.bf16 %v1406_v34, %v1406_v34  ;;  %4817 = vst [vmem:[#allocation17_spill] sm:$0xff] %v3981_v54  ;;  %vm1844_vm3 = vcmp.le.s32.totalorder %v3923_v36, %v3981_v54 }
 0x2a8   :  { %v3927_v60 = vunpack.c.l.b16 %v1483_v17  ;;  %1780 = vmatpush.bf16.xpose.msrb.mxu2 %v1757_v25  ;;  %v1260_v48 = vpop.f32.mrf.mxu2 }
 0x2a9   :  { %v1349_v32 = vpop.f32.mrf.mxu3 }
 0x2aa   :  { %v3956_v38 = vadd.f32 %v1349_v32, %v1260_v48  ;;  %v3995_v32 = vadd.s32 32, %v3921_v16 }
 0x2ab   :  { %v1408_v22 = vpop.f32.mrf.mxu0 }
 0x2ac   :  { %v3937_v45 = vadd.f32 %v1408_v22, %v3813_v23  ;;  %v1669_v37 = vpop.f32.mrf.mxu1  ;;  %4819 = vst [vmem:[#allocation40_spill] sm:$0xff] %v3995_v32  ;;  %vm1845_vm4 = vcmp.le.s32.totalorder %v3923_v36, %v3995_v32 }
 0x2ad   :  { %v3942_v30 = vsel %vm1841_vm0, %v1669_v37, -1e+30 }
 0x2ae   :  { %1447 = vmatmul.bf16.gmra.mxu0 %v4815_v7  ;;  %1921 = vmax.xlane.f32.xlu0 %v3942_v30 }
 0x2af   :  { %1781 = vmatmul.bf16.vlgmr.msrb.gmra.mxu2 %v3680_v18  ;;  %v3967_v18 = vadd.s32 16, %v3921_v16 }
 0x2b0   :  { %v3954_v58 = vpop.f32.mrf.mxu2 }
 0x2b1   :  { %v3963_v9 = vpop.f32.mrf.mxu3  ;;  %vm1843_vm2 = vcmp.le.s32.totalorder %v3923_v36, %v3967_v18 }
 0x2b3   :  { %v3952_v25 = vpop.f32.mrf.mxu0 }
 0x2b4   :  { %v1671_v23 = vpop.f32.mrf.mxu1 }
 0x2b5   :  { %v3961_v3 = vsel %vm1842_vm1, %v1671_v23, -1e+30 }
 0x2b6   :  { %1923 = vmax.xlane.f32.xlu0 %v3961_v3 }
 0x2b8   :  { %v1265_v0 = vpop.f32.mrf.mxu2 }
 0x2b9   :  { %v1354_v34 = vpop.f32.mrf.mxu3 }
 0x2ba   :  { %v3986_v48 = vadd.f32 %v1354_v34, %v1265_v0  ;;  %v4821_v0 = vld [vmem:[#allocation56_spill] sm:$0xff]  ;;  %v4011_v34 = vadd.s32 40, %v3921_v16 }
 0x2bb   :  { %v3971_v59 = vpop.f32.mrf.mxu0 }
 0x2bc   :  { %v1674_v50 = vpop.f32.mrf.mxu1  ;;  %4822 = vst [vmem:[#allocation47_spill] sm:$0xff] %v4011_v34  ;;  %vm1846_vm5 = vcmp.le.s32.totalorder %v3923_v36, %v4011_v34  ;;  %v1332_v34 = vadd.f32 %v3852_v24, %v3849_v19 }
 0x2bd   :  { %v3976_v6 = vsel %vm1843_vm2, %v1674_v50, -1e+30 }
 0x2be   :  { %1452 = vmatmul.bf16.gmra.mxu0 %v4816_v10  ;;  %1925 = vmax.xlane.f32.xlu2 %v3976_v6 }
 0x2bf   :  { %1786 = vmatmul.bf16.gmra.mxu2 %v3709_v20 }
 0x2c0   :  { %v3997_v7 = vpop.f32.mrf.mxu2 }
 0x2c1   :  { %v3999_v20 = vpop.f32.mrf.mxu3 }
 0x2c3   :  { %v1415_v17 = vpop.f32.mrf.mxu0 }
 0x2c4   :  { %v1676_v22 = vpop.f32.mrf.mxu1 }
 0x2c5   :  { %v3991_v37 = vsel %vm1844_vm3, %v1676_v22, -1e+30 }
 0x2c6   :  { %4818 = vst [vmem:[#allocation64_spill] sm:$0xff] %v3991_v37  ;;  %1927 = vmax.xlane.f32.xlu2 %v3991_v37 }
 0x2c8   :  { %v1270_v22 = vpop.f32.mrf.mxu2 }
 0x2c9   :  { %v1359_v11 = vpop.f32.mrf.mxu3 }
 0x2ca   :  { %v4016_v1 = vadd.f32 %v1359_v11, %v1270_v22  ;;  %v1335_v22 = vadd.f32 %v3865_v57, %v3862_v46  ;;  %v1337_v46 = vadd.f32 %v3875_v21, %v3872_v5 }
 0x2cb   :  { %v1418_v23 = vpop.f32.mrf.mxu0 }
 0x2cc   :  { %v1679_v50 = vpop.f32.mrf.mxu1 }
 0x2cd   :  { %v4006_v10 = vsel %vm1845_vm4, %v1679_v50, -1e+30 }
 0x2ce   :  { %4820 = vst [vmem:[#allocation57_spill] sm:$0xff] %v4006_v10  ;;  %1457 = vmatmul.bf16.gmra.mxu0 %v4821_v0  ;;  %1929 = vmax.xlane.f32.xlu2 %v4006_v10  ;;  %v4025_v0 = vadd.s32 48, %v3921_v16 }
 0x2cf   :  { %1791 = vmatmul.bf16.gmra.mxu2 %v3735_v47 }
 0x2d0   :  { %4824 = vst [vmem:[#allocation19_spill] sm:$0xff] %v4025_v0  ;;  %vm1847_vm6 = vcmp.le.s32.totalorder %v3923_v36, %v4025_v0 }
 0x2d3   :  { %v1420_v27 = vpop.f32.mrf.mxu0 }
 0x2d4   :  { %v1681_v44 = vpop.f32.mrf.mxu1  ;;  %v1421_v0 = vadd.f32 %v1420_v27, %v1332_v34 }
 0x2d5   :  { %v4021_v50 = vsel %vm1846_vm5, %v1681_v44, -1e+30  ;;  %v4826_v44 = vld [vmem:[#allocation60_spill] sm:$0xff] }
 0x2d6   :  { %4823 = vst [vmem:[#allocation59_spill] sm:$0xff] %v4021_v50  ;;  %1931 = vmax.xlane.f32.xlu0 %v4021_v50  ;;  %v4039_v50 = vadd.s32 56, %v3921_v16  ;;  %v1495_v24 = vpack.c.bf16 %v1421_v0, %v1421_v0 }
 0x2d8   :  { %vm1848_vm7 = vcmp.le.s32.totalorder %v3923_v36, %v4039_v50  ;;  %v2318_v34 = vunpack.c.l.b16 %v1495_v24 }
 0x2db   :  { %v1423_v47 = vpop.f32.mrf.mxu0 }
 0x2dc   :  { %v1684_v10 = vpop.f32.mrf.mxu1  ;;  %v1424_v37 = vadd.f32 %v1423_v47, %v1335_v22 }
 0x2dd   :  { %v4032_v11 = vsel %vm1847_vm6, %v1684_v10, -1e+30  ;;  %v1330_v10 = vadd.f32 %v3843_v51, %v3840_v13  ;;  %v1325_v13 = vadd.f32 %v3824_v40, %v3821_v49 }
 0x2de   :  { %4825 = vst [vmem:[#allocation21_spill] sm:$0xff] %v4032_v11  ;;  %1462 = vmatmul.bf16.gmra.mxu0 %v4826_v44  ;;  %1933 = vmax.xlane.f32.xlu0 %v4032_v11  ;;  %v1327_v44 = vadd.f32 %v3834_v53, %v3830_v31  ;;  %v1322_v31 = vadd.f32 %v3815_v12, %v3809_v63  ;;  %v4065_v63 = vpop.f32.mrf.mxu2 }
 0x2df   :  { %1796 = vmatmul.bf16.gmra.mxu2 %v3761_v33  ;;  %v1419_v11 = vadd.f32 %v1418_v23, %v1330_v10  ;;  %v1497_v33 = vpack.c.bf16 %v1424_v37, %v1424_v37  ;;  %v1414_v53 = vadd.f32 %v3971_v59, %v1325_v13  ;;  %v1485_v12 = vpack.c.bf16 %v3937_v45, %v3937_v45 }
 0x2e0   :  { %v1416_v51 = vadd.f32 %v1415_v17, %v1327_v44  ;;  %v1411_v23 = vadd.f32 %v3952_v25, %v1322_v31 }
 0x2e1   :  { %v1493_v5 = vpack.c.bf16 %v1419_v11, %v1419_v11  ;;  %v2319_v21 = vunpack.c.l.b16 %v1497_v33  ;;  %v1489_v49 = vpack.c.bf16 %v1414_v53, %v1414_v53  ;;  %v4828_v53 = vpack.c.b16 %v3901_v39, %v3899_v26 }
 0x2e2   :  { %v4830_v26 = vpack.c.b16 %v3856_v61, %v3854_v8 }
 0x2e3   :  { %v1425_v57 = vpop.f32.mrf.mxu0  ;;  %v2317_v40 = vunpack.c.l.b16 %v1493_v5  ;;  %v2315_v25 = vunpack.c.l.b16 %v1489_v49  ;;  %v1347_v5 = vadd.f32 %v3919_v52, %v3914_v62 }
 0x2e4   :  { %v1426_v32 = vadd.f32 %v1425_v57, %v1337_v46  ;;  %v1686_v54 = vpop.f32.mrf.mxu1  ;;  %v1342_v46 = vadd.f32 %v3897_v56, %v3892_v41  ;;  %v4827_v56 = vpack.c.b16 %v3927_v60, %v3925_v28 }
 0x2e5   :  { %v4055_v19 = vsel %vm1848_vm7, %v1686_v54, -1e+30  ;;  %v1491_v54 = vpack.c.bf16 %v1416_v51, %v1416_v51  ;;  %v2327_v10 = vpack.c.b16 %v2318_v34, %v2317_v40 }
 0x2e6   :  { %v1499_v27 = vpack.c.bf16 %v1426_v32, %v1426_v32  ;;  %1935 = vmax.xlane.f32.xlu1 %v4055_v19  ;;  %v1487_v32 = vpack.c.bf16 %v1411_v23, %v1411_v23  ;;  %v4076_v45 = vpop.f32.mrf.mxu2 }
 0x2e7   :  { %v2316_v0 = vunpack.c.l.b16 %v1491_v54 }
 0x2e8   :  { %v2320_v37 = vunpack.c.l.b16 %v1499_v27  ;;  %v2314_v59 = vunpack.c.l.b16 %v1487_v32 }
 0x2e9   :  { %v2326_v11 = vpack.c.b16 %v2316_v0, %v2315_v25 }
 0x2ea   :  { %v2328_v47 = vpack.c.b16 %v2320_v37, %v2319_v21 }
 0x2eb   :  { %v1428_v22 = vpop.f32.mrf.mxu0 }
 0x2ec   :  { %v1429_v17 = vadd.f32 %v1428_v22, %v3895_v15  ;;  %2337 = vmatpush.bf16.msrb.mxu3 %v2328_v47  ;;  %v2313_v15 = vunpack.c.l.b16 %v1485_v12  ;;  %v1361_v12 = vpop.f32.mrf.mxu3 }
 0x2ee   :  { %v1501_v44 = vpack.c.bf16 %v1429_v17, %v1429_v17  ;;  %v2325_v13 = vpack.c.b16 %v2314_v59, %v2313_v15  ;;  %v4090_v21 = vpop.f32.mrf.mxu2 }
 0x2ef   :  { %1801 = vmatmul.bf16.gmra.mxu2 %v3782_v2 }
 0x2f0   :  { %2338 = vmatpush.bf16.msrb.mxu3 %v2327_v10  ;;  %v4072_v24 = vunpack.c.l.b16 %v1501_v44 }
 0x2f3   :  { %v1430_v57 = vpop.f32.mrf.mxu0 }
 0x2f4   :  { %v1431_v33 = vadd.f32 %v1430_v57, %v1342_v46  ;;  %2339 = vmatpush.bf16.msrb.mxu3 %v2326_v11 }
 0x2f6   :  { %v1503_v51 = vpack.c.bf16 %v1431_v33, %v1431_v33  ;;  %v4105_v34 = vpop.f32.mrf.mxu2  ;;  %v1364_v33 = vpop.f32.mrf.mxu3 }
 0x2f8   :  { %v4074_v2 = vunpack.c.l.b16 %v1503_v51  ;;  %2340 = vmatpush.bf16.msrb.mxu3 %v2325_v13  ;;  %v1689_v13 = vpop.f32.mrf.mxu1  ;;  %v1362_v51 = vadd.f32 %v1361_v12, %v4065_v63 }
 0x2fa   :  { %v2466_v27 = vpack.c.b16 %v4074_v2, %v4072_v24 }
 0x2fb   :  { %v1433_v31 = vpop.f32.mrf.mxu0 }
 0x2fc   :  { %v1434_v41 = vadd.f32 %v1433_v31, %v3917_v14  ;;  %2341 = vmatpush.bf16.msrb.mxu3 %v4827_v56  ;;  %v4829_v14 = vpack.c.b16 %v3879_v29, %v3877_v35  ;;  %v1352_v35 = vadd.f32 %v3963_v9, %v3954_v58  ;;  %v1357_v9 = vadd.f32 %v3999_v20, %v3997_v7 }
 0x2fd   :  { %v4138_v20 = vadd.s32 64, %v3921_v16 }
 0x2fe   :  { %v1505_v23 = vpack.c.bf16 %v1434_v41, %v1434_v41  ;;  %v4110_v40 = vpop.f32.mrf.mxu2 }
 0x2ff   :  { %1806 = vmatmul.bf16.gmra.mxu2 %v3803_v4  ;;  %vm1849_vm8 = vcmp.le.s32.totalorder %v3923_v36, %v4138_v20  ;;  %v1833_v20 = vadd.s32 80, %v3921_v16 }
 0x300   :  { %2342 = vmatpush.bf16.msrb.mxu3 %v4828_v53  ;;  %v4095_v60 = vunpack.c.l.b16 %v1505_v23 }
 0x301   :  { %vm1851_vm11 = vcmp.le.s32.totalorder %v3923_v36, %v1833_v20 }
 0x303   :  { %v1435_v37 = vpop.f32.mrf.mxu0 }
 0x304   :  { %v1436_v54 = vadd.f32 %v1435_v37, %v1347_v5  ;;  %2343 = vmatpush.bf16.msrb.mxu3 %v4829_v14  ;;  %v4152_v37 = vsel %vm1849_vm8, %v1689_v13, -1e+30  ;;  %v1832_v13 = vadd.s32 72, %v3921_v16 }
 0x306   :  { %v1507_v28 = vpack.c.bf16 %v1436_v54, %v1436_v54  ;;  %v1366_v54 = vpop.f32.mrf.mxu3  ;;  %vm1850_vm9 = vcmp.le.s32.totalorder %v3923_v36, %v1832_v13 }
 0x308   :  { %v4097_v4 = vunpack.c.l.b16 %v1507_v28  ;;  %2344 = vmatpush.bf16.msrb.mxu3 %v4830_v26 }
 0x30a   :  { %v2467_v39 = vpack.c.b16 %v4097_v4, %v4095_v60 }
 0x30b   :  { %v1438_v62 = vpop.f32.mrf.mxu0 }
 0x30c   :  { %v1439_v52 = vadd.f32 %v1438_v62, %v3956_v38 }
 0x30e   :  { %v1509_v47 = vpack.c.bf16 %v1439_v52, %v1439_v52 }
 0x30f   :  { %1811 = vmatmul.bf16.gmra.mxu2 %v3826_v55  ;;  %v4120_v55 = vpop.f32.mrf.mxu2 }
 0x310   :  { %v4112_v8 = vunpack.c.l.b16 %v1509_v47 }
 0x313   :  { %v1440_v29 = vpop.f32.mrf.mxu0 }
 0x314   :  { %v1441_v22 = vadd.f32 %v1440_v29, %v1352_v35 }
 0x316   :  { %v1511_v49 = vpack.c.bf16 %v1441_v22, %v1441_v22  ;;  %v1365_v22 = vadd.f32 %v1364_v33, %v4076_v45 }
 0x317   :  { %v4131_v15 = vpop.f32.mrf.mxu2 }
 0x318   :  { %v4114_v61 = vunpack.c.l.b16 %v1511_v49 }
 0x31a   :  { %v2468_v38 = vpack.c.b16 %v4114_v61, %v4112_v8 }
 0x31b   :  { %v1443_v17 = vpop.f32.mrf.mxu0 }
 0x31c   :  { %v1444_v32 = vadd.f32 %v1443_v17, %v3986_v48 }
 0x31e   :  { %v1513_v25 = vpack.c.bf16 %v1444_v32, %v1444_v32  ;;  %v1369_v32 = vpop.f32.mrf.mxu3 }
 0x31f   :  { %1816 = vmatmul.bf16.gmra.mxu2 %v3845_v43 }
 0x320   :  { %v4125_v57 = vunpack.c.l.b16 %v1513_v25 }
 0x321   :  { %v1922_v58 = vpop.xlane.xlu0 %1921 }
 0x322   :  { %v1985_v0 = vsub.f32 %v3942_v30, %v1922_v58  ;;  %v1367_v58 = vadd.f32 %v1366_v54, %v4090_v21 }
 0x323   :  { %v1445_v10 = vpop.f32.mrf.mxu0 }
 0x324   :  { %v2017_v59 = vmul.f32 1.442695, %v1985_v0  ;;  %v1446_v11 = vadd.f32 %v1445_v10, %v1357_v9 }
 0x326   :  { %2952 = vpow2.f32 %v2017_v59  ;;  %v1515_v46 = vpack.c.bf16 %v1446_v11, %v1446_v11  ;;  %v1371_v33 = vpop.f32.mrf.mxu3 }
 0x328   :  { %v4127_v48 = vunpack.c.l.b16 %v1515_v46 }
 0x329   :  { %v1924_v62 = vpop.xlane.xlu0 %1923 }
 0x32a   :  { %v2469_v43 = vpack.c.b16 %v4127_v48, %v4125_v57 }
 0x32b   :  { %v1448_v44 = vpop.f32.mrf.mxu0 }
 0x32c   :  { %v4133_v7 = vpop.eup %2952  ;;  %v1449_v30 = vadd.f32 %v1448_v44, %v4016_v1 }
 0x32d   :  { %2081 = vadd.xlane.f32.xlu2 %v4133_v7 }
 0x32e   :  { %v1517_v1 = vpack.c.bf16 %v1449_v30, %v1449_v30 }
 0x330   :  { %v4156_v14 = vunpack.c.l.b16 %v1517_v1  ;;  %v1372_v1 = vadd.f32 %v1371_v33, %v4110_v40  ;;  %v1374_v40 = vpop.f32.mrf.mxu3 }
 0x331   :  { %v1926_v31 = vpop.xlane.xlu2 %1925 }
 0x332   :  { %v1782_v41 = vpop.f32.mrf.mxu2  ;;  %v1987_v23 = vsub.f32 %v3976_v6, %v1926_v31  ;;  %v1986_v6 = vsub.f32 %v3961_v3, %v1924_v62  ;;  %v1691_v31 = vpop.f32.mrf.mxu1 }
 0x333   :  { %v1450_v56 = vpop.f32.mrf.mxu0  ;;  %v4146_v53 = vsel %vm1841_vm0, %v1782_v41, -1e+30  ;;  %vm2531_vm0 = vcmask 523264  }
 0x334   :  { %v1451_v5 = vadd.f32 %v1450_v56, %v1362_v51  ;;  %1953 = vmax.xlane.f32.xlu1 %v4146_v53  ;;  %v2021_v26 = vmul.f32 1.442695, %v1987_v23  ;;  %v2019_v17 = vmul.f32 1.442695, %v1986_v6  ;;  %v1370_v51 = vadd.f32 %v1369_v32, %v4105_v34 }
 0x335   :  { %1937 = vmax.xlane.f32.xlu2 %v4152_v37 }
 0x336   :  { %v1519_v63 = vpack.c.bf16 %v1451_v5, %v1451_v5  ;;  %2954 = vpow2.f32 %v2021_v26 }
 0x337   :  { %2956 = vpow2.f32 %v2019_v17 }
 0x338   :  { %v4158_v28 = vunpack.c.l.b16 %v1519_v63  ;;  %v4201_v63 = vsel %vm1850_vm9, %v1691_v31, -1e+30 }
 0x339   :  { %v1928_v56 = vpop.xlane.xlu2 %1927 }
 0x33a   :  { %v2470_v52 = vpack.c.b16 %v4158_v28, %v4156_v14  ;;  %v1784_v35 = vpop.f32.mrf.mxu2  ;;  %v4836_v28 = vld [vmem:[#allocation57_spill] sm:$0xff] }
 0x33b   :  { %v1453_v29 = vpop.f32.mrf.mxu0  ;;  %v4165_v47 = vsel %vm1842_vm1, %v1784_v35, -1e+30  ;;  %v4833_v35 = vld [vmem:[#allocation64_spill] sm:$0xff] }
 0x33c   :  { %1955 = vmax.xlane.f32.xlu1 %v4165_v47  ;;  %v1454_v49 = vadd.f32 %v1453_v29, %v1365_v22  ;;  %v4171_v0 = vpop.eup %2954  ;;  %v1988_v29 = vsub.f32 %v4833_v35, %v1928_v56  ;;  %v4237_v35 = vadd.s32 88, %v3921_v16 }
 0x33d   :  { %v4186_v46 = vpop.eup %2956 }
 0x33e   :  { %v1521_v12 = vpack.c.bf16 %v1454_v49, %v1454_v49  ;;  %v2023_v17 = vmul.f32 1.442695, %v1988_v29  ;;  %vm1852_vm10 = vcmp.le.s32.totalorder %v3923_v36, %v4237_v35 }
 0x340   :  { %v4180_v45 = vunpack.c.l.b16 %v1521_v12  ;;  %2958 = vpow2.f32 %v2023_v17 }
 0x342   :  { %v1787_v9 = vpop.f32.mrf.mxu2 }
 0x343   :  { %v1455_v10 = vpop.f32.mrf.mxu0  ;;  %v4176_v42 = vsel %vm1843_vm2, %v1787_v9, -1e+30 }
 0x344   :  { %v1456_v25 = vadd.f32 %v1455_v10, %v1367_v58  ;;  %2085 = vadd.xlane.f32.xlu1 %v4171_v0  ;;  %1957 = vmax.xlane.f32.xlu0 %v4176_v42  ;;  %v4838_v10 = vld [vmem:[#allocation21_spill] sm:$0xff] }
 0x346   :  { %v1523_v3 = vpack.c.bf16 %v1456_v25, %v1456_v25  ;;  %v1375_v25 = vadd.f32 %v1374_v40, %v4120_v55  ;;  %v4219_v33 = vpop.eup %2958  ;;  %v4228_v55 = vpop.f32.mrf.mxu1 }
 0x348   :  { %v4182_v21 = vunpack.c.l.b16 %v1523_v3  ;;  %v1376_v3 = vpop.f32.mrf.mxu3 }
 0x349   :  { %v1932_v8 = vpop.xlane.xlu0 %1931 }
 0x34a   :  { %v2471_v59 = vpack.c.b16 %v4182_v21, %v4180_v45  ;;  %v1789_v11 = vpop.f32.mrf.mxu2 }
 0x34b   :  { %v1458_v18 = vpop.f32.mrf.mxu0  ;;  %v4191_v30 = vsel %vm1844_vm3, %v1789_v11, -1e+30 }
 0x34c   :  { %2083 = vadd.xlane.f32.xlu0 %v4186_v46  ;;  %1959 = vmax.xlane.f32.xlu1 %v4191_v30  ;;  %v1459_v41 = vadd.f32 %v1458_v18, %v1370_v51  ;;  %v1377_v18 = vadd.f32 %v1376_v3, %v4131_v15 }
 0x34e   :  { %v1525_v62 = vpack.c.bf16 %v1459_v41, %v1459_v41  ;;  %v1696_v29 = vpop.f32.mrf.mxu1 }
 0x350   :  { %v2462_v22 = vunpack.c.l.b16 %v1525_v62 }
 0x351   :  { %v1934_v60 = vpop.xlane.xlu0 %1933 }
 0x352   :  { %v1792_v5 = vpop.f32.mrf.mxu2 }
 0x353   :  { %v1460_v23 = vpop.f32.mrf.mxu0  ;;  %v4206_v26 = vsel %vm1845_vm4, %v1792_v5, -1e+30 }
 0x354   :  { %v1461_v34 = vadd.f32 %v1460_v23, %v1372_v1  ;;  %1939 = vmax.xlane.f32.xlu0 %v4201_v63  ;;  %1961 = vmax.xlane.f32.xlu1 %v4206_v26 }
 0x356   :  { %v1527_v6 = vpack.c.bf16 %v1461_v34, %v1461_v34 }
 0x358   :  { %v2463_v49 = vunpack.c.l.b16 %v1527_v6  ;;  %v4244_v6 = vsel %vm1852_vm10, %v1696_v29, -1e+30 }
 0x359   :  { %v4283_v57 = vpop.xlane.xlu1 %1935 }
 0x35a   :  { %v2472_v32 = vpack.c.b16 %v2463_v49, %v2462_v22  ;;  %v1794_v58 = vpop.f32.mrf.mxu2 }
 0x35b   :  { %v1463_v9 = vpop.f32.mrf.mxu0  ;;  %v4214_v12 = vsel %vm1846_vm5, %v1794_v58, -1e+30  ;;  %v4837_v58 = vld [vmem:[#allocation59_spill] sm:$0xff] }
 0x35c   :  { %1963 = vmax.xlane.f32.xlu2 %v4214_v12  ;;  %v1464_v11 = vadd.f32 %v1463_v9, %v1375_v25  ;;  %v1990_v9 = vsub.f32 %v4837_v58, %v1932_v8  ;;  %v1991_v25 = vsub.f32 %v4838_v10, %v1934_v60 }
 0x35e   :  { %v1529_v56 = vpack.c.bf16 %v1464_v11, %v1464_v11  ;;  %v2027_v3 = vmul.f32 1.442695, %v1990_v9  ;;  %v2029_v11 = vmul.f32 1.442695, %v1991_v25 }
 0x360   :  { %v2464_v23 = vunpack.c.l.b16 %v1529_v56 }
 0x362   :  { %v1797_v44 = vpop.f32.mrf.mxu2 }
 0x363   :  { %v1465_v51 = vpop.f32.mrf.mxu0  ;;  %v4224_v41 = vsel %vm1847_vm6, %v1797_v44, -1e+30 }
 0x364   :  { %v1466_v1 = vadd.f32 %v1465_v51, %v1377_v18  ;;  %2087 = vadd.xlane.f32.xlu2 %v4219_v33  ;;  %1965 = vmax.xlane.f32.xlu1 %v4224_v41 }
 0x366   :  { %v1531_v5 = vpack.c.bf16 %v1466_v1, %v1466_v1  ;;  %v1699_v1 = vpop.f32.mrf.mxu1 }
 0x368   :  { %v2465_v15 = vunpack.c.l.b16 %v1531_v5 }
 0x36a   :  { %v2473_v54 = vpack.c.b16 %v2465_v15, %v2464_v23  ;;  %v1799_v62 = vpop.f32.mrf.mxu2  ;;  %v4306_v23 = vsel %vm1851_vm11, %v4228_v55, -1e+30 }
 0x36b   :  { %v4233_v34 = vsel %vm1848_vm7, %v1799_v62, -1e+30 }
 0x36c   :  { %2482 = vmatpush.bf16.msrb.mxu1 %v2473_v54  ;;  %1967 = vmax.xlane.f32.xlu2 %v4233_v34 }
 0x370   :  { %2483 = vmatpush.bf16.msrb.mxu1 %v2472_v32 }
 0x372   :  { %v1802_v40 = vpop.f32.mrf.mxu2 }
 0x373   :  { %v4249_v50 = vsel %vm1849_vm8, %v1802_v40, -1e+30 }
 0x374   :  { %2484 = vmatpush.bf16.msrb.mxu1 %v2471_v59  ;;  %1943 = vmax.xlane.f32.xlu2 %v4244_v6 }
 0x375   :  { %1969 = vmax.xlane.f32.xlu0 %v4249_v50 }
 0x378   :  { %2485 = vmatpush.bf16.msrb.mxu1 %v2470_v52 }
 0x37a   :  { %v1804_v22 = vpop.f32.mrf.mxu2 }
 0x37b   :  { %v4261_v49 = vsel %vm1850_vm9, %v1804_v22, -1e+30 }
 0x37c   :  { %2486 = vmatpush.bf16.msrb.mxu1 %v2469_v43  ;;  %1971 = vmax.xlane.f32.xlu1 %v4261_v49 }
 0x380   :  { %2487 = vmatpush.bf16.msrb.mxu1 %v2468_v38  ;;  %v1930_v38 = vpop.xlane.xlu2 %1929 }
 0x381   :  { %v1989_v52 = vsub.f32 %v4836_v28, %v1930_v38  ;;  %v1836_v38 = vadd.s32 104, %v3921_v16 }
 0x382   :  { %v1807_v45 = vpop.f32.mrf.mxu2 }
 0x383   :  { %v4274_v14 = vsel %vm1851_vm11, %v1807_v45, -1e+30  ;;  %v2025_v21 = vmul.f32 1.442695, %v1989_v52  ;;  %vm1854_vm12 = vcmp.le.s32.totalorder %v3923_v36, %v1836_v38 }
 0x384   :  { %2488 = vmatpush.bf16.msrb.mxu1 %v2467_v39  ;;  %1973 = vmax.xlane.f32.xlu2 %v4274_v14 }
 0x388   :  { %2489 = vmatpush.bf16.msrb.mxu1 %v2466_v27 }
 0x38a   :  { %v1809_v51 = vpop.f32.mrf.mxu2 }
 0x3a0   :  { %v2082_v2 = vpop.xlane.xlu2 %2081 }
 0x3a7   :  { %v1954_v61 = vpop.xlane.xlu1 %1953 }
 0x3a8   :  { %v2001_v48 = vsub.f32 %v4146_v53, %v1954_v61  ;;  %v4317_v29 = vpop.xlane.xlu2 %1937 }
 0x3aa   :  { %v2049_v43 = vmul.f32 1.442695, %v2001_v48  ;;  %v1701_v48 = vpop.f32.mrf.mxu1 }
 0x3ac   :  { %2960 = vpow2.f32 %v2049_v43  ;;  %v1992_v43 = vsub.f32 %v4055_v19, %v4283_v57 }
 0x3ad   :  { %2962 = vpow2.f32 %v2025_v21 }
 0x3ae   :  { %v2031_v60 = vmul.f32 1.442695, %v1992_v43 }
 0x3af   :  { %v1956_v4 = vpop.xlane.xlu1 %1955 }
 0x3b0   :  { %v2002_v39 = vsub.f32 %v4165_v47, %v1956_v4 }
 0x3b2   :  { %v4288_v59 = vpop.eup %2960  ;;  %v2051_v24 = vmul.f32 1.442695, %v2002_v39  ;;  %v4339_v39 = vsel %vm1854_vm12, %v1701_v48, -1e+30  ;;  %v1704_v57 = vpop.f32.mrf.mxu1 }
 0x3b3   :  { %2113 = vadd.xlane.f32.xlu0 %v4288_v59  ;;  %v4292_v17 = vpop.eup %2962 }
 0x3b4   :  { %2964 = vpow2.f32 %v2051_v24 }
 0x3b5   :  { %2966 = vrcp.f32 %v2082_v2 }
 0x3b7   :  { %v2086_v27 = vpop.xlane.xlu1 %2085  ;;  %v1958_v13 = vpop.xlane.xlu0 %1957 }
 0x3b8   :  { %v2003_v53 = vsub.f32 %v4176_v42, %v1958_v13 }
 0x3ba   :  { %v4294_v32 = vpop.eup %2964  ;;  %v2053_v47 = vmul.f32 1.442695, %v2003_v53 }
 0x3bb   :  { %2089 = vadd.xlane.f32.xlu0 %v4292_v17  ;;  %2115 = vadd.xlane.f32.xlu1 %v4294_v32  ;;  %v2967_v42 = vpop.eup %2966 }
 0x3bc   :  { %2968 = vpow2.f32 %v2053_v47  ;;  %v2177_v15 = vmul.f32 %v2967_v42, %v4133_v7  ;;  %v4358_v47 = vadd.s32 120, %v3921_v16  ;;  %v1706_v42 = vpop.f32.mrf.mxu1 }
 0x3be   :  { %v2209_v62 = vpack.c.bf16 %v2177_v15, %v2177_v15  ;;  %vm1856_vm14 = vcmp.le.s32.totalorder %v3923_v36, %v4358_v47 }
 0x3bf   :  { %v2084_v18 = vpop.xlane.xlu0 %2083  ;;  %v1960_v44 = vpop.xlane.xlu1 %1959 }
 0x3c0   :  { %2970 = vrcp.f32 %v2084_v18  ;;  %v2004_v31 = vsub.f32 %v4191_v30, %v1960_v44  ;;  %v4314_v30 = vsel %vm1852_vm10, %v1809_v51, -1e+30  ;;  %v2257_v35 = vunpack.c.l.b16 %v2209_v62 }
 0x3c1   :  { %2972 = vpow2.f32 %v2027_v3 }
 0x3c2   :  { %v4301_v56 = vpop.eup %2968  ;;  %v2055_v5 = vmul.f32 1.442695, %v2004_v31  ;;  %2974 = vpow2.f32 %v2029_v11 }
 0x3c3   :  { %1941 = vmax.xlane.f32.xlu1 %v4306_v23  ;;  %2117 = vadd.xlane.f32.xlu2 %v4301_v56 }
 0x3c4   :  { %2976 = vpow2.f32 %v2055_v5  ;;  %1975 = vmax.xlane.f32.xlu0 %v4314_v30  ;;  %v1837_v5 = vadd.s32 112, %v3921_v16 }
 0x3c5   :  { %2978 = vrcp.f32 %v2086_v27 }
 0x3c6   :  { %v2971_v54 = vpop.eup %2970  ;;  %vm1855_vm15 = vcmp.le.s32.totalorder %v3923_v36, %v1837_v5 }
 0x3c7   :  { %v2178_v55 = vmul.f32 %v2971_v54, %v4186_v46  ;;  %v4320_v40 = vpop.eup %2972  ;;  %v1962_v7 = vpop.xlane.xlu1 %1961  ;;  %v1835_v46 = vadd.s32 96, %v3921_v16  ;;  %v1993_v54 = vsub.f32 %v4152_v37, %v4317_v29 }
 0x3c8   :  { %v4322_v22 = vpop.eup %2974  ;;  %v2005_v61 = vsub.f32 %v4206_v26, %v1962_v7  ;;  %v1940_v51 = vpop.xlane.xlu0 %1939 }
 0x3c9   :  { %v2210_v20 = vpack.c.bf16 %v2178_v55, %v2178_v55  ;;  %vm1853_vm13 = vcmp.le.s32.totalorder %v3923_v36, %v1835_v46  ;;  %v1994_v55 = vsub.f32 %v4201_v63, %v1940_v51 }
 0x3ca   :  { %v4324_v45 = vpop.eup %2976  ;;  %v2057_v52 = vmul.f32 1.442695, %v2005_v61  ;;  %v4344_v19 = vsel %vm1853_vm13, %v1699_v1, -1e+30 }
 0x3cb   :  { %v2258_v8 = vunpack.c.l.b16 %v2210_v20  ;;  %2091 = vadd.xlane.f32.xlu1 %v4320_v40  ;;  %2093 = vadd.xlane.f32.xlu2 %v4322_v22  ;;  %v2979_v2 = vpop.eup %2978  ;;  %v2033_v20 = vmul.f32 1.442695, %v1993_v54  ;;  %v2035_v37 = vmul.f32 1.442695, %v1994_v55 }
 0x3cc   :  { %2119 = vadd.xlane.f32.xlu0 %v4324_v45  ;;  %2980 = vpow2.f32 %v2057_v52  ;;  %v2179_v9 = vmul.f32 %v2979_v2, %v4171_v0 }
 0x3cd   :  { %v2273_v28 = vpack.c.b16 %v2258_v8, %v2257_v35  ;;  %v4390_v8 = vsel %vm1855_vm15, %v1704_v57, -1e+30 }
 0x3ce   :  { %v2211_v44 = vpack.c.bf16 %v2179_v9, %v2179_v9 }
 0x3cf   :  { %2345 = vmatmul.bf16.vlgmr.msrb.gmra.mxu3 %v2273_v28  ;;  %v1964_v21 = vpop.xlane.xlu2 %1963 }
 0x3d0   :  { %v2006_v26 = vsub.f32 %v4214_v12, %v1964_v21  ;;  %v1812_v12 = vpop.f32.mrf.mxu2  ;;  %v2259_v16 = vunpack.c.l.b16 %v2211_v44 }
 0x3d2   :  { %v2059_v4 = vmul.f32 1.442695, %v2006_v26  ;;  %v4347_v27 = vpop.eup %2980 }
 0x3d3   :  { %1947 = vmax.xlane.f32.xlu1 %v4339_v39 }
 0x3d4   :  { %2982 = vpow2.f32 %v2059_v4  ;;  %1945 = vmax.xlane.f32.xlu0 %v4344_v19 }
 0x3d5   :  { %2984 = vpow2.f32 %v2031_v60 }
 0x3d7   :  { %v2088_v24 = vpop.xlane.xlu2 %2087  ;;  %v1966_v53 = vpop.xlane.xlu1 %1965 }
 0x3d8   :  { %2986 = vrcp.f32 %v2088_v24  ;;  %v2007_v10 = vsub.f32 %v4224_v41, %v1966_v53  ;;  %v1814_v3 = vpop.f32.mrf.mxu2  ;;  %v4368_v41 = vsel %vm1853_vm13, %v1812_v12, -1e+30 }
 0x3da   :  { %v4349_v13 = vpop.eup %2982  ;;  %v2061_v0 = vmul.f32 1.442695, %v2007_v10 }
 0x3db   :  { %v4351_v58 = vpop.eup %2984  ;;  %2121 = vadd.xlane.f32.xlu1 %v4347_v27  ;;  %2123 = vadd.xlane.f32.xlu2 %v4349_v13 }
 0x3dc   :  { %2095 = vadd.xlane.f32.xlu0 %v4351_v58 }
 0x3de   :  { %v2987_v25 = vpop.eup %2986 }
 0x3df   :  { %v1968_v11 = vpop.xlane.xlu2 %1967  ;;  %v2180_v18 = vmul.f32 %v2987_v25, %v4219_v33  ;;  %v4372_v33 = vsel %vm1854_vm12, %v1814_v3, -1e+30 }
 0x3e0   :  { %v2008_v31 = vsub.f32 %v4233_v34, %v1968_v11  ;;  %v4379_v34 = vsel %vm1856_vm14, %v1706_v42, -1e+30  ;;  %v1817_v38 = vpop.f32.mrf.mxu2 }
 0x3e1   :  { %v2212_v1 = vpack.c.bf16 %v2180_v18, %v2180_v18  ;;  %v4408_v60 = vsel %vm1855_vm15, %v1817_v38, -1e+30 }
 0x3e2   :  { %v2063_v15 = vmul.f32 1.442695, %v2008_v31 }
 0x3e3   :  { %1977 = vmax.xlane.f32.xlu1 %v4368_v41  ;;  %1979 = vmax.xlane.f32.xlu2 %v4372_v33  ;;  %v2260_v62 = vunpack.c.l.b16 %v2212_v1 }
 0x3e4   :  { %2988 = vpow2.f32 %v2063_v15  ;;  %1951 = vmax.xlane.f32.xlu0 %v4379_v34 }
 0x3e5   :  { %2990 = vpow2.f32 %v2061_v0  ;;  %v2274_v7 = vpack.c.b16 %v2260_v62, %v2259_v16 }
 0x3e6   :  { %2992 = vpow2.f32 %v2033_v20 }
 0x3e7   :  { %2350 = vmatmul.bf16.gmra.mxu3 %v2274_v7  ;;  %2994 = vpow2.f32 %v2035_v37  ;;  %v1944_v48 = vpop.xlane.xlu2 %1943 }
 0x3e8   :  { %v1970_v29 = vpop.xlane.xlu0 %1969 }
 0x3e9   :  { %v2009_v63 = vsub.f32 %v4249_v50, %v1970_v29  ;;  %v1996_v50 = vsub.f32 %v4244_v6, %v1944_v48 }
 0x3ea   :  { %v4386_v35 = vpop.eup %2988 }
 0x3eb   :  { %v4392_v61 = vpop.eup %2990  ;;  %2127 = vadd.xlane.f32.xlu1 %v4386_v35  ;;  %1949 = vmax.xlane.f32.xlu2 %v4390_v8  ;;  %v2065_v46 = vmul.f32 1.442695, %v2009_v63  ;;  %v2039_v4 = vmul.f32 1.442695, %v1996_v50 }
 0x3ec   :  { %2125 = vadd.xlane.f32.xlu0 %v4392_v61  ;;  %v4399_v52 = vpop.eup %2992 }
 0x3ed   :  { %v4401_v21 = vpop.eup %2994  ;;  %2996 = vpow2.f32 %v2065_v46 }
 0x3ef   :  { %v1972_v43 = vpop.xlane.xlu1 %1971 }
 0x3f0   :  { %v2010_v28 = vsub.f32 %v4261_v49, %v1972_v43  ;;  %v1819_v49 = vpop.f32.mrf.mxu2 }
 0x3f1   :  { %v4419_v53 = vsel %vm1856_vm14, %v1819_v49, -1e+30 }
 0x3f2   :  { %v2067_v26 = vmul.f32 1.442695, %v2010_v28 }
 0x3f3   :  { %2097 = vadd.xlane.f32.xlu1 %v4399_v52  ;;  %2099 = vadd.xlane.f32.xlu2 %v4401_v21  ;;  %v4412_v24 = vpop.eup %2996 }
 0x3f4   :  { %2998 = vpow2.f32 %v2067_v26  ;;  %1981 = vmax.xlane.f32.xlu0 %v4408_v60 }
 0x3f5   :  { %3000 = vpow2.f32 %v2039_v4 }
 0x3f7   :  { %v1974_v12 = vpop.xlane.xlu2 %1973 }
 0x3f8   :  { %v2011_v57 = vsub.f32 %v4274_v14, %v1974_v12 }
 0x3fa   :  { %v4414_v6 = vpop.eup %2998  ;;  %v2069_v2 = vmul.f32 1.442695, %v2011_v57 }
 0x3fb   :  { %2129 = vadd.xlane.f32.xlu2 %v4412_v24  ;;  %1983 = vmax.xlane.f32.xlu1 %v4419_v53  ;;  %v4424_v9 = vpop.eup %3000 }
 0x3fc   :  { %3002 = vpow2.f32 %v2069_v2  ;;  %2131 = vadd.xlane.f32.xlu0 %v4414_v6 }
 0x402   :  { %v4426_v14 = vpop.eup %3002 }
 0x403   :  { %2103 = vadd.xlane.f32.xlu2 %v4424_v9 }
 0x404   :  { %2133 = vadd.xlane.f32.xlu0 %v4426_v14 }
 0x426   :  { %v2114_v10 = vpop.xlane.xlu0 %2113 }
 0x427   :  { %3004 = vrcp.f32 %v2114_v10 }
 0x42d   :  { %v3005_v25 = vpop.eup %3004 }
 0x42e   :  { %v2090_v36 = vpop.xlane.xlu0 %2089  ;;  %v2116_v47 = vpop.xlane.xlu1 %2115  ;;  %v2193_v3 = vmul.f32 %v3005_v25, %v4288_v59 }
 0x42f   :  { %3006 = vrcp.f32 %v2116_v47 }
 0x430   :  { %v2225_v44 = vpack.c.bf16 %v2193_v3, %v2193_v3  ;;  %3008 = vrcp.f32 %v2090_v36 }
 0x432   :  { %v2402_v15 = vunpack.c.l.b16 %v2225_v44 }
 0x435   :  { %v3007_v11 = vpop.eup %3006 }
 0x436   :  { %v1942_v18 = vpop.xlane.xlu1 %1941  ;;  %v2194_v42 = vmul.f32 %v3007_v11, %v4294_v32  ;;  %v2118_v31 = vpop.xlane.xlu2 %2117 }
 0x437   :  { %v1995_v51 = vsub.f32 %v4306_v23, %v1942_v18  ;;  %v1976_v0 = vpop.xlane.xlu0 %1975  ;;  %3010 = vrcp.f32 %v2118_v31  ;;  %v3009_v59 = vpop.eup %3008 }
 0x438   :  { %v2226_v1 = vpack.c.bf16 %v2194_v42, %v2194_v42  ;;  %v2012_v16 = vsub.f32 %v4314_v30, %v1976_v0  ;;  %v2181_v37 = vmul.f32 %v3009_v59, %v4292_v17 }
 0x439   :  { %v2037_v5 = vmul.f32 1.442695, %v1995_v51 }
 0x43a   :  { %v2403_v54 = vunpack.c.l.b16 %v2226_v1  ;;  %v2071_v7 = vmul.f32 1.442695, %v2012_v16  ;;  %v2213_v30 = vpack.c.bf16 %v2181_v37, %v2181_v37 }
 0x43b   :  { %3012 = vpow2.f32 %v2037_v5 }
 0x43c   :  { %v2418_v62 = vpack.c.b16 %v2403_v54, %v2402_v15 }
 0x43d   :  { %v3011_v20 = vpop.eup %3010 }
 0x43e   :  { %v2092_v55 = vpop.xlane.xlu1 %2091  ;;  %2490 = vmatmul.bf16.vlgmr.msrb.gmra.mxu1 %v2418_v62  ;;  %v2195_v29 = vmul.f32 %v3011_v20, %v4301_v56  ;;  %v2094_v38 = vpop.xlane.xlu2 %2093  ;;  %v2261_v56 = vunpack.c.l.b16 %v2213_v30 }
 0x43f   :  { %3014 = vrcp.f32 %v2092_v55  ;;  %v2120_v32 = vpop.xlane.xlu0 %2119 }
 0x440   :  { %3016 = vrcp.f32 %v2120_v32  ;;  %v2227_v4 = vpack.c.bf16 %v2195_v29, %v2195_v29 }
 0x441   :  { %v4434_v23 = vpop.eup %3012  ;;  %3018 = vpow2.f32 %v2071_v7 }
 0x442   :  { %2101 = vadd.xlane.f32.xlu1 %v4434_v23  ;;  %3020 = vrcp.f32 %v2094_v38  ;;  %v2404_v36 = vunpack.c.l.b16 %v2227_v4 }
 0x445   :  { %v3015_v63 = vpop.eup %3014 }
 0x446   :  { %v1948_v48 = vpop.xlane.xlu1 %1947  ;;  %v2182_v46 = vmul.f32 %v3015_v63, %v4320_v40  ;;  %v3017_v43 = vpop.eup %3016 }
 0x447   :  { %v1998_v28 = vsub.f32 %v4339_v39, %v1948_v48  ;;  %v1946_v26 = vpop.xlane.xlu0 %1945  ;;  %v2196_v17 = vmul.f32 %v3017_v43, %v4324_v45  ;;  %v4443_v12 = vpop.eup %3018 }
 0x448   :  { %v1997_v50 = vsub.f32 %v4344_v19, %v1946_v26  ;;  %v2214_v49 = vpack.c.bf16 %v2182_v46, %v2182_v46  ;;  %v3021_v11 = vpop.eup %3020 }
 0x449   :  { %v2043_v57 = vmul.f32 1.442695, %v1998_v28  ;;  %v2228_v40 = vpack.c.bf16 %v2196_v17, %v2196_v17  ;;  %v2183_v51 = vmul.f32 %v3021_v11, %v4322_v22 }
 0x44a   :  { %v2041_v2 = vmul.f32 1.442695, %v1997_v50  ;;  %2135 = vadd.xlane.f32.xlu1 %v4443_v12  ;;  %v2262_v10 = vunpack.c.l.b16 %v2214_v49 }
 0x44b   :  { %3022 = vpow2.f32 %v2043_v57  ;;  %v2405_v47 = vunpack.c.l.b16 %v2228_v40  ;;  %v2215_v32 = vpack.c.bf16 %v2183_v51, %v2183_v51 }
 0x44c   :  { %3024 = vpow2.f32 %v2041_v2  ;;  %v2275_v39 = vpack.c.b16 %v2262_v10, %v2261_v56 }
 0x44d   :  { %v2419_v45 = vpack.c.b16 %v2405_v47, %v2404_v36 }
 0x44e   :  { %2355 = vmatmul.bf16.gmra.mxu3 %v2275_v39  ;;  %v2122_v19 = vpop.xlane.xlu1 %2121  ;;  %v2124_v25 = vpop.xlane.xlu2 %2123 }
 0x44f   :  { %3026 = vrcp.f32 %v2122_v19  ;;  %v2096_v3 = vpop.xlane.xlu0 %2095  ;;  %2495 = vmatmul.bf16.gmra.mxu1 %v2419_v45 }
 0x450   :  { %3028 = vrcp.f32 %v2124_v25 }
 0x451   :  { %v4446_v18 = vpop.eup %3022  ;;  %3030 = vrcp.f32 %v2096_v3 }
 0x452   :  { %v4448_v44 = vpop.eup %3024  ;;  %v2346_v42 = vpop.f32.mrf.mxu3  ;;  %2107 = vadd.xlane.f32.xlu0 %v4446_v18 }
 0x453   :  { %2532 = vst.msk [vmem:[%s4628_s2] sm:$0xff] %vm2531_vm0, %v2346_v42  ;;  %2105 = vadd.xlane.f32.xlu2 %v4448_v44 }
 0x455   :  { %v3027_v31 = vpop.eup %3026 }
 0x456   :  { %v3029_v0 = vpop.eup %3028  ;;  %v1978_v1 = vpop.xlane.xlu1 %1977  ;;  %v2197_v15 = vmul.f32 %v3027_v31, %v4347_v27 }
 0x457   :  { %v1980_v5 = vpop.xlane.xlu2 %1979  ;;  %v3031_v54 = vpop.eup %3030  ;;  %v2013_v62 = vsub.f32 %v4368_v41, %v1978_v1  ;;  %v2198_v55 = vmul.f32 %v3029_v0, %v4349_v13  ;;  %v2263_v13 = vunpack.c.l.b16 %v2215_v32 }
 0x458   :  { %v1952_v16 = vpop.xlane.xlu0 %1951  ;;  %v2014_v59 = vsub.f32 %v4372_v33, %v1980_v5  ;;  %v2184_v7 = vmul.f32 %v3031_v54, %v4351_v58  ;;  %v2229_v20 = vpack.c.bf16 %v2197_v15, %v2197_v15 }
 0x459   :  { %v2073_v37 = vmul.f32 1.442695, %v2013_v62  ;;  %v2230_v29 = vpack.c.bf16 %v2198_v55, %v2198_v55  ;;  %v2000_v63 = vsub.f32 %v4379_v34, %v1952_v16 }
 0x45a   :  { %v2075_v22 = vmul.f32 1.442695, %v2014_v59  ;;  %v2348_v30 = vpop.f32.mrf.mxu3  ;;  %v2216_v38 = vpack.c.bf16 %v2184_v7, %v2184_v7  ;;  %v2406_v27 = vunpack.c.l.b16 %v2229_v20 }
 0x45b   :  { %3032 = vpow2.f32 %v2073_v37  ;;  %2533 = vst.msk [vmem:[%s4628_s2 + $0x8] sm:$0xff] %vm2531_vm0, %v2348_v30  ;;  %v2407_v41 = vunpack.c.l.b16 %v2230_v29  ;;  %v2047_v48 = vmul.f32 1.442695, %v2000_v63 }
 0x45c   :  { %v2264_v33 = vunpack.c.l.b16 %v2216_v38  ;;  %3034 = vpow2.f32 %v2075_v22 }
 0x45d   :  { %v2420_v58 = vpack.c.b16 %v2407_v41, %v2406_v27 }
 0x45e   :  { %v2276_v46 = vpack.c.b16 %v2264_v33, %v2263_v13  ;;  %v2128_v43 = vpop.xlane.xlu1 %2127 }
 0x45f   :  { %v1950_v28 = vpop.xlane.xlu2 %1949  ;;  %3036 = vrcp.f32 %v2128_v43  ;;  %2500 = vmatmul.bf16.gmra.mxu1 %v2420_v58 }
 0x460   :  { %v2126_v26 = vpop.xlane.xlu0 %2125  ;;  %v1999_v34 = vsub.f32 %v4390_v8, %v1950_v28  ;;  %2360 = vmatmul.bf16.gmra.mxu3 %v2276_v46 }
 0x461   :  { %3038 = vrcp.f32 %v2126_v26  ;;  %v4468_v50 = vpop.eup %3032 }
 0x462   :  { %v2045_v49 = vmul.f32 1.442695, %v1999_v34  ;;  %3040 = vpow2.f32 %v2047_v48  ;;  %2137 = vadd.xlane.f32.xlu1 %v4468_v50  ;;  %v4471_v17 = vpop.eup %3034 }
 0x463   :  { %2139 = vadd.xlane.f32.xlu2 %v4471_v17 }
 0x464   :  { %3042 = vpow2.f32 %v2045_v49 }
 0x465   :  { %v3037_v4 = vpop.eup %3036 }
 0x466   :  { %v2098_v56 = vpop.xlane.xlu1 %2097  ;;  %v2200_v8 = vmul.f32 %v3037_v4, %v4386_v35 }
 0x467   :  { %v3039_v57 = vpop.eup %3038  ;;  %v2100_v2 = vpop.xlane.xlu2 %2099  ;;  %3044 = vrcp.f32 %v2098_v56 }
 0x468   :  { %v1982_v10 = vpop.xlane.xlu0 %1981  ;;  %v2199_v40 = vmul.f32 %v3039_v57, %v4392_v61  ;;  %v4476_v39 = vpop.eup %3040  ;;  %3046 = vrcp.f32 %v2100_v2  ;;  %v2232_v47 = vpack.c.bf16 %v2200_v8, %v2200_v8 }
 0x469   :  { %v2015_v36 = vsub.f32 %v4408_v60, %v1982_v10 }
 0x46a   :  { %v4479_v19 = vpop.eup %3042  ;;  %v2231_v25 = vpack.c.bf16 %v2199_v40, %v2199_v40  ;;  %v2351_v3 = vpop.f32.mrf.mxu3  ;;  %2111 = vadd.xlane.f32.xlu1 %v4476_v39  ;;  %v2409_v35 = vunpack.c.l.b16 %v2232_v47 }
 0x46b   :  { %v2077_v45 = vmul.f32 1.442695, %v2015_v36  ;;  %2109 = vadd.xlane.f32.xlu0 %v4479_v19  ;;  %2534 = vst.msk [vmem:[%s4628_s2 + $0x10] sm:$0xff] %vm2531_vm0, %v2351_v3 }
 0x46c   :  { %v2408_v61 = vunpack.c.l.b16 %v2231_v25 }
 0x46d   :  { %3048 = vpow2.f32 %v2077_v45  ;;  %v3045_v11 = vpop.eup %3044 }
 0x46e   :  { %v2421_v60 = vpack.c.b16 %v2409_v35, %v2408_v61  ;;  %v3047_v42 = vpop.eup %3046  ;;  %v1984_v31 = vpop.xlane.xlu1 %1983  ;;  %v2185_v0 = vmul.f32 %v3045_v11, %v4399_v52 }
 0x46f   :  { %v2130_v51 = vpop.xlane.xlu2 %2129  ;;  %v2016_v5 = vsub.f32 %v4419_v53, %v1984_v31  ;;  %v2186_v15 = vmul.f32 %v3047_v42, %v4401_v21 }
 0x470   :  { %3050 = vrcp.f32 %v2130_v51  ;;  %v2132_v1 = vpop.xlane.xlu0 %2131  ;;  %2505 = vmatmul.bf16.gmra.mxu1 %v2421_v60  ;;  %v2217_v54 = vpack.c.bf16 %v2185_v0, %v2185_v0 }
 0x471   :  { %3052 = vrcp.f32 %v2132_v1  ;;  %v2079_v16 = vmul.f32 1.442695, %v2016_v5  ;;  %v2218_v62 = vpack.c.bf16 %v2186_v15, %v2186_v15 }
 0x472   :  { %v2353_v55 = vpop.f32.mrf.mxu3  ;;  %v2265_v7 = vunpack.c.l.b16 %v2217_v54 }
 0x473   :  { %v4490_v59 = vpop.eup %3048  ;;  %3054 = vpow2.f32 %v2079_v16  ;;  %2535 = vst.msk [vmem:[%s4628_s2 + $0x18] sm:$0xff] %vm2531_vm0, %v2353_v55  ;;  %v2266_v52 = vunpack.c.l.b16 %v2218_v62 }
 0x474   :  { %2141 = vadd.xlane.f32.xlu2 %v4490_v59 }
 0x475   :  { %v2277_v21 = vpack.c.b16 %v2266_v52, %v2265_v7 }
 0x476   :  { %v3051_v53 = vpop.eup %3050 }
 0x477   :  { %v3053_v32 = vpop.eup %3052  ;;  %v2201_v20 = vmul.f32 %v3051_v53, %v4412_v24  ;;  %2365 = vmatmul.bf16.gmra.mxu3 %v2277_v21  ;;  %v2104_v41 = vpop.xlane.xlu2 %2103 }
 0x478   :  { %v2202_v37 = vmul.f32 %v3053_v32, %v4414_v6  ;;  %3056 = vrcp.f32 %v2104_v41  ;;  %v2134_v13 = vpop.xlane.xlu0 %2133 }
 0x479   :  { %v2233_v22 = vpack.c.bf16 %v2201_v20, %v2201_v20  ;;  %v4499_v29 = vpop.eup %3054 }
 0x47a   :  { %v2234_v63 = vpack.c.bf16 %v2202_v37, %v2202_v37  ;;  %2143 = vadd.xlane.f32.xlu0 %v4499_v29 }
 0x47b   :  { %v2410_v30 = vunpack.c.l.b16 %v2233_v22 }
 0x47c   :  { %v2411_v38 = vunpack.c.l.b16 %v2234_v63 }
 0x47e   :  { %v2422_v27 = vpack.c.b16 %v2411_v38, %v2410_v30  ;;  %v3057_v58 = vpop.eup %3056 }
 0x47f   :  { %v2188_v24 = vmul.f32 %v3057_v58, %v4424_v9 }
 0x480   :  { %2510 = vmatmul.bf16.gmra.mxu1 %v2422_v27 }
 0x481   :  { %v2220_v28 = vpack.c.bf16 %v2188_v24, %v2188_v24 }
 0x483   :  { %v2268_v4 = vunpack.c.l.b16 %v2220_v28 }
 0x4b5   :  { %v2102_v33 = vpop.xlane.xlu1 %2101 }
 0x4b6   :  { %3058 = vrcp.f32 %v2102_v33 }
 0x4b7   :  { %3060 = vrcp.f32 %v2134_v13 }
 0x4bb   :  { %v2491_v48 = vpop.f32.mrf.mxu1 }
 0x4bc   :  { %v3059_v6 = vpop.eup %3058  ;;  %2548 = vst.msk [vmem:[%s4628_s2 + $0x80] sm:$0xff] %vm2531_vm0, %v2491_v48 }
 0x4bd   :  { %v2136_v46 = vpop.xlane.xlu1 %2135  ;;  %v2187_v43 = vmul.f32 %v3059_v6, %v4434_v23  ;;  %v3061_v26 = vpop.eup %3060 }
 0x4be   :  { %3062 = vrcp.f32 %v2136_v46  ;;  %v2203_v57 = vmul.f32 %v3061_v26, %v4426_v14 }
 0x4bf   :  { %v2219_v34 = vpack.c.bf16 %v2187_v43, %v2187_v43 }
 0x4c0   :  { %v2235_v10 = vpack.c.bf16 %v2203_v57, %v2203_v57 }
 0x4c1   :  { %v2267_v49 = vunpack.c.l.b16 %v2219_v34 }
 0x4c2   :  { %v2412_v47 = vunpack.c.l.b16 %v2235_v10 }
 0x4c3   :  { %v2278_v56 = vpack.c.b16 %v2268_v4, %v2267_v49  ;;  %v2493_v2 = vpop.f32.mrf.mxu1 }
 0x4c4   :  { %v3063_v9 = vpop.eup %3062  ;;  %2549 = vst.msk [vmem:[%s4628_s2 + $0x88] sm:$0xff] %vm2531_vm0, %v2493_v2 }
 0x4c5   :  { %v2108_v8 = vpop.xlane.xlu0 %2107  ;;  %2370 = vmatmul.bf16.gmra.mxu3 %v2278_v56  ;;  %v2204_v23 = vmul.f32 %v3063_v9, %v4443_v12 }
 0x4c6   :  { %v2106_v40 = vpop.xlane.xlu2 %2105  ;;  %3064 = vrcp.f32 %v2108_v8 }
 0x4c7   :  { %3066 = vrcp.f32 %v2106_v40  ;;  %v2236_v36 = vpack.c.bf16 %v2204_v23, %v2204_v23 }
 0x4c9   :  { %v2413_v25 = vunpack.c.l.b16 %v2236_v36 }
 0x4cb   :  { %v2423_v14 = vpack.c.b16 %v2413_v25, %v2412_v47 }
 0x4cc   :  { %v3065_v45 = vpop.eup %3064  ;;  %v2496_v35 = vpop.f32.mrf.mxu1 }
 0x4cd   :  { %v3067_v3 = vpop.eup %3066  ;;  %2515 = vmatmul.bf16.gmra.mxu1 %v2423_v14  ;;  %v2190_v61 = vmul.f32 %v3065_v45, %v4446_v18  ;;  %2550 = vst.msk [vmem:[%s4628_s2 + $0x90] sm:$0xff] %vm2531_vm0, %v2496_v35 }
 0x4ce   :  { %v2189_v12 = vmul.f32 %v3067_v3, %v4448_v44 }
 0x4cf   :  { %v2222_v11 = vpack.c.bf16 %v2190_v61, %v2190_v61 }
 0x4d0   :  { %v2221_v60 = vpack.c.bf16 %v2189_v12, %v2189_v12 }
 0x4d1   :  { %v2356_v42 = vpop.f32.mrf.mxu3  ;;  %v2270_v51 = vunpack.c.l.b16 %v2222_v11 }
 0x4d2   :  { %2536 = vst.msk [vmem:[%s4628_s2 + $0x20] sm:$0xff] %vm2531_vm0, %v2356_v42  ;;  %v2269_v31 = vunpack.c.l.b16 %v2221_v60 }
 0x4d4   :  { %v2279_v0 = vpack.c.b16 %v2270_v51, %v2269_v31  ;;  %v2498_v1 = vpop.f32.mrf.mxu1 }
 0x4d5   :  { %v2138_v18 = vpop.xlane.xlu1 %2137  ;;  %2551 = vst.msk [vmem:[%s4628_s2 + $0x98] sm:$0xff] %vm2531_vm0, %v2498_v1 }
 0x4d6   :  { %2375 = vmatmul.bf16.gmra.mxu3 %v2279_v0  ;;  %3068 = vrcp.f32 %v2138_v18  ;;  %v2140_v44 = vpop.xlane.xlu2 %2139 }
 0x4d7   :  { %3070 = vrcp.f32 %v2140_v44 }
 0x4d9   :  { %v2358_v5 = vpop.f32.mrf.mxu3 }
 0x4da   :  { %2537 = vst.msk [vmem:[%s4628_s2 + $0x28] sm:$0xff] %vm2531_vm0, %v2358_v5 }
 0x4dc   :  { %v3069_v15 = vpop.eup %3068  ;;  %v2501_v54 = vpop.f32.mrf.mxu1 }
 0x4dd   :  { %v2205_v62 = vmul.f32 %v3069_v15, %v4468_v50  ;;  %v3071_v55 = vpop.eup %3070  ;;  %2552 = vst.msk [vmem:[%s4628_s2 + $0xa0] sm:$0xff] %vm2531_vm0, %v2501_v54  ;;  %v2112_v7 = vpop.xlane.xlu1 %2111 }
 0x4de   :  { %v2110_v16 = vpop.xlane.xlu0 %2109  ;;  %v2206_v52 = vmul.f32 %v3071_v55, %v4471_v17 }
 0x4df   :  { %3072 = vrcp.f32 %v2110_v16  ;;  %v2237_v53 = vpack.c.bf16 %v2205_v62, %v2205_v62 }
 0x4e0   :  { %3074 = vrcp.f32 %v2112_v7  ;;  %v2238_v21 = vpack.c.bf16 %v2206_v52, %v2206_v52 }
 0x4e1   :  { %v2414_v32 = vunpack.c.l.b16 %v2237_v53 }
 0x4e2   :  { %v2415_v37 = vunpack.c.l.b16 %v2238_v21 }
 0x4e3   :  { %v2361_v20 = vpop.f32.mrf.mxu3 }
 0x4e4   :  { %2538 = vst.msk [vmem:[%s4628_s2 + $0x30] sm:$0xff] %vm2531_vm0, %v2361_v20  ;;  %v2503_v63 = vpop.f32.mrf.mxu1  ;;  %v2424_v30 = vpack.c.b16 %v2415_v37, %v2414_v32 }
 0x4e5   :  { %v3073_v22 = vpop.eup %3072  ;;  %2553 = vst.msk [vmem:[%s4628_s2 + $0xa8] sm:$0xff] %vm2531_vm0, %v2503_v63 }
 0x4e6   :  { %v3075_v50 = vpop.eup %3074  ;;  %v2191_v38 = vmul.f32 %v3073_v22, %v4479_v19  ;;  %2520 = vmatmul.bf16.gmra.mxu1 %v2424_v30 }
 0x4e7   :  { %v2192_v27 = vmul.f32 %v3075_v50, %v4476_v39  ;;  %v2142_v17 = vpop.xlane.xlu2 %2141 }
 0x4e8   :  { %v2223_v41 = vpack.c.bf16 %v2191_v38, %v2191_v38  ;;  %3076 = vrcp.f32 %v2142_v17 }
 0x4e9   :  { %v2224_v13 = vpack.c.bf16 %v2192_v27, %v2192_v27 }
 0x4ea   :  { %v2271_v33 = vunpack.c.l.b16 %v2223_v41 }
 0x4eb   :  { %v2272_v58 = vunpack.c.l.b16 %v2224_v13  ;;  %v2363_v24 = vpop.f32.mrf.mxu3 }
 0x4ec   :  { %2539 = vst.msk [vmem:[%s4628_s2 + $0x38] sm:$0xff] %vm2531_vm0, %v2363_v24 }
 0x4ed   :  { %v2280_v19 = vpack.c.b16 %v2272_v58, %v2271_v33  ;;  %v2506_v39 = vpop.f32.mrf.mxu1  ;;  %v2144_v6 = vpop.xlane.xlu0 %2143 }
 0x4ee   :  { %v3077_v48 = vpop.eup %3076  ;;  %2554 = vst.msk [vmem:[%s4628_s2 + $0xb0] sm:$0xff] %vm2531_vm0, %v2506_v39  ;;  %3078 = vrcp.f32 %v2144_v6 }
 0x4ef   :  { %2380 = vmatmul.bf16.gmra.mxu3 %v2280_v19  ;;  %v2207_v46 = vmul.f32 %v3077_v48, %v4490_v59 }
 0x4f1   :  { %v2239_v34 = vpack.c.bf16 %v2207_v46, %v2207_v46 }
 0x4f3   :  { %v2416_v4 = vunpack.c.l.b16 %v2239_v34 }
 0x4f4   :  { %v3079_v43 = vpop.eup %3078 }
 0x4f5   :  { %v2208_v28 = vmul.f32 %v3079_v43, %v4499_v29  ;;  %v2508_v26 = vpop.f32.mrf.mxu1 }
 0x4f6   :  { %2555 = vst.msk [vmem:[%s4628_s2 + $0xb8] sm:$0xff] %vm2531_vm0, %v2508_v26 }
 0x4f7   :  { %v2240_v49 = vpack.c.bf16 %v2208_v28, %v2208_v28 }
 0x4f9   :  { %v2417_v57 = vunpack.c.l.b16 %v2240_v49 }
 0x4fa   :  { %v2366_v56 = vpop.f32.mrf.mxu3 }
 0x4fb   :  { %2540 = vst.msk [vmem:[%s4628_s2 + $0x40] sm:$0xff] %vm2531_vm0, %v2366_v56  ;;  %v2425_v59 = vpack.c.b16 %v2417_v57, %v2416_v4 }
 0x4fd   :  { %v2511_v9 = vpop.f32.mrf.mxu1  ;;  %2525 = vmatmul.bf16.gmra.mxu1 %v2425_v59 }
 0x4fe   :  { %2556 = vst.msk [vmem:[%s4628_s2 + $0xc0] sm:$0xff] %vm2531_vm0, %v2511_v9 }
 0x502   :  { %v2368_v29 = vpop.f32.mrf.mxu3 }
 0x503   :  { %2541 = vst.msk [vmem:[%s4628_s2 + $0x48] sm:$0xff] %vm2531_vm0, %v2368_v29 }
 0x505   :  { %v2513_v2 = vpop.f32.mrf.mxu1 }
 0x506   :  { %2557 = vst.msk [vmem:[%s4628_s2 + $0xc8] sm:$0xff] %vm2531_vm0, %v2513_v2 }
 0x548   :  { %v2371_v8 = vpop.f32.mrf.mxu3 }
 0x549   :  { %2542 = vst.msk [vmem:[%s4628_s2 + $0x50] sm:$0xff] %vm2531_vm0, %v2371_v8 }
 0x54a   :  { %v2516_v23 = vpop.f32.mrf.mxu1 }
 0x54b   :  { %2558 = vst.msk [vmem:[%s4628_s2 + $0xd0] sm:$0xff] %vm2531_vm0, %v2516_v23 }
 0x550   :  { %v2373_v10 = vpop.f32.mrf.mxu3 }
 0x551   :  { %2543 = vst.msk [vmem:[%s4628_s2 + $0x58] sm:$0xff] %vm2531_vm0, %v2373_v10 }
 0x552   :  { %v2518_v40 = vpop.f32.mrf.mxu1 }
 0x553   :  { %2559 = vst.msk [vmem:[%s4628_s2 + $0xd8] sm:$0xff] %vm2531_vm0, %v2518_v40 }
 0x559   :  { %v2376_v36 = vpop.f32.mrf.mxu3 }
 0x55a   :  { %2544 = vst.msk [vmem:[%s4628_s2 + $0x60] sm:$0xff] %vm2531_vm0, %v2376_v36 }
 0x561   :  { %v2378_v47 = vpop.f32.mrf.mxu3 }
 0x562   :  { %2545 = vst.msk [vmem:[%s4628_s2 + $0x68] sm:$0xff] %vm2531_vm0, %v2378_v47 }
 0x563   :  { %v2521_v25 = vpop.f32.mrf.mxu1 }
 0x564   :  { %2560 = vst.msk [vmem:[%s4628_s2 + $0xe0] sm:$0xff] %vm2531_vm0, %v2521_v25 }
 0x56b   :  { %v2523_v14 = vpop.f32.mrf.mxu1 }
 0x56c   :  { %2561 = vst.msk [vmem:[%s4628_s2 + $0xe8] sm:$0xff] %vm2531_vm0, %v2523_v14 }
 0x572   :  { %v2381_v45 = vpop.f32.mrf.mxu3 }
 0x573   :  { %2546 = vst.msk [vmem:[%s4628_s2 + $0x70] sm:$0xff] %vm2531_vm0, %v2381_v45 }
 0x57a   :  { %v2383_v3 = vpop.f32.mrf.mxu3  ;;  %v2526_v35 = vpop.f32.mrf.mxu1 }
 0x57b   :  { %2547 = vst.msk [vmem:[%s4628_s2 + $0x78] sm:$0xff] %vm2531_vm0, %v2383_v3 }
 0x57c   :  { %2562 = vst.msk [vmem:[%s4628_s2 + $0xf0] sm:$0xff] %vm2531_vm0, %v2526_v35 }
 0x582   :  { %v2528_v61 = vpop.f32.mrf.mxu1 }
 0x583   :  { %2563 = vst.msk [vmem:[%s4628_s2 + $0xf8] sm:$0xff] %vm2531_vm0, %v2528_v61 }
 0x584   :  { %2568 = vsyncpa [#allocation3], 1 }
 0x585   :  { %2569 = vsyncpa [#allocation5], 1 }

</bundles_post_ra>
